<compile_context>
chip_gen: v5e
topology: v5e:2x2
jax: 0.10.0
libtpu: 0.0.40
codegen_flags: <defaults>
</compile_context>

<pallas_src>
import jax
import jax.numpy as jnp
from jax.experimental import pallas as pl
from jax.experimental.pallas import tpu as pltpu

# MLP layer widths (n_in defaults to 512 in the module).
N_IN = 512
DIMS = [N_IN, 512, 256, 128, 64, 32, 16, 8, 1]
NUM_LAYERS = len(DIMS) - 1          # 8 linear layers
BN_EPS = 1e-5                        # PyTorch BatchNorm1d default eps


def mlp_kernel(x_ref, *refs):
    """Whole-MLP hot path: 8 matmuls + bias/ReLU/BN/sigmoid fused in VMEM.

    refs layout: [w0, b0, w1, b1, ..., w7, b7, gamma, beta, mean, var, out]
    Weights / x are bf16 (MXU inputs); accumulation, biases, BN are f32.
    """
    ws_bs = refs[: 2 * NUM_LAYERS]
    gamma_ref, beta_ref, mean_ref, var_ref = refs[2 * NUM_LAYERS: 2 * NUM_LAYERS + 4]
    out_ref = refs[-1]

    h = x_ref[...]                                   # (TB, 512) bf16

    # Linear(n_in,512)+ReLU, Linear(512,256)+ReLU, Linear(256,128) (no ReLU yet)
    for li in range(3):
        w = ws_bs[2 * li][...]                       # bf16
        b = ws_bs[2 * li + 1][...]                   # f32
        h = jnp.dot(h, w, preferred_element_type=jnp.float32) + b
        if li < 2:
            h = jnp.maximum(h, 0.0).astype(jnp.bfloat16)

    # BatchNorm1d(128) in eval mode (running stats), then ReLU — all in f32.
    inv_std = jax.lax.rsqrt(var_ref[...] + BN_EPS)
    h = (h - mean_ref[...]) * inv_std * gamma_ref[...] + beta_ref[...]
    h = jnp.maximum(h, 0.0).astype(jnp.bfloat16)

    # Linear(128,64)+ReLU ... Linear(8,1)  (no ReLU on the last layer)
    for li in range(3, NUM_LAYERS):
        w = ws_bs[2 * li][...]
        b = ws_bs[2 * li + 1][...]
        h = jnp.dot(h, w, preferred_element_type=jnp.float32) + b
        if li < NUM_LAYERS - 1:
            h = jnp.maximum(h, 0.0).astype(jnp.bfloat16)

    # Sigmoid (f32).
    out_ref[...] = (1.0 / (1.0 + jnp.exp(-h))).astype(out_ref.dtype)


def init_params(key):
    """Deterministic synthetic f32 parameters matching the module's layer shapes."""
    params = []
    for li in range(NUM_LAYERS):
        fan_in, fan_out = DIMS[li], DIMS[li + 1]
        key, kw, kb = jax.random.split(key, 3)
        bound = 1.0 / jnp.sqrt(fan_in)
        w = jax.random.uniform(kw, (fan_in, fan_out), jnp.float32, -bound, bound)
        b = jax.random.uniform(kb, (1, fan_out), jnp.float32, -bound, bound)
        params += [w, b]
    # BatchNorm1d(128): affine params + running stats (freshly-initialized values).
    bn_dim = 128
    gamma = jnp.ones((1, bn_dim), jnp.float32)
    beta = jnp.zeros((1, bn_dim), jnp.float32)
    running_mean = jnp.zeros((1, bn_dim), jnp.float32)
    running_var = jnp.ones((1, bn_dim), jnp.float32)
    params += [gamma, beta, running_mean, running_var]
    return params


def predictor_forward(x, params, *, tb=None):
    """Wrapper: pads + tiles the batch over a parallel grid, weights resident."""
    B, n_in = x.shape
    assert n_in == N_IN

    # Large, MXU-aligned batch tile; 256 matches v6e/v7x 2x256x256 MXU geometry,
    # 128 floor keeps small batches cheap.  Pad B up instead of asserting.
    if tb is None:
        tb = 256 if B >= 512 else 128
    num_tiles = -(-B // tb)
    b_pad = num_tiles * tb
    if b_pad != B:
        x = jnp.pad(x, ((0, b_pad - B), (0, 0)))

    # bf16 MXU inputs (x + weight matrices); biases / BN params stay f32.
    x_in = x.astype(jnp.bfloat16)
    kernel_params = []
    for li in range(NUM_LAYERS):
        kernel_params.append(params[2 * li].astype(jnp.bfloat16))   # W
        kernel_params.append(params[2 * li + 1])                     # b (f32)
    kernel_params += list(params[2 * NUM_LAYERS:])                   # BN (f32)

    full_spec = lambda arr: pl.BlockSpec(arr.shape, lambda i: (0, 0))
    in_specs = [pl.BlockSpec((tb, N_IN), lambda i: (i, 0))]          # x tile
    in_specs += [full_spec(p) for p in kernel_params]                # weights/BN

    flops = 2 * b_pad * sum(DIMS[i] * DIMS[i + 1] for i in range(NUM_LAYERS))
    bytes_accessed = (
        x_in.size * x_in.dtype.itemsize
        + sum(int(p.size) * p.dtype.itemsize for p in kernel_params)
        + b_pad * 4
    )
    cost = pl.CostEstimate(flops=flops, transcendentals=b_pad,
                           bytes_accessed=bytes_accessed)

    out = pl.pallas_call(
        mlp_kernel,
        out_shape=jax.ShapeDtypeStruct((b_pad, 1), jnp.float32),
        grid_spec=pltpu.PrefetchScalarGridSpec(
            num_scalar_prefetch=0,
            grid=(num_tiles,),
            in_specs=in_specs,
            out_specs=pl.BlockSpec((tb, 1), lambda i: (i, 0)),
        ),
        compiler_params=pltpu.CompilerParams(
            dimension_semantics=("parallel",),
            vmem_limit_bytes=32 * 1024 * 1024,
        ),
        cost_estimate=cost,
    )(x_in, *kernel_params)

    return out[:B]


def predictor_forward_ref(x, params):
    """Pure-JAX f32 reference for correctness checking."""
    ws_bs = params[: 2 * NUM_LAYERS]
    gamma, beta, mean, var = params[2 * NUM_LAYERS:]
    h = x
    for li in range(3):
        h = h @ ws_bs[2 * li] + ws_bs[2 * li + 1]
        if li < 2:
            h = jnp.maximum(h, 0.0)
    h = (h - mean) * jax.lax.rsqrt(var + BN_EPS) * gamma + beta
    h = jnp.maximum(h, 0.0)
    for li in range(3, NUM_LAYERS):
        h = h @ ws_bs[2 * li] + ws_bs[2 * li + 1]
        if li < NUM_LAYERS - 1:
            h = jnp.maximum(h, 0.0)
    return jax.nn.sigmoid(h)


if __name__ == "__main__":
    key = jax.random.PRNGKey(0)
    key, kx = jax.random.split(key)

    B = 16  # small batch of difference-vectors (wrapper pads to the tile size)
    x = jax.random.normal(kx, (B, N_IN), jnp.float32)
    params = init_params(key)

    out = predictor_forward(x, params)
    out = jax.block_until_ready(out)

    ref = predictor_forward_ref(x, params)
    assert out.shape == (B, 1)
    # bf16 matmul inputs with f32 accumulation -> relaxed tolerance on the
    # sigmoid output vs. the f32 reference.
    assert jnp.allclose(out, ref, atol=2e-2), float(jnp.max(jnp.abs(out - ref)))

    print("KERNEL_OK")
</pallas_src>

<mosaic_0001>
module attributes {stable_mosaic.version = 11 : i64} {
  func.func @mlp_kernel(%arg0: i32, %arg1: memref<128x512xbf16, #tpu.memory_space<vmem>>, %arg2: memref<512x512xbf16, #tpu.memory_space<vmem>>, %arg3: memref<1x512xf32, #tpu.memory_space<vmem>>, %arg4: memref<512x256xbf16, #tpu.memory_space<vmem>>, %arg5: memref<1x256xf32, #tpu.memory_space<vmem>>, %arg6: memref<256x128xbf16, #tpu.memory_space<vmem>>, %arg7: memref<1x128xf32, #tpu.memory_space<vmem>>, %arg8: memref<128x64xbf16, #tpu.memory_space<vmem>>, %arg9: memref<1x64xf32, #tpu.memory_space<vmem>>, %arg10: memref<64x32xbf16, #tpu.memory_space<vmem>>, %arg11: memref<1x32xf32, #tpu.memory_space<vmem>>, %arg12: memref<32x16xbf16, #tpu.memory_space<vmem>>, %arg13: memref<1x16xf32, #tpu.memory_space<vmem>>, %arg14: memref<16x8xbf16, #tpu.memory_space<vmem>>, %arg15: memref<1x8xf32, #tpu.memory_space<vmem>>, %arg16: memref<8x1xbf16, #tpu.memory_space<vmem>>, %arg17: memref<1x1xf32, #tpu.memory_space<vmem>>, %arg18: memref<1x128xf32, #tpu.memory_space<vmem>>, %arg19: memref<1x128xf32, #tpu.memory_space<vmem>>, %arg20: memref<1x128xf32, #tpu.memory_space<vmem>>, %arg21: memref<1x128xf32, #tpu.memory_space<vmem>>, %arg22: memref<128x1xf32, #tpu.memory_space<vmem>>) attributes {dimension_semantics = [#tpu.dimension_semantics<parallel>], iteration_bounds = array<i64: 1>, scalar_prefetch = 0 : i64, scratch_operands = 0 : i64, tpu.core_type = #tpu.core_type<tc>, window_params = [{transform_indices = @transform_0, window_bounds = array<i64: 128, 512>}, {pipeline_mode = #tpu.pipeline_mode<synchronous>, transform_indices = @transform_1, window_bounds = array<i64: 512, 512>}, {pipeline_mode = #tpu.pipeline_mode<synchronous>, transform_indices = @transform_2, window_bounds = array<i64: 1, 512>}, {pipeline_mode = #tpu.pipeline_mode<synchronous>, transform_indices = @transform_3, window_bounds = array<i64: 512, 256>}, {pipeline_mode = #tpu.pipeline_mode<synchronous>, transform_indices = @transform_4, window_bounds = array<i64: 1, 256>}, {pipeline_mode = #tpu.pipeline_mode<synchronous>, transform_indices = @transform_5, window_bounds = array<i64: 256, 128>}, {pipeline_mode = #tpu.pipeline_mode<synchronous>, transform_indices = @transform_6, window_bounds = array<i64: 1, 128>}, {pipeline_mode = #tpu.pipeline_mode<synchronous>, transform_indices = @transform_7, window_bounds = array<i64: 128, 64>}, {pipeline_mode = #tpu.pipeline_mode<synchronous>, transform_indices = @transform_8, window_bounds = array<i64: 1, 64>}, {pipeline_mode = #tpu.pipeline_mode<synchronous>, transform_indices = @transform_9, window_bounds = array<i64: 64, 32>}, {pipeline_mode = #tpu.pipeline_mode<synchronous>, transform_indices = @transform_10, window_bounds = array<i64: 1, 32>}, {pipeline_mode = #tpu.pipeline_mode<synchronous>, transform_indices = @transform_11, window_bounds = array<i64: 32, 16>}, {pipeline_mode = #tpu.pipeline_mode<synchronous>, transform_indices = @transform_12, window_bounds = array<i64: 1, 16>}, {pipeline_mode = #tpu.pipeline_mode<synchronous>, transform_indices = @transform_13, window_bounds = array<i64: 16, 8>}, {pipeline_mode = #tpu.pipeline_mode<synchronous>, transform_indices = @transform_14, window_bounds = array<i64: 1, 8>}, {pipeline_mode = #tpu.pipeline_mode<synchronous>, transform_indices = @transform_15, window_bounds = array<i64: 8, 1>}, {pipeline_mode = #tpu.pipeline_mode<synchronous>, transform_indices = @transform_16, window_bounds = array<i64: 1, 1>}, {pipeline_mode = #tpu.pipeline_mode<synchronous>, transform_indices = @transform_17, window_bounds = array<i64: 1, 128>}, {pipeline_mode = #tpu.pipeline_mode<synchronous>, transform_indices = @transform_18, window_bounds = array<i64: 1, 128>}, {pipeline_mode = #tpu.pipeline_mode<synchronous>, transform_indices = @transform_19, window_bounds = array<i64: 1, 128>}, {pipeline_mode = #tpu.pipeline_mode<synchronous>, transform_indices = @transform_20, window_bounds = array<i64: 1, 128>}, {transform_indices = @transform_21, window_bounds = array<i64: 128, 1>}]} {
    %c0 = arith.constant 0 : index
    %c0_0 = arith.constant 0 : index
    %0 = vector.load %arg1[%c0, %c0_0] : memref<128x512xbf16, #tpu.memory_space<vmem>>, vector<128x512xbf16>
    %c0_1 = arith.constant 0 : index
    %c0_2 = arith.constant 0 : index
    %1 = vector.load %arg2[%c0_1, %c0_2] : memref<512x512xbf16, #tpu.memory_space<vmem>>, vector<512x512xbf16>
    %c0_3 = arith.constant 0 : index
    %c0_4 = arith.constant 0 : index
    %2 = vector.load %arg3[%c0_3, %c0_4] : memref<1x512xf32, #tpu.memory_space<vmem>>, vector<1x512xf32>
    %cst = arith.constant dense<0.000000e+00> : vector<128x512xf32>
    %3 = tpu.matmul %0, %1, %cst {dimension_numbers = #tpu.dot_dimension_numbers<[1], [0], [0], [1], [0, 0, 1, 1], [], []>} : vector<128x512xbf16>, vector<512x512xbf16>, vector<128x512xf32> -> vector<128x512xf32>
    %4 = vector.broadcast %2 : vector<1x512xf32> to vector<128x512xf32>
    %5 = arith.addf %3, %4 : vector<128x512xf32>
    %cst_5 = arith.constant 0.000000e+00 : f32
    %6 = vector.broadcast %cst_5 : f32 to vector<128x512xf32>
    %7 = arith.maximumf %5, %6 : vector<128x512xf32>
    %8 = arith.truncf %7 : vector<128x512xf32> to vector<128x512xbf16>
    %c0_6 = arith.constant 0 : index
    %c0_7 = arith.constant 0 : index
    %9 = vector.load %arg4[%c0_6, %c0_7] : memref<512x256xbf16, #tpu.memory_space<vmem>>, vector<512x256xbf16>
    %c0_8 = arith.constant 0 : index
    %c0_9 = arith.constant 0 : index
    %10 = vector.load %arg5[%c0_8, %c0_9] : memref<1x256xf32, #tpu.memory_space<vmem>>, vector<1x256xf32>
    %cst_10 = arith.constant dense<0.000000e+00> : vector<128x256xf32>
    %11 = tpu.matmul %8, %9, %cst_10 {dimension_numbers = #tpu.dot_dimension_numbers<[1], [0], [0], [1], [0, 0, 1, 1], [], []>} : vector<128x512xbf16>, vector<512x256xbf16>, vector<128x256xf32> -> vector<128x256xf32>
    %12 = vector.broadcast %10 : vector<1x256xf32> to vector<128x256xf32>
    %13 = arith.addf %11, %12 : vector<128x256xf32>
    %cst_11 = arith.constant 0.000000e+00 : f32
    %14 = vector.broadcast %cst_11 : f32 to vector<128x256xf32>
    %15 = arith.maximumf %13, %14 : vector<128x256xf32>
    %16 = arith.truncf %15 : vector<128x256xf32> to vector<128x256xbf16>
    %c0_12 = arith.constant 0 : index
    %c0_13 = arith.constant 0 : index
    %17 = vector.load %arg6[%c0_12, %c0_13] : memref<256x128xbf16, #tpu.memory_space<vmem>>, vector<256x128xbf16>
    %c0_14 = arith.constant 0 : index
    %c0_15 = arith.constant 0 : index
    %18 = vector.load %arg7[%c0_14, %c0_15] : memref<1x128xf32, #tpu.memory_space<vmem>>, vector<1x128xf32>
    %cst_16 = arith.constant dense<0.000000e+00> : vector<128x128xf32>
    %19 = tpu.matmul %16, %17, %cst_16 {dimension_numbers = #tpu.dot_dimension_numbers<[1], [0], [0], [1], [0, 0, 1, 1], [], []>} : vector<128x256xbf16>, vector<256x128xbf16>, vector<128x128xf32> -> vector<128x128xf32>
    %20 = vector.broadcast %18 : vector<1x128xf32> to vector<128x128xf32>
    %21 = arith.addf %19, %20 : vector<128x128xf32>
    %c0_17 = arith.constant 0 : index
    %c0_18 = arith.constant 0 : index
    %22 = vector.load %arg21[%c0_17, %c0_18] : memref<1x128xf32, #tpu.memory_space<vmem>>, vector<1x128xf32>
    %cst_19 = arith.constant 9.99999974E-6 : f32
    %23 = vector.broadcast %cst_19 : f32 to vector<1x128xf32>
    %24 = arith.addf %22, %23 : vector<1x128xf32>
    %25 = math.rsqrt %24 : vector<1x128xf32>
    %c0_20 = arith.constant 0 : index
    %c0_21 = arith.constant 0 : index
    %26 = vector.load %arg20[%c0_20, %c0_21] : memref<1x128xf32, #tpu.memory_space<vmem>>, vector<1x128xf32>
    %27 = vector.broadcast %26 : vector<1x128xf32> to vector<128x128xf32>
    %28 = arith.subf %21, %27 : vector<128x128xf32>
    %29 = vector.broadcast %25 : vector<1x128xf32> to vector<128x128xf32>
    %30 = arith.mulf %28, %29 : vector<128x128xf32>
    %c0_22 = arith.constant 0 : index
    %c0_23 = arith.constant 0 : index
    %31 = vector.load %arg18[%c0_22, %c0_23] : memref<1x128xf32, #tpu.memory_space<vmem>>, vector<1x128xf32>
    %32 = vector.broadcast %31 : vector<1x128xf32> to vector<128x128xf32>
    %33 = arith.mulf %30, %32 : vector<128x128xf32>
    %c0_24 = arith.constant 0 : index
    %c0_25 = arith.constant 0 : index
    %34 = vector.load %arg19[%c0_24, %c0_25] : memref<1x128xf32, #tpu.memory_space<vmem>>, vector<1x128xf32>
    %35 = vector.broadcast %34 : vector<1x128xf32> to vector<128x128xf32>
    %36 = arith.addf %33, %35 : vector<128x128xf32>
    %cst_26 = arith.constant 0.000000e+00 : f32
    %37 = vector.broadcast %cst_26 : f32 to vector<128x128xf32>
    %38 = arith.maximumf %36, %37 : vector<128x128xf32>
    %39 = arith.truncf %38 : vector<128x128xf32> to vector<128x128xbf16>
    %c0_27 = arith.constant 0 : index
    %c0_28 = arith.constant 0 : index
    %40 = vector.load %arg8[%c0_27, %c0_28] : memref<128x64xbf16, #tpu.memory_space<vmem>>, vector<128x64xbf16>
    %c0_29 = arith.constant 0 : index
    %c0_30 = arith.constant 0 : index
    %41 = vector.load %arg9[%c0_29, %c0_30] : memref<1x64xf32, #tpu.memory_space<vmem>>, vector<1x64xf32>
    %cst_31 = arith.constant dense<0.000000e+00> : vector<128x64xf32>
    %42 = tpu.matmul %39, %40, %cst_31 {dimension_numbers = #tpu.dot_dimension_numbers<[1], [0], [0], [1], [0, 0, 1, 1], [], []>} : vector<128x128xbf16>, vector<128x64xbf16>, vector<128x64xf32> -> vector<128x64xf32>
    %43 = vector.broadcast %41 : vector<1x64xf32> to vector<128x64xf32>
    %44 = arith.addf %42, %43 : vector<128x64xf32>
    %cst_32 = arith.constant 0.000000e+00 : f32
    %45 = vector.broadcast %cst_32 : f32 to vector<128x64xf32>
    %46 = arith.maximumf %44, %45 : vector<128x64xf32>
    %47 = arith.truncf %46 : vector<128x64xf32> to vector<128x64xbf16>
    %c0_33 = arith.constant 0 : index
    %c0_34 = arith.constant 0 : index
    %48 = vector.load %arg10[%c0_33, %c0_34] : memref<64x32xbf16, #tpu.memory_space<vmem>>, vector<64x32xbf16>
    %c0_35 = arith.constant 0 : index
    %c0_36 = arith.constant 0 : index
    %49 = vector.load %arg11[%c0_35, %c0_36] : memref<1x32xf32, #tpu.memory_space<vmem>>, vector<1x32xf32>
    %cst_37 = arith.constant dense<0.000000e+00> : vector<128x32xf32>
    %50 = tpu.matmul %47, %48, %cst_37 {dimension_numbers = #tpu.dot_dimension_numbers<[1], [0], [0], [1], [0, 0, 1, 1], [], []>} : vector<128x64xbf16>, vector<64x32xbf16>, vector<128x32xf32> -> vector<128x32xf32>
    %51 = vector.broadcast %49 : vector<1x32xf32> to vector<128x32xf32>
    %52 = arith.addf %50, %51 : vector<128x32xf32>
    %cst_38 = arith.constant 0.000000e+00 : f32
    %53 = vector.broadcast %cst_38 : f32 to vector<128x32xf32>
    %54 = arith.maximumf %52, %53 : vector<128x32xf32>
    %55 = arith.truncf %54 : vector<128x32xf32> to vector<128x32xbf16>
    %c0_39 = arith.constant 0 : index
    %c0_40 = arith.constant 0 : index
    %56 = vector.load %arg12[%c0_39, %c0_40] : memref<32x16xbf16, #tpu.memory_space<vmem>>, vector<32x16xbf16>
    %c0_41 = arith.constant 0 : index
    %c0_42 = arith.constant 0 : index
    %57 = vector.load %arg13[%c0_41, %c0_42] : memref<1x16xf32, #tpu.memory_space<vmem>>, vector<1x16xf32>
    %cst_43 = arith.constant dense<0.000000e+00> : vector<128x16xf32>
    %58 = tpu.matmul %55, %56, %cst_43 {dimension_numbers = #tpu.dot_dimension_numbers<[1], [0], [0], [1], [0, 0, 1, 1], [], []>} : vector<128x32xbf16>, vector<32x16xbf16>, vector<128x16xf32> -> vector<128x16xf32>
    %59 = vector.broadcast %57 : vector<1x16xf32> to vector<128x16xf32>
    %60 = arith.addf %58, %59 : vector<128x16xf32>
    %cst_44 = arith.constant 0.000000e+00 : f32
    %61 = vector.broadcast %cst_44 : f32 to vector<128x16xf32>
    %62 = arith.maximumf %60, %61 : vector<128x16xf32>
    %63 = arith.truncf %62 : vector<128x16xf32> to vector<128x16xbf16>
    %c0_45 = arith.constant 0 : index
    %c0_46 = arith.constant 0 : index
    %64 = vector.load %arg14[%c0_45, %c0_46] : memref<16x8xbf16, #tpu.memory_space<vmem>>, vector<16x8xbf16>
    %c0_47 = arith.constant 0 : index
    %c0_48 = arith.constant 0 : index
    %65 = vector.load %arg15[%c0_47, %c0_48] : memref<1x8xf32, #tpu.memory_space<vmem>>, vector<1x8xf32>
    %cst_49 = arith.constant dense<0.000000e+00> : vector<128x8xf32>
    %66 = tpu.matmul %63, %64, %cst_49 {dimension_numbers = #tpu.dot_dimension_numbers<[1], [0], [0], [1], [0, 0, 1, 1], [], []>} : vector<128x16xbf16>, vector<16x8xbf16>, vector<128x8xf32> -> vector<128x8xf32>
    %67 = vector.broadcast %65 : vector<1x8xf32> to vector<128x8xf32>
    %68 = arith.addf %66, %67 : vector<128x8xf32>
    %cst_50 = arith.constant 0.000000e+00 : f32
    %69 = vector.broadcast %cst_50 : f32 to vector<128x8xf32>
    %70 = arith.maximumf %68, %69 : vector<128x8xf32>
    %71 = arith.truncf %70 : vector<128x8xf32> to vector<128x8xbf16>
    %c0_51 = arith.constant 0 : index
    %c0_52 = arith.constant 0 : index
    %72 = vector.load %arg16[%c0_51, %c0_52] : memref<8x1xbf16, #tpu.memory_space<vmem>>, vector<8x1xbf16>
    %c0_53 = arith.constant 0 : index
    %c0_54 = arith.constant 0 : index
    %73 = vector.load %arg17[%c0_53, %c0_54] : memref<1x1xf32, #tpu.memory_space<vmem>>, vector<1x1xf32>
    %cst_55 = arith.constant dense<0.000000e+00> : vector<128x1xf32>
    %74 = tpu.matmul %71, %72, %cst_55 {dimension_numbers = #tpu.dot_dimension_numbers<[1], [0], [0], [1], [0, 0, 1, 1], [], []>} : vector<128x8xbf16>, vector<8x1xbf16>, vector<128x1xf32> -> vector<128x1xf32>
    %75 = vector.broadcast %73 : vector<1x1xf32> to vector<128x1xf32>
    %76 = arith.addf %74, %75 : vector<128x1xf32>
    %cst_56 = arith.constant 0.000000e+00 : f32
    %77 = vector.broadcast %cst_56 : f32 to vector<128x1xf32>
    %78 = arith.subf %77, %76 : vector<128x1xf32>
    %79 = math.exp %78 : vector<128x1xf32>
    %cst_57 = arith.constant 1.000000e+00 : f32
    %80 = vector.broadcast %cst_57 : f32 to vector<128x1xf32>
    %81 = arith.addf %80, %79 : vector<128x1xf32>
    %cst_58 = arith.constant 1.000000e+00 : f32
    %82 = vector.broadcast %cst_58 : f32 to vector<128x1xf32>
    %83 = arith.divf %82, %81 : vector<128x1xf32>
    %c0_59 = arith.constant 0 : index
    %c0_60 = arith.constant 0 : index
    %84 = vector.load %arg22[%c0_59, %c0_60] : memref<128x1xf32, #tpu.memory_space<vmem>>, vector<128x1xf32>
    tpu.vector_store %arg22[%c0_59, %c0_60], %83 {strides = array<i32>} : memref<128x1xf32, #tpu.memory_space<vmem>>, vector<128x1xf32>,
    return
  }
  func.func @transform_0(%arg0: i32) -> (i32, i32) {
    %c0_i32 = arith.constant 0 : i32
    %c0_i32_0 = arith.constant 0 : i32
    return %arg0, %c0_i32 : i32, i32
  }
  func.func @transform_1(%arg0: i32) -> (i32, i32) {
    %c0_i32 = arith.constant 0 : i32
    %c0_i32_0 = arith.constant 0 : i32
    %c0_i32_1 = arith.constant 0 : i32
    return %c0_i32, %c0_i32_0 : i32, i32
  }
  func.func @transform_2(%arg0: i32) -> (i32, i32) {
    %c0_i32 = arith.constant 0 : i32
    %c0_i32_0 = arith.constant 0 : i32
    %c0_i32_1 = arith.constant 0 : i32
    return %c0_i32, %c0_i32_0 : i32, i32
  }
  func.func @transform_3(%arg0: i32) -> (i32, i32) {
    %c0_i32 = arith.constant 0 : i32
    %c0_i32_0 = arith.constant 0 : i32
    %c0_i32_1 = arith.constant 0 : i32
    return %c0_i32, %c0_i32_0 : i32, i32
  }
  func.func @transform_4(%arg0: i32) -> (i32, i32) {
    %c0_i32 = arith.constant 0 : i32
    %c0_i32_0 = arith.constant 0 : i32
    %c0_i32_1 = arith.constant 0 : i32
    return %c0_i32, %c0_i32_0 : i32, i32
  }
  func.func @transform_5(%arg0: i32) -> (i32, i32) {
    %c0_i32 = arith.constant 0 : i32
    %c0_i32_0 = arith.constant 0 : i32
    %c0_i32_1 = arith.constant 0 : i32
    return %c0_i32, %c0_i32_0 : i32, i32
  }
  func.func @transform_6(%arg0: i32) -> (i32, i32) {
    %c0_i32 = arith.constant 0 : i32
    %c0_i32_0 = arith.constant 0 : i32
    %c0_i32_1 = arith.constant 0 : i32
    return %c0_i32, %c0_i32_0 : i32, i32
  }
  func.func @transform_7(%arg0: i32) -> (i32, i32) {
    %c0_i32 = arith.constant 0 : i32
    %c0_i32_0 = arith.constant 0 : i32
    %c0_i32_1 = arith.constant 0 : i32
    return %c0_i32, %c0_i32_0 : i32, i32
  }
  func.func @transform_8(%arg0: i32) -> (i32, i32) {
    %c0_i32 = arith.constant 0 : i32
    %c0_i32_0 = arith.constant 0 : i32
    %c0_i32_1 = arith.constant 0 : i32
    return %c0_i32, %c0_i32_0 : i32, i32
  }
  func.func @transform_9(%arg0: i32) -> (i32, i32) {
    %c0_i32 = arith.constant 0 : i32
    %c0_i32_0 = arith.constant 0 : i32
    %c0_i32_1 = arith.constant 0 : i32
    return %c0_i32, %c0_i32_0 : i32, i32
  }
  func.func @transform_10(%arg0: i32) -> (i32, i32) {
    %c0_i32 = arith.constant 0 : i32
    %c0_i32_0 = arith.constant 0 : i32
    %c0_i32_1 = arith.constant 0 : i32
    return %c0_i32, %c0_i32_0 : i32, i32
  }
  func.func @transform_11(%arg0: i32) -> (i32, i32) {
    %c0_i32 = arith.constant 0 : i32
    %c0_i32_0 = arith.constant 0 : i32
    %c0_i32_1 = arith.constant 0 : i32
    return %c0_i32, %c0_i32_0 : i32, i32
  }
  func.func @transform_12(%arg0: i32) -> (i32, i32) {
    %c0_i32 = arith.constant 0 : i32
    %c0_i32_0 = arith.constant 0 : i32
    %c0_i32_1 = arith.constant 0 : i32
    return %c0_i32, %c0_i32_0 : i32, i32
  }
  func.func @transform_13(%arg0: i32) -> (i32, i32) {
    %c0_i32 = arith.constant 0 : i32
    %c0_i32_0 = arith.constant 0 : i32
    %c0_i32_1 = arith.constant 0 : i32
    return %c0_i32, %c0_i32_0 : i32, i32
  }
  func.func @transform_14(%arg0: i32) -> (i32, i32) {
    %c0_i32 = arith.constant 0 : i32
    %c0_i32_0 = arith.constant 0 : i32
    %c0_i32_1 = arith.constant 0 : i32
    return %c0_i32, %c0_i32_0 : i32, i32
  }
  func.func @transform_15(%arg0: i32) -> (i32, i32) {
    %c0_i32 = arith.constant 0 : i32
    %c0_i32_0 = arith.constant 0 : i32
    %c0_i32_1 = arith.constant 0 : i32
    return %c0_i32, %c0_i32_0 : i32, i32
  }
  func.func @transform_16(%arg0: i32) -> (i32, i32) {
    %c0_i32 = arith.constant 0 : i32
    %c0_i32_0 = arith.constant 0 : i32
    %c0_i32_1 = arith.constant 0 : i32
    return %c0_i32, %c0_i32_0 : i32, i32
  }
  func.func @transform_17(%arg0: i32) -> (i32, i32) {
    %c0_i32 = arith.constant 0 : i32
    %c0_i32_0 = arith.constant 0 : i32
    %c0_i32_1 = arith.constant 0 : i32
    return %c0_i32, %c0_i32_0 : i32, i32
  }
  func.func @transform_18(%arg0: i32) -> (i32, i32) {
    %c0_i32 = arith.constant 0 : i32
    %c0_i32_0 = arith.constant 0 : i32
    %c0_i32_1 = arith.constant 0 : i32
    return %c0_i32, %c0_i32_0 : i32, i32
  }
  func.func @transform_19(%arg0: i32) -> (i32, i32) {
    %c0_i32 = arith.constant 0 : i32
    %c0_i32_0 = arith.constant 0 : i32
    %c0_i32_1 = arith.constant 0 : i32
    return %c0_i32, %c0_i32_0 : i32, i32
  }
  func.func @transform_20(%arg0: i32) -> (i32, i32) {
    %c0_i32 = arith.constant 0 : i32
    %c0_i32_0 = arith.constant 0 : i32
    %c0_i32_1 = arith.constant 0 : i32
    return %c0_i32, %c0_i32_0 : i32, i32
  }
  func.func @transform_21(%arg0: i32) -> (i32, i32) {
    %c0_i32 = arith.constant 0 : i32
    %c0_i32_0 = arith.constant 0 : i32
    return %arg0, %c0_i32 : i32, i32
  }
}

</mosaic_0001>

<bundles_post_ra>
// kernel: tpu_custom_call.1
= control target key start
LH: loop header
LB: loop body
LE: loop exit
PB: predicated region body
PF: predicated region fallthrough
CT: control target
= control target key end

     0   :  { %s6887_s0 = inlined_call_operand.hbm [shape: bf16[128,512], index: 0, kind: input, shape index: {}]   ;;  %s6888_s1 = inlined_call_operand.hbm [shape: bf16[512,512], index: 1, kind: input, shape index: {}]   ;;  %s6889_s2 = inlined_call_operand.vmem [shape: f32[1,512], index: 2, kind: input, shape index: {}]   ;;  %s6890_s3 = inlined_call_operand.hbm [shape: bf16[512,256], index: 3, kind: input, shape index: {}]   ;;  %s6891_s4 = inlined_call_operand.vmem [shape: f32[1,256], index: 4, kind: input, shape index: {}]   ;;  %s6892_s5 = inlined_call_operand.vmem [shape: bf16[256,128], index: 5, kind: input, shape index: {}]   ;;  %s6893_s6 = inlined_call_operand.vmem [shape: f32[1,128], index: 6, kind: input, shape index: {}]   ;;  %s6894_s7 = inlined_call_operand.vmem [shape: bf16[128,64], index: 7, kind: input, shape index: {}]   ;;  %s6895_s8 = inlined_call_operand.vmem [shape: f32[1,64], index: 8, kind: input, shape index: {}]   ;;  %s6896_s9 = inlined_call_operand.vmem [shape: bf16[64,32], index: 9, kind: input, shape index: {}]   ;;  %s6897_s10 = inlined_call_operand.vmem [shape: f32[1,32], index: 10, kind: input, shape index: {}]   ;;  %s6898_s11 = inlined_call_operand.vmem [shape: bf16[32,16], index: 11, kind: input, shape index: {}]   ;;  %s6899_s12 = inlined_call_operand.vmem [shape: f32[1,16], index: 12, kind: input, shape index: {}]   ;;  %s6900_s13 = inlined_call_operand.vmem [shape: bf16[16,8], index: 13, kind: input, shape index: {}]   ;;  %s6901_s14 = inlined_call_operand.vmem [shape: f32[1,8], index: 14, kind: input, shape index: {}]   ;;  %s6902_s15 = inlined_call_operand.vmem [shape: bf16[8,1], index: 15, kind: input, shape index: {}]   ;;  %s6903_s16 = inlined_call_operand.<no memory space> [shape: f32[1,1], index: 16, kind: input, shape index: {}]   ;;  %s6904_s17 = inlined_call_operand.vmem [shape: f32[1,128], index: 17, kind: input, shape index: {}]   ;;  %s6905_s18 = inlined_call_operand.vmem [shape: f32[1,128], index: 18, kind: input, shape index: {}]   ;;  %s6906_s19 = inlined_call_operand.vmem [shape: f32[1,128], index: 19, kind: input, shape index: {}]   ;;  %s6907_s20 = inlined_call_operand.vmem [shape: f32[1,128], index: 20, kind: input, shape index: {}]   ;;  %s6908_s21 = inlined_call_operand.vmem [shape: f32[128,1], index: 21, kind: output, shape index: {}]  }
   0x1   :  { %6934 = sst [smem:[#allocation25_spill]] %s6887_s0  ;;  %v26_v0 = vstv %s6903_s16 }
   0x2   :  { %6935 = sst [smem:[#allocation26_spill]] %s6888_s1  ;;  %27 = vst [vmem:[#allocation2] sm:$0x1] %v26_v0 }
   0x3   :  { %6936 = sst [smem:[#allocation27_spill]] %s6889_s2 }
   0x4   :  { %6937 = sst [smem:[#allocation28_spill]] %s6890_s3 }
   0x5   :  { %6938 = sst [smem:[#allocation29_spill]] %s6891_s4 }
   0x6   :  { %6939 = sst [smem:[#allocation30_spill]] %s6892_s5 }
   0x7   :  { %6940 = sst [smem:[#allocation31_spill]] %s6901_s14 }
   0x8   :  { %6941 = sst [smem:[#allocation32_spill]] %s6908_s21 }
   0x9   :  { %28 = vsyncpa [#allocation4], 0 }
   0xa   :  { %29 = vsyncpa [#allocation6], 0  ;;  %s6942_s3 = sld [smem:[#allocation26_spill]]  ;;  %s5546_s29 = smov [#allocation5]  }
   0xb   :  { %s49_s0 = sshll.u32 %s5546_s29, 4  ;;  %s6943_s5 = sld [smem:[#allocation25_spill]]  ;;  %s50_s0 = int_to_ptr.vmem [resolvable:$true] %s49_s0 }
   0xc   :  { %s5547_s23 = smov 256   ;;  %s5548_s1 = smov 16  }
   0xd   :  { %s5549_s16 = smov [#allocation3]   ;;  %s6944_s21 = sld [smem:[#allocation28_spill]] }
   0xe   :  { %s36_s24 = sshll.u32 %s5549_s16, 4  ;;  %s5550_s26 = smov [#allocation7]   ;;  %s37_s24 = int_to_ptr.vmem [resolvable:$true] %s36_s24 }
   0xf   :  { %s64_s27 = sshll.u32 %s5550_s26, 4  ;;  %s5552_s29 = smov 8   ;;  %s65_s27 = int_to_ptr.vmem [resolvable:$true] %s64_s27 }
  0x10   :  { %s47_s28 = sshll.u32 %s6942_s3, 4  ;;  %s5551_s3 = smov 128   ;;  %s48_s28 = int_to_ptr.hbm [resolvable:$true] %s47_s28 }
  0x11   :  { %s34_s22 = sshll.u32 %s6943_s5, 4  ;;  %s35_s22 = int_to_ptr.hbm [resolvable:$true] %s34_s22 }
  0x12   :  { %55 = dma.hbm_to_vmem [thread:$0]  %s48_s28, 16384, %s50_s0, [#allocation6], %s5547_s23, %s5547_s23, %s5548_s1  }
  0x13   :  { %s62_s14 = sshll.u32 %s6944_s21, 4  ;;  %s63_s14 = int_to_ptr.hbm [resolvable:$true] %s62_s14 }
  0x14   :  { %42 = dma.hbm_to_vmem [thread:$0]  %s35_s22, 4096, %s37_s24, [#allocation4], %s5547_s23, %s5547_s23, %s5548_s1  }
  0x15   :  { %70 = dma.hbm_to_vmem [thread:$0]  %s63_s14, 8192, %s65_s27, [#allocation6], %s5551_s3, %s5551_s3, %s5552_s29  }
  0x16   :  { %5542 = dma.done.wait [#allocation4], 4096  }
  0x17   :  { %5543 = vsyncadd [#allocation4], 4294963200 }
  0x18   :  { %5544 = dma.done.wait [#allocation6], 24576  }
  0x19   :  { %5545 = vsyncadd [#allocation6], 4294942720  ;;  %v4298_v1 = vld [vmem:[#allocation5 + $0xe0] sm:$0xf]  ;;  %v5170_v2 = vld [vmem:[#allocation5 + $0xec] sm:$0xf0] }
  0x1a   :  { %v4426_v3 = vld [vmem:[#allocation5 + $0x1e0] sm:$0xf]  ;;  %v4299_v4 = vor.u32 %v5170_v2, %v4298_v1  ;;  %v5202_v5 = vld [vmem:[#allocation5 + $0x1ec] sm:$0xf0]  ;;  %s6952_s28 = sld [smem:[#allocation27_spill]]  ;;  %vm3320_vm3 = vcmask 523264  }
  0x1b   :  { %v4282_v6 = vld [vmem:[#allocation5 + $0xc0] sm:$0xf]  ;;  %v5166_v7 = vld [vmem:[#allocation5 + $0xcc] sm:$0xf0]  ;;  %v5675_v8 = vor.u32 %v5202_v5, %v4426_v3  ;;  %s6987_s22 = sld [smem:[#allocation29_spill]]  ;;  %vm3438_vm4 = vcmask 261120  }
  0x1c   :  { %v4410_v9 = vld [vmem:[#allocation5 + $0x1c0] sm:$0xf]  ;;  %v5198_v10 = vld [vmem:[#allocation5 + $0x1cc] sm:$0xf0]  ;;  %1088 = vmatpush.bf16.msra.mxu0 %v4299_v4  ;;  %5363 = vmatpush.bf16.msra.mxu3 %v4299_v4  ;;  %v4283_v12 = vor.u32 %v5166_v7, %v4282_v6  ;;  %s7002_s16 = sld [smem:[#allocation30_spill]]  ;;  %vm3676_vm5 = vcmask 1043456  }
  0x1d   :  { %v4554_v11 = vld [vmem:[#allocation5 + $0x2e0] sm:$0xf]  ;;  %v5234_v13 = vld [vmem:[#allocation5 + $0x2ec] sm:$0xf0]  ;;  %5371 = vmatpush.bf16.msra.mxu1 %v5675_v8  ;;  %v5678_v14 = vor.u32 %v5198_v10, %v4410_v9  ;;  %vm3548_vm6 = vcmask 130048   ;;  %vm3651_vm7 = vcmask 64512  }
  0x1e   :  { %v5680_v15 = vor.u32 %v5234_v13, %v4554_v11  ;;  %v4266_v16 = vld [vmem:[#allocation5 + $0xa0] sm:$0xf]  ;;  %v5162_v17 = vld [vmem:[#allocation5 + $0xac] sm:$0xf0]  ;;  %vm4033_vm11 = vcmask 7168  }
  0x1f   :  { %v4538_v18 = vld [vmem:[#allocation5 + $0x2c0] sm:$0xf]  ;;  %v5194_v20 = vld [vmem:[#allocation5 + $0x1ac] sm:$0xf0]  ;;  %v4267_v23 = vor.u32 %v5162_v17, %v4266_v16  ;;  %v4092_v16 = vld [vmem:[#allocation3 + $0x50] sm:$0xf0] }
  0x20   :  { %v4394_v19 = vld [vmem:[#allocation5 + $0x1a0] sm:$0xf]  ;;  %v5230_v21 = vld [vmem:[#allocation5 + $0x2cc] sm:$0xf0]  ;;  %5379 = vmatpush.bf16.msra.mxu2 %v5680_v15  ;;  %1089 = vmatpush.bf16.msra.mxu0 %v4283_v12 }
  0x21   :  { %v5683_v22 = vor.u32 %v5230_v21, %v4538_v18  ;;  %5364 = vmatpush.bf16.msra.mxu3 %v4283_v12  ;;  %v4522_v24 = vld [vmem:[#allocation5 + $0x2a0] sm:$0xf]  ;;  %v5226_v25 = vld [vmem:[#allocation5 + $0x2ac] sm:$0xf0]  ;;  %5372 = vmatpush.bf16.msra.mxu1 %v5678_v14  ;;  %v5686_v26 = vor.u32 %v5194_v20, %v4394_v19  ;;  %v5116_v12 = vld [vmem:[#allocation3 + $0x44] sm:$0xf] }
  0x22   :  { %v4250_v27 = vld [vmem:[#allocation5 + $0x80] sm:$0xf]  ;;  %v5158_v28 = vld [vmem:[#allocation5 + $0x8c] sm:$0xf0]  ;;  %v5689_v31 = vor.u32 %v5226_v25, %v4522_v24  ;;  %v5723_v25 = vor.u32 %v5116_v12, %v4092_v16 }
  0x23   :  { %v4378_v29 = vld [vmem:[#allocation5 + $0x180] sm:$0xf]  ;;  %v5190_v30 = vld [vmem:[#allocation5 + $0x18c] sm:$0xf0]  ;;  %v4251_v32 = vor.u32 %v5158_v28, %v4250_v27  ;;  %v4098_v28 = vld [vmem:[#allocation3 + $0x48] sm:$0xf] }
  0x24   :  { %5380 = vmatpush.bf16.msra.mxu2 %v5683_v22  ;;  %1090 = vmatpush.bf16.msra.mxu0 %v4267_v23  ;;  %v4506_v33 = vld [vmem:[#allocation5 + $0x280] sm:$0xf]  ;;  %v5222_v34 = vld [vmem:[#allocation5 + $0x28c] sm:$0xf0]  ;;  %v5692_v35 = vor.u32 %v5190_v30, %v4378_v29  ;;  %v5119_v29 = vld [vmem:[#allocation3 + $0x54] sm:$0xf0] }
  0x25   :  { %5365 = vmatpush.bf16.msra.mxu3 %v4267_v23  ;;  %5373 = vmatpush.bf16.msra.mxu1 %v5686_v26  ;;  %v4234_v36 = vld [vmem:[#allocation5 + $0x60] sm:$0xf]  ;;  %v5154_v37 = vld [vmem:[#allocation5 + $0x6c] sm:$0xf0]  ;;  %v5695_v40 = vor.u32 %v5222_v34, %v4506_v33  ;;  %v5731_v34 = vor.u32 %v5119_v29, %v4098_v28  ;;  %v5112_v29 = vld [vmem:[#allocation3 + $0x24] sm:$0xf] }
  0x26   :  { %v4362_v38 = vld [vmem:[#allocation5 + $0x160] sm:$0xf]  ;;  %v5186_v39 = vld [vmem:[#allocation5 + $0x16c] sm:$0xf0]  ;;  %v4235_v41 = vor.u32 %v5154_v37, %v4234_v36 }
  0x27   :  { %v4490_v42 = vld [vmem:[#allocation5 + $0x260] sm:$0xf]  ;;  %v5218_v43 = vld [vmem:[#allocation5 + $0x26c] sm:$0xf0]  ;;  %v5698_v44 = vor.u32 %v5186_v39, %v4362_v38 }
  0x28   :  { %5381 = vmatpush.bf16.msra.mxu2 %v5689_v31  ;;  %1091 = vmatpush.bf16.msra.mxu0 %v4251_v32  ;;  %v4218_v45 = vld [vmem:[#allocation5 + $0x40] sm:$0xf]  ;;  %v5150_v46 = vld [vmem:[#allocation5 + $0x4c] sm:$0xf0]  ;;  %v5701_v49 = vor.u32 %v5218_v43, %v4490_v42 }
  0x29   :  { %5366 = vmatpush.bf16.msra.mxu3 %v4251_v32  ;;  %5374 = vmatpush.bf16.msra.mxu1 %v5692_v35  ;;  %v4346_v47 = vld [vmem:[#allocation5 + $0x140] sm:$0xf]  ;;  %v5182_v48 = vld [vmem:[#allocation5 + $0x14c] sm:$0xf0]  ;;  %v4219_v50 = vor.u32 %v5150_v46, %v4218_v45  ;;  %v5120_v45 = vld [vmem:[#allocation3 + $0x64] sm:$0xf] }
  0x2a   :  { %v4474_v51 = vld [vmem:[#allocation5 + $0x240] sm:$0xf]  ;;  %v5214_v52 = vld [vmem:[#allocation5 + $0x24c] sm:$0xf0]  ;;  %v5704_v53 = vor.u32 %v5182_v48, %v4346_v47  ;;  %v4108_v46 = vld [vmem:[#allocation3 + $0x70] sm:$0xf0] }
  0x2b   :  { %v4202_v54 = vld [vmem:[#allocation5 + $0x20] sm:$0xf]  ;;  %v5146_v55 = vld [vmem:[#allocation5 + $0x2c] sm:$0xf0]  ;;  %v5707_v58 = vor.u32 %v5214_v52, %v4474_v51  ;;  %v5743_v48 = vor.u32 %v5120_v45, %v4108_v46  ;;  %v5123_v51 = vld [vmem:[#allocation3 + $0x74] sm:$0xf0] }
  0x2c   :  { %5382 = vmatpush.bf16.msra.mxu2 %v5695_v40  ;;  %1092 = vmatpush.bf16.msra.mxu0 %v4235_v41  ;;  %v4330_v56 = vld [vmem:[#allocation5 + $0x120] sm:$0xf]  ;;  %v5178_v57 = vld [vmem:[#allocation5 + $0x12c] sm:$0xf0]  ;;  %v4203_v63 = vor.u32 %v5146_v55, %v4202_v54  ;;  %v5232_v45 = vld [vmem:[#allocation5 + $0x2e4] sm:$0xf] }
  0x2d   :  { %5367 = vmatpush.bf16.msra.mxu3 %v4235_v41  ;;  %5375 = vmatpush.bf16.msra.mxu1 %v5698_v44  ;;  %v4186_v59 = vld [vmem:[#allocation5] sm:$0xf]  ;;  %v5142_v60 = vld [vmem:[#allocation5 + $0xc] sm:$0xf0]  ;;  %v5710_v4 = vor.u32 %v5178_v57, %v4330_v56  ;;  %6945 = vst [vmem:[#allocation10_spill] sm:$0xff] %v5743_v48 }
  0x2e   :  { %v4458_v61 = vld [vmem:[#allocation5 + $0x220] sm:$0xf]  ;;  %v5210_v62 = vld [vmem:[#allocation5 + $0x22c] sm:$0xf0]  ;;  %v4187_v9 = vor.u32 %v5142_v60, %v4186_v59  ;;  %v5108_v60 = vld [vmem:[#allocation3 + $0x4] sm:$0xf] }
  0x2f   :  { %v4314_v0 = vld [vmem:[#allocation5 + $0x100] sm:$0xf]  ;;  %v5174_v1 = vld [vmem:[#allocation5 + $0x10c] sm:$0xf0]  ;;  %v5713_v5 = vor.u32 %v5210_v62, %v4458_v61  ;;  %v4060_v61 = vld [vmem:[#allocation3 + $0x10] sm:$0xf0] }
  0x30   :  { %5383 = vmatpush.bf16.msra.mxu2 %v5701_v49  ;;  %1093 = vmatpush.bf16.msra.mxu0 %v4219_v50  ;;  %v4682_v2 = vld [vmem:[#allocation5 + $0x3e0] sm:$0xf]  ;;  %v5266_v3 = vld [vmem:[#allocation5 + $0x3ec] sm:$0xf0]  ;;  %v5716_v13 = vor.u32 %v5174_v1, %v4314_v0  ;;  %v5124_v62 = vld [vmem:[#allocation3 + $0x84] sm:$0xf] }
  0x31   :  { %5368 = vmatpush.bf16.msra.mxu3 %v4219_v50  ;;  %5376 = vmatpush.bf16.msra.mxu1 %v5704_v53  ;;  %v4058_v6 = vld [vmem:[#allocation3] sm:$0xf]  ;;  %v5110_v7 = vld [vmem:[#allocation3 + $0xc] sm:$0xf0]  ;;  %v4683_v17 = vor.u32 %v5266_v3, %v4682_v2  ;;  %v4114_v50 = vld [vmem:[#allocation3 + $0x68] sm:$0xf] }
  0x32   :  { %v4090_v10 = vld [vmem:[#allocation3 + $0x40] sm:$0xf]  ;;  %v5118_v11 = vld [vmem:[#allocation3 + $0x4c] sm:$0xf0]  ;;  %v5719_v23 = vor.u32 %v5110_v7, %v4058_v6  ;;  %v4130_v2 = vld [vmem:[#allocation3 + $0x88] sm:$0xf] }
  0x33   :  { %v4442_v18 = vld [vmem:[#allocation5 + $0x200] sm:$0xf]  ;;  %v5206_v19 = vld [vmem:[#allocation5 + $0x20c] sm:$0xf0]  ;;  %v5721_v24 = vor.u32 %v5118_v11, %v4090_v10  ;;  %v5127_v3 = vld [vmem:[#allocation3 + $0x94] sm:$0xf0] }
  0x34   :  { %5384 = vmatpush.bf16.msra.mxu2 %v5707_v58  ;;  %1094 = vmatpush.bf16.msra.mxu0 %v4203_v63  ;;  %v4666_v20 = vld [vmem:[#allocation5 + $0x3c0] sm:$0xf]  ;;  %v5262_v21 = vld [vmem:[#allocation5 + $0x3cc] sm:$0xf0]  ;;  %v5725_v27 = vor.u32 %v5206_v19, %v4442_v18  ;;  %v5200_v6 = vld [vmem:[#allocation5 + $0x1e4] sm:$0xf] }
  0x35   :  { %5369 = vmatpush.bf16.msra.mxu3 %v4203_v63  ;;  %5377 = vmatpush.bf16.msra.mxu1 %v5710_v4  ;;  %v4667_v30 = vor.u32 %v5262_v21, %v4666_v20  ;;  %v4650_v32 = vld [vmem:[#allocation5 + $0x3a0] sm:$0xf]  ;;  %v5258_v33 = vld [vmem:[#allocation5 + $0x3ac] sm:$0xf0]  ;;  %v4124_v63 = vld [vmem:[#allocation3 + $0x90] sm:$0xf0] }
  0x36   :  { %v4651_v36 = vor.u32 %v5258_v33, %v4650_v32  ;;  %v4634_v37 = vld [vmem:[#allocation5 + $0x380] sm:$0xf]  ;;  %v5114_v41 = vld [vmem:[#allocation3 + $0x2c] sm:$0xf0]  ;;  %v5760_v1 = vor.u32 %v5124_v62, %v4124_v63  ;;  %v4428_v7 = vld [vmem:[#allocation5 + $0x1f0] sm:$0xf0] }
  0x37   :  { %v4074_v39 = vld [vmem:[#allocation3 + $0x20] sm:$0xf]  ;;  %v5122_v43 = vld [vmem:[#allocation3 + $0x6c] sm:$0xf0]  ;;  %v5196_v10 = vld [vmem:[#allocation5 + $0x1c4] sm:$0xf] }
  0x38   :  { %5385 = vmatpush.bf16.msra.mxu2 %v5713_v5  ;;  %1095 = vmatpush.bf16.msra.mxu0 %v4187_v9  ;;  %v4106_v42 = vld [vmem:[#allocation3 + $0x60] sm:$0xf]  ;;  %v5739_v47 = vor.u32 %v5114_v41, %v4074_v39  ;;  %v5246_v56 = vld [vmem:[#allocation5 + $0x34c] sm:$0xf0]  ;;  %6948 = vst [vmem:[#allocation13_spill] sm:$0xff] %v5760_v1 }
  0x39   :  { %5370 = vmatpush.bf16.msra.mxu3 %v4187_v9  ;;  %5378 = vmatpush.bf16.msra.mxu1 %v5716_v13  ;;  %v4618_v52 = vld [vmem:[#allocation5 + $0x360] sm:$0xf]  ;;  %v5126_v59 = vld [vmem:[#allocation3 + $0x8c] sm:$0xf0]  ;;  %v4431_v9 = vor.u32 %v5200_v6, %v4428_v7  ;;  %v4396_v18 = vld [vmem:[#allocation5 + $0x1b0] sm:$0xf0] }
  0x3a   :  { %v4602_v55 = vld [vmem:[#allocation5 + $0x340] sm:$0xf]  ;;  %v5242_v12 = vld [vmem:[#allocation5 + $0x32c] sm:$0xf0]  ;;  %v5188_v21 = vld [vmem:[#allocation5 + $0x184] sm:$0xf] }
  0x3b   :  { %1096 = vmatmul.bf16.vlgmr.msra.gmra.mxu0 %v5719_v23  ;;  %v4603_v57 = vor.u32 %v5246_v56, %v4602_v55  ;;  %v4586_v11 = vld [vmem:[#allocation5 + $0x320] sm:$0xf]  ;;  %v5130_v28 = vld [vmem:[#allocation3 + $0xac] sm:$0xf0]  ;;  %v5128_v32 = vld [vmem:[#allocation3 + $0xa4] sm:$0xf] }
  0x3c   :  { %1137 = vmatpush.bf16.msrb.mxu0 %v5675_v8  ;;  %1106 = vmatmul.bf16.vlgmr.msra.gmra.mxu3 %v5721_v24  ;;  %v5254_v8 = vld [vmem:[#allocation5 + $0x38c] sm:$0xf0]  ;;  %v4587_v16 = vor.u32 %v5242_v12, %v4586_v11  ;;  %v4138_v20 = vld [vmem:[#allocation3 + $0xa0] sm:$0xf]  ;;  %v4140_v33 = vld [vmem:[#allocation3 + $0xb0] sm:$0xf0] }
  0x3d   :  { %1235 = vmatpush.bf16.msrb.mxu3 %v4683_v17  ;;  %1155 = vmatmul.bf16.vlgmr.msra.gmra.mxu1 %v5723_v25  ;;  %v4635_v38 = vor.u32 %v5254_v8, %v4634_v37  ;;  %v5192_v17 = vld [vmem:[#allocation5 + $0x1a4] sm:$0xf]  ;;  %v5775_v8 = vor.u32 %v5128_v32, %v4140_v33  ;;  %v5131_v39 = vld [vmem:[#allocation3 + $0xb4] sm:$0xf0]  ;;  %v4556_v46 = vld [vmem:[#allocation5 + $0x2f0] sm:$0xf0] }
  0x3e   :  { %5386 = vmatpush.bf16.msra.mxu2 %v5725_v27  ;;  %1333 = vmatpush.bf16.msrb.mxu1 %v4431_v9  ;;  %v4399_v19 = vor.u32 %v5192_v17, %v4396_v18  ;;  %v5184_v41 = vld [vmem:[#allocation5 + $0x164] sm:$0xf]  ;;  %v4348_v55 = vld [vmem:[#allocation5 + $0x150] sm:$0xf0]  ;;  %v4066_v12 = vld [vmem:[#allocation3 + $0x8] sm:$0xf] }
  0x3f   :  { %v5176_v62 = vld [vmem:[#allocation5 + $0x124] sm:$0xf]  ;;  %v4332_v63 = vld [vmem:[#allocation5 + $0x130] sm:$0xf0]  ;;  %v5135_v33 = vld [vmem:[#allocation3 + $0xd4] sm:$0xf0] }
  0x40   :  { %1138 = vmatpush.bf16.msrb.mxu0 %v5678_v14  ;;  %v5741_v14 = vor.u32 %v5122_v43, %v4106_v42  ;;  %v4364_v42 = vld [vmem:[#allocation5 + $0x170] sm:$0xf0]  ;;  %v4335_v6 = vor.u32 %v5176_v62, %v4332_v63  ;;  %v5224_v7 = vld [vmem:[#allocation5 + $0x2a4] sm:$0xf]  ;;  %v4170_v62 = vld [vmem:[#allocation3 + $0xe0] sm:$0xf] }
  0x41   :  { %1236 = vmatpush.bf16.msrb.mxu3 %v4667_v30  ;;  %1204 = vmatmul.bf16.vlgmr.msra.gmra.mxu2 %v5731_v34  ;;  %v4076_v30 = vld [vmem:[#allocation3 + $0x30] sm:$0xf0]  ;;  %v4367_v43 = vor.u32 %v5184_v41, %v4364_v42  ;;  %v5132_v11 = vld [vmem:[#allocation3 + $0xc4] sm:$0xf]  ;;  %v5138_v63 = vld [vmem:[#allocation3 + $0xec] sm:$0xf0] }
  0x42   :  { %v5773_v37 = vor.u32 %v5112_v29, %v4076_v30  ;;  %v4524_v9 = vld [vmem:[#allocation5 + $0x2b0] sm:$0xf0] }
  0x43   :  { %v4156_v17 = vld [vmem:[#allocation3 + $0xd0] sm:$0xf0] }
  0x44   :  { %1139 = vmatpush.bf16.msrb.mxu0 %v5686_v26  ;;  %v5748_v26 = vor.u32 %v5123_v51, %v4114_v50  ;;  %v4559_v50 = vor.u32 %v5232_v45, %v4556_v46  ;;  %v4300_v51 = vld [vmem:[#allocation5 + $0xf0] sm:$0xf0]  ;;  %v5791_v32 = vor.u32 %v5132_v11, %v4156_v17  ;;  %v5216_v46 = vld [vmem:[#allocation5 + $0x264] sm:$0xf] }
  0x45   :  { %1237 = vmatpush.bf16.msrb.mxu3 %v4651_v36  ;;  %v4252_v41 = vld [vmem:[#allocation5 + $0x90] sm:$0xf0]  ;;  %v5144_v11 = vld [vmem:[#allocation5 + $0x24] sm:$0xf] }
  0x46   :  { %6946 = vst [vmem:[#allocation11_spill] sm:$0xff] %v5748_v26  ;;  %1382 = vmatpush.bf16.msrb.mxu2 %v4559_v50  ;;  %v4684_v45 = vld [vmem:[#allocation5 + $0x3f0] sm:$0xf0] }
  0x48   :  { %1140 = vmatpush.bf16.msrb.mxu0 %v5692_v35  ;;  %v5250_v35 = vld [vmem:[#allocation5 + $0x36c] sm:$0xf0] }
  0x49   :  { %1238 = vmatpush.bf16.msrb.mxu3 %v4635_v38  ;;  %v4619_v54 = vor.u32 %v5250_v35, %v4618_v52  ;;  %v4146_v38 = vld [vmem:[#allocation3 + $0xa8] sm:$0xf]  ;;  %v5180_v52 = vld [vmem:[#allocation5 + $0x144] sm:$0xf]  ;;  %v4570_v35 = vld [vmem:[#allocation5 + $0x300] sm:$0xf] }
  0x4b   :  { %1101 = vmatmul.bf16.gmra.mxu0 %v5739_v47 }
  0x4c   :  { %1141 = vmatpush.bf16.msrb.mxu0 %v5698_v44  ;;  %1111 = vmatmul.bf16.gmra.mxu3 %v5741_v14  ;;  %v4122_v44 = vld [vmem:[#allocation3 + $0x80] sm:$0xf] }
  0x4d   :  { %1160 = vmatmul.bf16.gmra.mxu1 %v5743_v48  ;;  %1239 = vmatpush.bf16.msrb.mxu3 %v4619_v54  ;;  %v5755_v0 = vor.u32 %v5126_v59, %v4122_v44  ;;  %v5238_v54 = vld [vmem:[#allocation5 + $0x30c] sm:$0xf0]  ;;  %v5228_v44 = vld [vmem:[#allocation5 + $0x2c4] sm:$0xf] }
  0x4e   :  { %v4571_v56 = vor.u32 %v5238_v54, %v4570_v35  ;;  %v4476_v35 = vld [vmem:[#allocation5 + $0x250] sm:$0xf0]  ;;  %v5152_v54 = vld [vmem:[#allocation5 + $0x64] sm:$0xf] }
  0x4f   :  { %6947 = vst [vmem:[#allocation12_spill] sm:$0xff] %v5755_v0 }
  0x50   :  { %1142 = vmatpush.bf16.msrb.mxu0 %v5704_v53  ;;  %v5757_v53 = vor.u32 %v5108_v60, %v4060_v61  ;;  %v5164_v60 = vld [vmem:[#allocation5 + $0xc4] sm:$0xf] }
  0x51   :  { %1209 = vmatmul.bf16.gmra.mxu2 %v5748_v26  ;;  %1240 = vmatpush.bf16.msrb.mxu3 %v4603_v57  ;;  %v4351_v57 = vor.u32 %v5180_v52, %v4348_v55  ;;  %v5212_v52 = vld [vmem:[#allocation5 + $0x244] sm:$0xf]  ;;  %v4236_v55 = vld [vmem:[#allocation5 + $0x70] sm:$0xf0] }
  0x54   :  { %1143 = vmatpush.bf16.msrb.mxu0 %v5710_v4  ;;  %v5764_v4 = vor.u32 %v5127_v3, %v4130_v2  ;;  %v4154_v2 = vld [vmem:[#allocation3 + $0xc0] sm:$0xf]  ;;  %v4284_v3 = vld [vmem:[#allocation5 + $0xd0] sm:$0xf0] }
  0x55   :  { %1241 = vmatpush.bf16.msrb.mxu3 %v4587_v16  ;;  %v4527_v16 = vor.u32 %v5224_v7, %v4524_v9  ;;  %v4287_v18 = vor.u32 %v5164_v60, %v4284_v3  ;;  %v5148_v60 = vld [vmem:[#allocation5 + $0x44] sm:$0xf]  ;;  %v4082_v3 = vld [vmem:[#allocation3 + $0x28] sm:$0xf]  ;;  %v4172_v9 = vld [vmem:[#allocation3 + $0xf0] sm:$0xf0] }
  0x56   :  { %6949 = vst [vmem:[#allocation14_spill] sm:$0xff] %v5764_v4 }
  0x58   :  { %1144 = vmatpush.bf16.msrb.mxu0 %v5716_v13 }
  0x59   :  { %1242 = vmatpush.bf16.msrb.mxu3 %v4571_v56 }
  0x5b   :  { %1145 = vmatmul.bf16.vlgmr.msrb.gmra.mxu0 %v5757_v53 }
  0x5c   :  { %1186 = vmatpush.bf16.msra.mxu0 %v5680_v15  ;;  %1116 = vmatmul.bf16.gmra.mxu3 %v5755_v0  ;;  %v4412_v15 = vld [vmem:[#allocation5 + $0x1d0] sm:$0xf0] }
  0x5d   :  { %1165 = vmatmul.bf16.gmra.mxu1 %v5760_v1  ;;  %v4415_v13 = vor.u32 %v5196_v10, %v4412_v15  ;;  %v5134_v10 = vld [vmem:[#allocation3 + $0xcc] sm:$0xf0]  ;;  %v5172_v15 = vld [vmem:[#allocation5 + $0x104] sm:$0xf] }
  0x5e   :  { %v5787_v29 = vor.u32 %v5134_v10, %v4154_v2  ;;  %v5136_v2 = vld [vmem:[#allocation3 + $0xe4] sm:$0xf] }
  0x5f   :  { %1334 = vmatpush.bf16.msrb.mxu1 %v4415_v13  ;;  %v5111_v13 = vld [vmem:[#allocation3 + $0x14] sm:$0xf0]  ;;  %v5803_v17 = vor.u32 %v5136_v2, %v4172_v9  ;;  %v4620_v2 = vld [vmem:[#allocation5 + $0x370] sm:$0xf0] }
  0x60   :  { %1187 = vmatpush.bf16.msra.mxu0 %v5683_v22  ;;  %v4380_v22 = vld [vmem:[#allocation5 + $0x190] sm:$0xf0]  ;;  %v5789_v30 = vor.u32 %v5111_v13, %v4066_v12  ;;  %v5799_v13 = vor.u32 %v5138_v63, %v4170_v62  ;;  %v5248_v63 = vld [vmem:[#allocation5 + $0x364] sm:$0xf] }
  0x61   :  { %1214 = vmatmul.bf16.gmra.mxu2 %v5764_v4  ;;  %v4383_v36 = vor.u32 %v5188_v21, %v4380_v22  ;;  %v5160_v21 = vld [vmem:[#allocation5 + $0xa4] sm:$0xf]  ;;  %v4268_v22 = vld [vmem:[#allocation5 + $0xb0] sm:$0xf0] }
  0x62   :  { %v4204_v12 = vld [vmem:[#allocation5 + $0x30] sm:$0xf0] }
  0x63   :  { %1335 = vmatpush.bf16.msrb.mxu1 %v4399_v19  ;;  %v5220_v19 = vld [vmem:[#allocation5 + $0x284] sm:$0xf] }
  0x64   :  { %1188 = vmatpush.bf16.msra.mxu0 %v5689_v31  ;;  %v5771_v31 = vor.u32 %v5130_v28, %v4138_v20  ;;  %v4508_v20 = vld [vmem:[#allocation5 + $0x290] sm:$0xf0] }
  0x67   :  { %1336 = vmatpush.bf16.msrb.mxu1 %v4383_v36  ;;  %v4511_v36 = vor.u32 %v5220_v19, %v4508_v20  ;;  %v5139_v19 = vld [vmem:[#allocation3 + $0xf4] sm:$0xf0] }
  0x68   :  { %1189 = vmatpush.bf16.msra.mxu0 %v5695_v40  ;;  %v5780_v40 = vor.u32 %v5131_v39, %v4146_v38  ;;  %v4271_v38 = vor.u32 %v5160_v21, %v4268_v22  ;;  %v5156_v39 = vld [vmem:[#allocation5 + $0x84] sm:$0xf]  ;;  %v4207_v21 = vor.u32 %v5144_v11, %v4204_v12  ;;  %v5121_v12 = vld [vmem:[#allocation3 + $0x6c] sm:$0xf] }
  0x69   :  { %v4255_v50 = vor.u32 %v5156_v39, %v4252_v41  ;;  %v5140_v22 = vld [vmem:[#allocation5 + $0x4] sm:$0xf]  ;;  %v5109_v41 = vld [vmem:[#allocation3 + $0xc] sm:$0xf] }
  0x6a   :  { %6950 = vst [vmem:[#allocation15_spill] sm:$0xff] %v5780_v40 }
  0x6b   :  { %1150 = vmatmul.bf16.gmra.mxu0 %v5773_v37  ;;  %1337 = vmatpush.bf16.msrb.mxu1 %v4367_v43  ;;  %v5264_v43 = vld [vmem:[#allocation5 + $0x3e4] sm:$0xf] }
  0x6c   :  { %1190 = vmatpush.bf16.msra.mxu0 %v5701_v49  ;;  %1121 = vmatmul.bf16.gmra.mxu3 %v5771_v31  ;;  %v5168_v49 = vld [vmem:[#allocation5 + $0xe4] sm:$0xf] }
  0x6d   :  { %1170 = vmatmul.bf16.gmra.mxu1 %v5775_v8  ;;  %v4303_v59 = vor.u32 %v5168_v49, %v4300_v51  ;;  %v4687_v49 = vor.u32 %v5264_v43, %v4684_v45  ;;  %v4492_v51 = vld [vmem:[#allocation5 + $0x270] sm:$0xf0]  ;;  %v4068_v43 = vld [vmem:[#allocation3 + $0x18] sm:$0xf0] }
  0x6e   :  { %v4495_v56 = vor.u32 %v5216_v46, %v4492_v51  ;;  %v5811_v45 = vor.u32 %v5109_v41, %v4068_v43  ;;  %v5256_v46 = vld [vmem:[#allocation5 + $0x3a4] sm:$0xf]  ;;  %v5113_v51 = vld [vmem:[#allocation3 + $0x2c] sm:$0xf]  ;;  %v4604_v41 = vld [vmem:[#allocation5 + $0x350] sm:$0xf0] }
  0x6f   :  { %1338 = vmatpush.bf16.msrb.mxu1 %v4351_v57  ;;  %1431 = vmatpush.bf16.msra.mxu3 %v4687_v49  ;;  %v4479_v57 = vor.u32 %v5212_v52, %v4476_v35  ;;  %v4084_v52 = vld [vmem:[#allocation3 + $0x38] sm:$0xf0] }
  0x70   :  { %1191 = vmatpush.bf16.msra.mxu0 %v5707_v58  ;;  %v4540_v58 = vld [vmem:[#allocation5 + $0x2d0] sm:$0xf0]  ;;  %v5817_v35 = vor.u32 %v5113_v51, %v4084_v52 }
  0x71   :  { %1219 = vmatmul.bf16.gmra.mxu2 %v5780_v40  ;;  %v4543_v61 = vor.u32 %v5228_v44, %v4540_v58  ;;  %v4239_v44 = vor.u32 %v5152_v54, %v4236_v55  ;;  %v5208_v58 = vld [vmem:[#allocation5 + $0x224] sm:$0xf]  ;;  %v4636_v55 = vld [vmem:[#allocation5 + $0x390] sm:$0xf0] }
  0x72   :  { %v5252_v54 = vld [vmem:[#allocation5 + $0x384] sm:$0xf] }
  0x73   :  { %1383 = vmatpush.bf16.msrb.mxu2 %v4543_v61  ;;  %1339 = vmatpush.bf16.msrb.mxu1 %v4335_v6  ;;  %v4220_v61 = vld [vmem:[#allocation5 + $0x50] sm:$0xf0]  ;;  %v5115_v6 = vld [vmem:[#allocation3 + $0x34] sm:$0xf0] }
  0x74   :  { %1192 = vmatpush.bf16.msra.mxu0 %v5713_v5  ;;  %v4316_v5 = vld [vmem:[#allocation5 + $0x110] sm:$0xf0]  ;;  %v4223_v10 = vor.u32 %v5148_v60, %v4220_v61 }
  0x75   :  { %v4319_v28 = vor.u32 %v5172_v15, %v4316_v5  ;;  %v5204_v15 = vld [vmem:[#allocation5 + $0x204] sm:$0xf]  ;;  %v4444_v5 = vld [vmem:[#allocation5 + $0x210] sm:$0xf0] }
  0x76   :  { %v4447_v20 = vor.u32 %v5204_v15, %v4444_v5 }
  0x77   :  { %1384 = vmatpush.bf16.msrb.mxu2 %v4527_v16  ;;  %1340 = vmatpush.bf16.msrb.mxu1 %v4319_v28  ;;  %v5801_v16 = vor.u32 %v5115_v6, %v4082_v3  ;;  %v4188_v28 = vld [vmem:[#allocation5 + $0x10] sm:$0xf0]  ;;  %v4623_v3 = vor.u32 %v5248_v63, %v4620_v2 }
  0x78   :  { %1193 = vmatpush.bf16.msra.mxu0 %v5725_v27  ;;  %v4162_v27 = vld [vmem:[#allocation3 + $0xc8] sm:$0xf] }
  0x79   :  { %v5795_v42 = vor.u32 %v5135_v33, %v4162_v27  ;;  %v5260_v33 = vld [vmem:[#allocation5 + $0x3c4] sm:$0xf] }
  0x7b   :  { %1194 = vmatmul.bf16.vlgmr.msra.gmra.mxu0 %v5789_v30  ;;  %1385 = vmatpush.bf16.msrb.mxu2 %v4511_v36  ;;  %v4668_v36 = vld [vmem:[#allocation5 + $0x3d0] sm:$0xf0] }
  0x7c   :  { %1284 = vmatpush.bf16.msrb.mxu0 %v4303_v59  ;;  %1126 = vmatmul.bf16.gmra.mxu3 %v5787_v29  ;;  %v4460_v59 = vld [vmem:[#allocation5 + $0x230] sm:$0xf0]  ;;  %v4671_v39 = vor.u32 %v5260_v33, %v4668_v36 }
  0x7d   :  { %1175 = vmatmul.bf16.gmra.mxu1 %v5791_v32  ;;  %v4463_v7 = vor.u32 %v5208_v58, %v4460_v59  ;;  %v5828_v59 = vld [vmem:[%s6952_s28] sm:$0xf] }
  0x7e   :  { %1432 = vmatpush.bf16.msra.mxu3 %v4671_v39  ;;  %v5831_v62 = vperm.slane %v5828_v59, 0  ;;  %v5244_v39 = vld [vmem:[#allocation5 + $0x344] sm:$0xf] }
  0x7f   :  { %1386 = vmatpush.bf16.msrb.mxu2 %v4495_v56  ;;  %v4639_v56 = vor.u32 %v5252_v54, %v4636_v55  ;;  %v4607_v43 = vor.u32 %v5244_v39, %v4604_v41 }
  0x80   :  { %1285 = vmatpush.bf16.msrb.mxu0 %v4287_v18  ;;  %v4178_v18 = vld [vmem:[#allocation3 + $0xe8] sm:$0xf] }
  0x81   :  { %1224 = vmatmul.bf16.gmra.mxu2 %v5795_v42  ;;  %v5807_v27 = vor.u32 %v5139_v19, %v4178_v18  ;;  %v4116_v18 = vld [vmem:[#allocation3 + $0x78] sm:$0xf0] }
  0x83   :  { %1387 = vmatpush.bf16.msrb.mxu2 %v4479_v57  ;;  %6951 = vst [vmem:[#allocation16_spill] sm:$0xff] %v5807_v27  ;;  %v5117_v57 = vld [vmem:[#allocation3 + $0x4c] sm:$0xf] }
  0x84   :  { %1286 = vmatpush.bf16.msrb.mxu0 %v4271_v38  ;;  %v4191_v38 = vor.u32 %v5140_v22, %v4188_v28 }
  0x87   :  { %1388 = vmatpush.bf16.msrb.mxu2 %v4463_v7 }
  0x88   :  { %1287 = vmatpush.bf16.msrb.mxu0 %v4255_v50  ;;  %v4652_v50 = vld [vmem:[#allocation5 + $0x3b0] sm:$0xf0] }
  0x89   :  { %v4655_v49 = vor.u32 %v5256_v46, %v4652_v50 }
  0x8b   :  { %1199 = vmatmul.bf16.gmra.mxu0 %v5801_v16  ;;  %1389 = vmatpush.bf16.msrb.mxu2 %v4447_v20 }
  0x8c   :  { %1288 = vmatpush.bf16.msrb.mxu0 %v4239_v44  ;;  %1131 = vmatmul.bf16.gmra.mxu3 %v5799_v13  ;;  %v4100_v44 = vld [vmem:[#allocation3 + $0x58] sm:$0xf0] }
  0x8d   :  { %1180 = vmatmul.bf16.gmra.mxu1 %v5803_v17  ;;  %1433 = vmatpush.bf16.msra.mxu3 %v4655_v49  ;;  %v5823_v58 = vor.u32 %v5117_v57, %v4100_v44  ;;  %v4132_v57 = vld [vmem:[#allocation3 + $0x98] sm:$0xf0] }
  0x90   :  { %1289 = vmatpush.bf16.msrb.mxu0 %v4223_v10 }
  0x91   :  { %1229 = vmatmul.bf16.gmra.mxu2 %v5807_v27  ;;  %1434 = vmatpush.bf16.msra.mxu3 %v4639_v56  ;;  %v5125_v56 = vld [vmem:[#allocation3 + $0x8c] sm:$0xf] }
  0x92   :  { %v5858_v2 = vor.u32 %v5125_v56, %v4132_v57  ;;  %v5199_v56 = vld [vmem:[#allocation5 + $0x1d4] sm:$0xf0] }
  0x94   :  { %1290 = vmatpush.bf16.msrb.mxu0 %v4207_v21  ;;  %v5841_v21 = vor.u32 %v5121_v12, %v4116_v18  ;;  %6953 = vst [vmem:[#allocation17_spill] sm:$0xff] %v5858_v2  ;;  %v5171_v12 = vld [vmem:[#allocation5 + $0xf4] sm:$0xf0]  ;;  %v4434_v18 = vld [vmem:[#allocation5 + $0x1e8] sm:$0xf] }
  0x95   :  { %1435 = vmatpush.bf16.msra.mxu3 %v4623_v3 }
  0x98   :  { %1291 = vmatpush.bf16.msrb.mxu0 %v4191_v38 }
  0x99   :  { %1436 = vmatpush.bf16.msra.mxu3 %v4607_v43 }
  0x9b   :  { %1292 = vmatmul.bf16.vlgmr.msrb.gmra.mxu0 %v5719_v23 }
  0x9c   :  { %1243 = vmatmul.bf16.vlgmr.msrb.gmra.mxu3 %v5811_v45 }
  0x9d   :  { %1341 = vmatmul.bf16.vlgmr.msrb.gmra.mxu1 %v5757_v53 }
  0xa1   :  { %1390 = vmatmul.bf16.vlgmr.msrb.gmra.mxu2 %v5789_v30 }
  0xab   :  { %1297 = vmatmul.bf16.gmra.mxu0 %v5739_v47 }
  0xac   :  { %1248 = vmatmul.bf16.gmra.mxu3 %v5817_v35 }
  0xad   :  { %1346 = vmatmul.bf16.gmra.mxu1 %v5773_v37 }
  0xb1   :  { %1395 = vmatmul.bf16.gmra.mxu2 %v5801_v16 }
  0xb8   :  { %v1097_v60 = vpop.f32.mrf.mxu0 }
  0xb9   :  { %v1098_v44 = vadd.f32 %v1097_v60, %v5831_v62 }
  0xba   :  { %v1156_v61 = vpop.f32.mrf.mxu1 }
  0xbb   :  { %1302 = vmatmul.bf16.gmra.mxu0 %v5721_v24 }
  0xbc   :  { %1253 = vmatmul.bf16.gmra.mxu3 %v5823_v58 }
  0xbd   :  { %1351 = vmatmul.bf16.gmra.mxu1 %v5723_v25 }
  0xbf   :  { %v1107_v6 = vpop.f32.mrf.mxu3 }
  0xc0   :  { %v1108_v7 = vadd.f32 %v1107_v6, %v5831_v62  ;;  %v1099_v9 = vpop.f32.mrf.mxu0 }
  0xc1   :  { %1400 = vmatmul.bf16.gmra.mxu2 %v5731_v34  ;;  %v1100_v39 = vadd.f32 %v1099_v9, %v5831_v62 }
  0xc2   :  { %v1158_v10 = vpop.f32.mrf.mxu1  ;;  %v1157_v15 = vadd.f32 %v1156_v61, %v1108_v7 }
  0xc4   :  { %v1205_v5 = vpop.f32.mrf.mxu2 }
  0xc5   :  { %v5838_v11 = vadd.f32 %v1205_v5, %v1157_v15  ;;  %v4306_v5 = vld [vmem:[#allocation5 + $0xe8] sm:$0xf] }
  0xc6   :  { %v4307_v60 = vor.u32 %v5171_v12, %v4306_v5  ;;  %v4402_v5 = vld [vmem:[#allocation5 + $0x1a8] sm:$0xf] }
  0xc7   :  { %v1109_v19 = vpop.f32.mrf.mxu3 }
  0xc8   :  { %v1110_v20 = vadd.f32 %v1109_v19, %v5831_v62  ;;  %v5843_v22 = vpop.f32.mrf.mxu0  ;;  %1480 = vmatpush.bf16.msra.mxu0 %v4307_v60  ;;  %v5195_v60 = vld [vmem:[#allocation5 + $0x1b4] sm:$0xf0] }
  0xca   :  { %v1161_v28 = vpop.f32.mrf.mxu1  ;;  %v1159_v33 = vadd.f32 %v1158_v10, %v1110_v20  ;;  %v5203_v20 = vld [vmem:[#allocation5 + $0x1f4] sm:$0xf0] }
  0xcb   :  { %1307 = vmatmul.bf16.gmra.mxu0 %v5741_v14 }
  0xcc   :  { %v1207_v36 = vpop.f32.mrf.mxu2  ;;  %1258 = vmatmul.bf16.gmra.mxu3 %v5841_v21 }
  0xcd   :  { %v5845_v38 = vadd.f32 %v1207_v36, %v1159_v33  ;;  %1356 = vmatmul.bf16.gmra.mxu1 %v5743_v48  ;;  %v4588_v33 = vld [vmem:[#allocation5 + $0x330] sm:$0xf0]  ;;  %v4435_v36 = vor.u32 %v5203_v20, %v4434_v18  ;;  %v5129_v20 = vld [vmem:[#allocation3 + $0xac] sm:$0xf] }
  0xcf   :  { %v1112_v46 = vpop.f32.mrf.mxu3  ;;  %1529 = vmatpush.bf16.msra.mxu1 %v4435_v36  ;;  %v1103_v36 = vadd.f32 %v5843_v22, %v5831_v62 }
  0xd0   :  { %v1113_v50 = vadd.f32 %v1112_v46, %v5831_v62  ;;  %v5852_v49 = vpop.f32.mrf.mxu0  ;;  %v4290_v46 = vld [vmem:[#allocation5 + $0xc8] sm:$0xf] }
  0xd1   :  { %1405 = vmatmul.bf16.gmra.mxu2 %v5748_v26 }
  0xd2   :  { %v1163_v51 = vpop.f32.mrf.mxu1  ;;  %v1162_v52 = vadd.f32 %v1161_v28, %v1113_v50  ;;  %v5240_v28 = vld [vmem:[#allocation5 + $0x324] sm:$0xf]  ;;  %v5167_v50 = vld [vmem:[#allocation5 + $0xd4] sm:$0xf0] }
  0xd3   :  { %v4591_v41 = vor.u32 %v5240_v28, %v4588_v33  ;;  %v4148_v28 = vld [vmem:[#allocation3 + $0xb8] sm:$0xf0]  ;;  %v4403_v33 = vor.u32 %v5195_v60, %v4402_v5  ;;  %v5187_v60 = vld [vmem:[#allocation5 + $0x174] sm:$0xf0] }
  0xd4   :  { %v1210_v54 = vpop.f32.mrf.mxu2 }
  0xd5   :  { %v5854_v55 = vadd.f32 %v1210_v54, %v1162_v52  ;;  %1437 = vmatpush.bf16.msra.mxu3 %v4591_v41  ;;  %v4291_v54 = vor.u32 %v5167_v50, %v4290_v46  ;;  %v5159_v41 = vld [vmem:[#allocation5 + $0x94] sm:$0xf0]  ;;  %v5877_v50 = vor.u32 %v5129_v20, %v4148_v28  ;;  %v5236_v20 = vld [vmem:[#allocation5 + $0x304] sm:$0xf]  ;;  %v4572_v28 = vld [vmem:[#allocation5 + $0x310] sm:$0xf0] }
  0xd7   :  { %v1114_v61 = vpop.f32.mrf.mxu3  ;;  %1481 = vmatpush.bf16.msra.mxu0 %v4291_v54 }
  0xd8   :  { %v1115_v63 = vadd.f32 %v1114_v61, %v5831_v62  ;;  %v1146_v3 = vpop.f32.mrf.mxu0 }
  0xd9   :  { %v5860_v6 = vadd.f32 %v1146_v3, %v1098_v44 }
  0xda   :  { %v1166_v7 = vpop.f32.mrf.mxu1  ;;  %v1164_v10 = vadd.f32 %v1163_v51, %v1115_v63  ;;  %v4418_v51 = vld [vmem:[#allocation5 + $0x1c8] sm:$0xf] }
  0xdb   :  { %1312 = vmatmul.bf16.gmra.mxu0 %v5755_v0  ;;  %v4419_v44 = vor.u32 %v5199_v56, %v4418_v51 }
  0xdc   :  { %v1212_v15 = vpop.f32.mrf.mxu2  ;;  %1263 = vmatmul.bf16.gmra.mxu3 %v5858_v2 }
  0xdd   :  { %v5862_v19 = vadd.f32 %v1212_v15, %v1164_v10  ;;  %1361 = vmatmul.bf16.gmra.mxu1 %v5760_v1  ;;  %v4274_v10 = vld [vmem:[#allocation5 + $0xa8] sm:$0xf]  ;;  %v5163_v15 = vld [vmem:[#allocation5 + $0xb4] sm:$0xf0] }
  0xde   :  { %1530 = vmatpush.bf16.msra.mxu1 %v4419_v44  ;;  %v4275_v18 = vor.u32 %v5163_v15, %v4274_v10  ;;  %v5155_v10 = vld [vmem:[#allocation5 + $0x74] sm:$0xf0]  ;;  %v4370_v15 = vld [vmem:[#allocation5 + $0x168] sm:$0xf] }
  0xdf   :  { %v1117_v43 = vpop.f32.mrf.mxu3 }
  0xe0   :  { %v1118_v52 = vadd.f32 %v1117_v43, %v5831_v62  ;;  %v1148_v57 = vpop.f32.mrf.mxu0  ;;  %1482 = vmatpush.bf16.msra.mxu0 %v4275_v18  ;;  %v4386_v43 = vld [vmem:[#allocation5 + $0x188] sm:$0xf] }
  0xe1   :  { %1410 = vmatmul.bf16.gmra.mxu2 %v5764_v4  ;;  %v5870_v61 = vadd.f32 %v1148_v57, %v1100_v39 }
  0xe2   :  { %v1168_v63 = vpop.f32.mrf.mxu1  ;;  %v1167_v9 = vadd.f32 %v1166_v7, %v1118_v52  ;;  %1531 = vmatpush.bf16.msra.mxu1 %v4403_v33  ;;  %v4258_v7 = vld [vmem:[#allocation5 + $0x88] sm:$0xf]  ;;  %v5191_v52 = vld [vmem:[#allocation5 + $0x194] sm:$0xf0]  ;;  %v4371_v33 = vor.u32 %v5187_v60, %v4370_v15 }
  0xe3   :  { %v4259_v51 = vor.u32 %v5159_v41, %v4258_v7  ;;  %v4387_v56 = vor.u32 %v5191_v52, %v4386_v43  ;;  %v5235_v7 = vld [vmem:[#allocation5 + $0x2f4] sm:$0xf0]  ;;  %v4354_v52 = vld [vmem:[#allocation5 + $0x148] sm:$0xf] }
  0xe4   :  { %v1215_v3 = vpop.f32.mrf.mxu2 }
  0xe5   :  { %v5872_v12 = vadd.f32 %v1215_v3, %v1167_v9  ;;  %1483 = vmatpush.bf16.msra.mxu0 %v4259_v51  ;;  %v4242_v3 = vld [vmem:[#allocation5 + $0x68] sm:$0xf]  ;;  %v5151_v51 = vld [vmem:[#allocation5 + $0x54] sm:$0xf0] }
  0xe6   :  { %1532 = vmatpush.bf16.msra.mxu1 %v4387_v56  ;;  %v4243_v18 = vor.u32 %v5155_v10, %v4242_v3  ;;  %v5231_v10 = vld [vmem:[#allocation5 + $0x2d4] sm:$0xf0] }
  0xe7   :  { %v1119_v39 = vpop.f32.mrf.mxu3 }
  0xe8   :  { %v1120_v46 = vadd.f32 %v1119_v39, %v5831_v62  ;;  %v1151_v54 = vpop.f32.mrf.mxu0  ;;  %v4575_v39 = vor.u32 %v5236_v20, %v4572_v28 }
  0xe9   :  { %v5879_v57 = vadd.f32 %v1151_v54, %v1103_v36  ;;  %v1105_v36 = vadd.f32 %v5852_v49, %v5831_v62  ;;  %1484 = vmatpush.bf16.msra.mxu0 %v4243_v18  ;;  %v4546_v49 = vld [vmem:[#allocation5 + $0x2c8] sm:$0xf] }
  0xea   :  { %v1171_v44 = vpop.f32.mrf.mxu1  ;;  %v1169_v9 = vadd.f32 %v1168_v63, %v1120_v46  ;;  %v4562_v63 = vld [vmem:[#allocation5 + $0x2e8] sm:$0xf]  ;;  %1533 = vmatpush.bf16.msra.mxu1 %v4371_v33  ;;  %1438 = vmatpush.bf16.msra.mxu3 %v4575_v39  ;;  %v4547_v20 = vor.u32 %v5231_v10, %v4546_v49  ;;  %v5133_v39 = vld [vmem:[#allocation3 + $0xcc] sm:$0xf] }
  0xeb   :  { %1317 = vmatmul.bf16.gmra.mxu0 %v5771_v31  ;;  %v4563_v43 = vor.u32 %v5235_v7, %v4562_v63  ;;  %v4226_v46 = vld [vmem:[#allocation5 + $0x48] sm:$0xf]  ;;  %v5147_v63 = vld [vmem:[#allocation5 + $0x34] sm:$0xf0] }
  0xec   :  { %v1217_v22 = vpop.f32.mrf.mxu2  ;;  %1268 = vmatmul.bf16.gmra.mxu3 %v5877_v50  ;;  %v4227_v56 = vor.u32 %v5151_v51, %v4226_v46  ;;  %v4210_v33 = vld [vmem:[#allocation5 + $0x28] sm:$0xf]  ;;  %v5179_v51 = vld [vmem:[#allocation5 + $0x134] sm:$0xf0] }
  0xed   :  { %v5881_v5 = vadd.f32 %v1217_v22, %v1169_v9  ;;  %1366 = vmatmul.bf16.gmra.mxu1 %v5775_v8  ;;  %v5183_v9 = vld [vmem:[#allocation5 + $0x154] sm:$0xf0]  ;;  %1578 = vmatpush.bf16.msra.mxu2 %v4563_v43  ;;  %v4338_v7 = vld [vmem:[#allocation5 + $0x128] sm:$0xf]  ;;  %v4211_v46 = vor.u32 %v5147_v63, %v4210_v33  ;;  %v4164_v43 = vld [vmem:[#allocation3 + $0xd8] sm:$0xf0] }
  0xee   :  { %v4355_v3 = vor.u32 %v5183_v9, %v4354_v52  ;;  %1485 = vmatpush.bf16.msra.mxu0 %v4227_v56  ;;  %v4339_v52 = vor.u32 %v5179_v51, %v4338_v7  ;;  %v4530_v9 = vld [vmem:[#allocation5 + $0x2a8] sm:$0xf]  ;;  %v5143_v56 = vld [vmem:[#allocation5 + $0x14] sm:$0xf0]  ;;  %v5895_v10 = vor.u32 %v5133_v39, %v4164_v43 }
  0xef   :  { %v1122_v41 = vpop.f32.mrf.mxu3  ;;  %v5223_v7 = vld [vmem:[#allocation5 + $0x294] sm:$0xf0]  ;;  %v4690_v39 = vld [vmem:[#allocation5 + $0x3e8] sm:$0xf] }
  0xf0   :  { %v1123_v54 = vadd.f32 %v1122_v41, %v5831_v62  ;;  %v1153_v22 = vpop.f32.mrf.mxu0  ;;  %1534 = vmatpush.bf16.msra.mxu1 %v4355_v3  ;;  %v4322_v3 = vld [vmem:[#allocation5 + $0x108] sm:$0xf]  ;;  %v5267_v43 = vld [vmem:[#allocation5 + $0x3f4] sm:$0xf0] }
  0xf1   :  { %1415 = vmatmul.bf16.gmra.mxu2 %v5780_v40  ;;  %v5890_v15 = vadd.f32 %v1153_v22, %v1105_v36  ;;  %v5227_v36 = vld [vmem:[#allocation5 + $0x2b4] sm:$0xf0] }
  0xf2   :  { %v1173_v18 = vpop.f32.mrf.mxu1  ;;  %v1172_v60 = vadd.f32 %v1171_v44, %v1123_v54  ;;  %1579 = vmatpush.bf16.msra.mxu2 %v4547_v20  ;;  %1486 = vmatpush.bf16.msra.mxu0 %v4211_v46  ;;  %v4531_v22 = vor.u32 %v5227_v36, %v4530_v9  ;;  %v4194_v54 = vld [vmem:[#allocation5 + $0x8] sm:$0xf] }
  0xf3   :  { %v4514_v20 = vld [vmem:[#allocation5 + $0x288] sm:$0xf] }
  0xf4   :  { %v1220_v28 = vpop.f32.mrf.mxu2  ;;  %1535 = vmatpush.bf16.msra.mxu1 %v4339_v52  ;;  %v4515_v52 = vor.u32 %v5223_v7, %v4514_v20 }
  0xf5   :  { %v5892_v41 = vadd.f32 %v1220_v28, %v1172_v60  ;;  %v4195_v60 = vor.u32 %v5143_v56, %v4194_v54  ;;  %v5175_v28 = vld [vmem:[#allocation5 + $0x114] sm:$0xf0] }
  0xf6   :  { %1580 = vmatpush.bf16.msra.mxu2 %v4531_v22  ;;  %v4323_v63 = vor.u32 %v5175_v28, %v4322_v3  ;;  %v4498_v22 = vld [vmem:[#allocation5 + $0x268] sm:$0xf] }
  0xf7   :  { %v1124_v44 = vpop.f32.mrf.mxu3  ;;  %1487 = vmatpush.bf16.msra.mxu0 %v4195_v60  ;;  %v5215_v60 = vld [vmem:[#allocation5 + $0x254] sm:$0xf0] }
  0xf8   :  { %v1125_v49 = vadd.f32 %v1124_v44, %v5831_v62  ;;  %v1195_v33 = vpop.f32.mrf.mxu0  ;;  %1536 = vmatpush.bf16.msra.mxu1 %v4323_v63  ;;  %v4691_v44 = vor.u32 %v5267_v43, %v4690_v39  ;;  %v4466_v39 = vld [vmem:[#allocation5 + $0x228] sm:$0xf]  ;;  %v5211_v43 = vld [vmem:[#allocation5 + $0x234] sm:$0xf0] }
  0xf9   :  { %v5898_v46 = vadd.f32 %v1195_v33, %v5860_v6  ;;  %v5219_v6 = vld [vmem:[#allocation5 + $0x274] sm:$0xf0] }
  0xfa   :  { %v1176_v51 = vpop.f32.mrf.mxu1  ;;  %v1174_v9 = vadd.f32 %v1173_v18, %v1125_v49  ;;  %1581 = vmatpush.bf16.msra.mxu2 %v4515_v52  ;;  %v4499_v18 = vor.u32 %v5219_v6, %v4498_v22  ;;  %1627 = vmatpush.bf16.msrb.mxu3 %v4691_v44  ;;  %v4482_v49 = vld [vmem:[#allocation5 + $0x248] sm:$0xf]  ;;  %v5137_v52 = vld [vmem:[#allocation3 + $0xec] sm:$0xf]  ;;  %v4467_v22 = vor.u32 %v5211_v43, %v4466_v39 }
  0xfb   :  { %1322 = vmatmul.bf16.gmra.mxu0 %v5787_v29  ;;  %v4483_v20 = vor.u32 %v5215_v60, %v4482_v49 }
  0xfc   :  { %v1222_v36 = vpop.f32.mrf.mxu2  ;;  %1273 = vmatmul.bf16.gmra.mxu3 %v5895_v10 }
  0xfd   :  { %v5900_v40 = vadd.f32 %v1222_v36, %v1174_v9  ;;  %1371 = vmatmul.bf16.gmra.mxu1 %v5791_v32  ;;  %v4180_v36 = vld [vmem:[#allocation3 + $0xf8] sm:$0xf0] }
  0xfe   :  { %1582 = vmatpush.bf16.msra.mxu2 %v4499_v18 }
  0xff   :  { %v1127_v54 = vpop.f32.mrf.mxu3 }
 0x100   :  { %v1128_v56 = vadd.f32 %v1127_v54, %v5831_v62  ;;  %v1197_v3 = vpop.f32.mrf.mxu0  ;;  %v5913_v54 = vor.u32 %v5137_v52, %v4180_v36  ;;  %v5263_v52 = vld [vmem:[#allocation5 + $0x3d4] sm:$0xf0] }
 0x101   :  { %1420 = vmatmul.bf16.gmra.mxu2 %v5795_v42  ;;  %v5908_v33 = vadd.f32 %v1197_v3, %v5870_v61  ;;  %v4450_v61 = vld [vmem:[#allocation5 + $0x208] sm:$0xf]  ;;  %v5207_v3 = vld [vmem:[#allocation5 + $0x214] sm:$0xf0] }
 0x102   :  { %v1178_v28 = vpop.f32.mrf.mxu1  ;;  %v1177_v63 = vadd.f32 %v1176_v51, %v1128_v56  ;;  %1583 = vmatpush.bf16.msra.mxu2 %v4483_v20  ;;  %v4451_v60 = vor.u32 %v5207_v3, %v4450_v61  ;;  %v5929_v61 = vperm.slane %v5828_v59, 1  ;;  %v4658_v59 = vld [vmem:[#allocation5 + $0x3a8] sm:$0xf] }
 0x104   :  { %v1225_v7 = vpop.f32.mrf.mxu2 }
 0x105   :  { %v5910_v9 = vadd.f32 %v1225_v7, %v1177_v63  ;;  %v4674_v7 = vld [vmem:[#allocation5 + $0x3c8] sm:$0xf] }
 0x106   :  { %1584 = vmatpush.bf16.msra.mxu2 %v4467_v22  ;;  %v4675_v36 = vor.u32 %v5263_v52, %v4674_v7 }
 0x107   :  { %v1129_v44 = vpop.f32.mrf.mxu3 }
 0x108   :  { %v1130_v6 = vadd.f32 %v1129_v44, %v5831_v62  ;;  %v1200_v18 = vpop.f32.mrf.mxu0  ;;  %1628 = vmatpush.bf16.msrb.mxu3 %v4675_v36 }
 0x109   :  { %v5916_v56 = vadd.f32 %v1200_v18, %v5879_v57 }
 0x10a   :  { %v1181_v51 = vpop.f32.mrf.mxu1  ;;  %v1179_v49 = vadd.f32 %v1178_v28, %v1130_v6  ;;  %1585 = vmatpush.bf16.msra.mxu2 %v4451_v60 }
 0x10b   :  { %1327 = vmatmul.bf16.gmra.mxu0 %v5799_v13 }
 0x10c   :  { %v1227_v63 = vpop.f32.mrf.mxu2  ;;  %1278 = vmatmul.bf16.gmra.mxu3 %v5913_v54 }
 0x10d   :  { %v5918_v20 = vadd.f32 %v1227_v63, %v1179_v49  ;;  %1376 = vmatmul.bf16.gmra.mxu1 %v5803_v17 }
 0x10f   :  { %v1132_v39 = vpop.f32.mrf.mxu3 }
 0x110   :  { %v1133_v43 = vadd.f32 %v1132_v39, %v5831_v62  ;;  %v1202_v57 = vpop.f32.mrf.mxu0 }
 0x111   :  { %1425 = vmatmul.bf16.gmra.mxu2 %v5807_v27  ;;  %v1203_v22 = vadd.f32 %v1202_v57, %v5890_v15  ;;  %v5259_v15 = vld [vmem:[#allocation5 + $0x3b4] sm:$0xf0] }
 0x112   :  { %v1183_v28 = vpop.f32.mrf.mxu1  ;;  %v1182_v44 = vadd.f32 %v1181_v51, %v1133_v43  ;;  %v4659_v51 = vor.u32 %v5259_v15, %v4658_v59 }
 0x114   :  { %v1230_v6 = vpop.f32.mrf.mxu2  ;;  %1629 = vmatpush.bf16.msrb.mxu3 %v4659_v51 }
 0x115   :  { %v5926_v18 = vadd.f32 %v1230_v6, %v1182_v44 }
 0x117   :  { %v1134_v3 = vpop.f32.mrf.mxu3 }
 0x118   :  { %v1135_v49 = vadd.f32 %v1134_v3, %v5831_v62  ;;  %v1293_v60 = vpop.f32.mrf.mxu0 }
 0x119   :  { %v1294_v63 = vadd.f32 %v1293_v60, %v5929_v61 }
 0x11a   :  { %v1342_v7 = vpop.f32.mrf.mxu1  ;;  %v1184_v52 = vadd.f32 %v1183_v28, %v1135_v49 }
 0x11b   :  { %v1343_v39 = vadd.f32 %v1342_v7, %v1294_v63  ;;  %1488 = vmatmul.bf16.vlgmr.msra.gmra.mxu0 %v5719_v23 }
 0x11c   :  { %v1232_v36 = vpop.f32.mrf.mxu2  ;;  %1439 = vmatmul.bf16.vlgmr.msra.gmra.mxu3 %v5811_v45 }
 0x11d   :  { %v5933_v27 = vadd.f32 %v1232_v36, %v1184_v52  ;;  %1537 = vmatmul.bf16.vlgmr.msra.gmra.mxu1 %v5757_v53 }
 0x11f   :  { %v1244_v43 = vpop.f32.mrf.mxu3 }
 0x120   :  { %v1245_v62 = vadd.f32 %v1244_v43, %v5898_v46  ;;  %v1295_v57 = vpop.f32.mrf.mxu0 }
 0x121   :  { %1586 = vmatmul.bf16.vlgmr.msra.gmra.mxu2 %v5789_v30  ;;  %v1296_v28 = vadd.f32 %v1295_v57, %v5929_v61 }
 0x122   :  { %v1344_v44 = vpop.f32.mrf.mxu1  ;;  %v1872_v52 = vmax.f32 %v1245_v62, 0.0 }
 0x123   :  { %v1345_v3 = vadd.f32 %v1344_v44, %v1296_v28 }
 0x124   :  { %v1391_v6 = vpop.f32.mrf.mxu2 }
 0x125   :  { %v5941_v49 = vadd.f32 %v1391_v6, %v1343_v39  ;;  %v4642_v39 = vld [vmem:[#allocation5 + $0x388] sm:$0xf] }
 0x127   :  { %v1246_v60 = vpop.f32.mrf.mxu3 }
 0x128   :  { %v1247_v63 = vadd.f32 %v1246_v60, %v5908_v33  ;;  %v1298_v7 = vpop.f32.mrf.mxu0  ;;  %v5255_v33 = vld [vmem:[#allocation5 + $0x394] sm:$0xf0] }
 0x129   :  { %v1299_v59 = vadd.f32 %v1298_v7, %v5929_v61  ;;  %v4643_v28 = vor.u32 %v5255_v33, %v4642_v39 }
 0x12a   :  { %v1876_v36 = vmax.f32 %v1247_v63, 0.0  ;;  %v1347_v46 = vpop.f32.mrf.mxu1 }
 0x12b   :  { %v1348_v51 = vadd.f32 %v1347_v46, %v1299_v59  ;;  %1493 = vmatmul.bf16.gmra.mxu0 %v5739_v47  ;;  %1630 = vmatpush.bf16.msrb.mxu3 %v4643_v28 }
 0x12c   :  { %v1393_v15 = vpop.f32.mrf.mxu2  ;;  %v5945_v43 = vpack.c.bf16 %v1876_v36, %v1872_v52  ;;  %1444 = vmatmul.bf16.gmra.mxu3 %v5817_v35 }
 0x12d   :  { %v5949_v57 = vadd.f32 %v1393_v15, %v1345_v3  ;;  %1542 = vmatmul.bf16.gmra.mxu1 %v5773_v37 }
 0x12e   :  { %6954 = vst [vmem:[#allocation18_spill] sm:$0xff] %v5945_v43 }
 0x12f   :  { %v1249_v62 = vpop.f32.mrf.mxu3 }
 0x130   :  { %v1250_v44 = vadd.f32 %v1249_v62, %v5916_v56  ;;  %v1300_v6 = vpop.f32.mrf.mxu0 }
 0x131   :  { %1591 = vmatmul.bf16.gmra.mxu2 %v5801_v16  ;;  %v1301_v60 = vadd.f32 %v1300_v6, %v5929_v61 }
 0x132   :  { %v1349_v63 = vpop.f32.mrf.mxu1  ;;  %v1880_v15 = vmax.f32 %v1250_v44, 0.0 }
 0x133   :  { %v1350_v52 = vadd.f32 %v1349_v63, %v1301_v60 }
 0x134   :  { %v1396_v7 = vpop.f32.mrf.mxu2 }
 0x135   :  { %v5955_v36 = vadd.f32 %v1396_v7, %v1348_v51  ;;  %v4626_v51 = vld [vmem:[#allocation5 + $0x368] sm:$0xf] }
 0x137   :  { %v1251_v3 = vpop.f32.mrf.mxu3 }
 0x138   :  { %v1252_v59 = vadd.f32 %v1251_v3, %v1203_v22  ;;  %v1303_v46 = vpop.f32.mrf.mxu0  ;;  %v5251_v22 = vld [vmem:[#allocation5 + $0x374] sm:$0xf0] }
 0x139   :  { %v1304_v39 = vadd.f32 %v1303_v46, %v5929_v61  ;;  %v4627_v60 = vor.u32 %v5251_v22, %v4626_v51 }
 0x13a   :  { %v1884_v43 = vmax.f32 %v1252_v59, 0.0  ;;  %v1352_v33 = vpop.f32.mrf.mxu1 }
 0x13b   :  { %v1353_v62 = vadd.f32 %v1352_v33, %v1304_v39  ;;  %1498 = vmatmul.bf16.gmra.mxu0 %v5721_v24  ;;  %1631 = vmatpush.bf16.msrb.mxu3 %v4627_v60 }
 0x13c   :  { %v1398_v56 = vpop.f32.mrf.mxu2  ;;  %1449 = vmatmul.bf16.gmra.mxu3 %v5823_v58  ;;  %v5962_v6 = vpack.c.bf16 %v1884_v43, %v1880_v15 }
 0x13d   :  { %v5960_v28 = vadd.f32 %v1398_v56, %v1350_v52  ;;  %1547 = vmatmul.bf16.gmra.mxu1 %v5723_v25 }
 0x13e   :  { %6955 = vst [vmem:[#allocation19_spill] sm:$0xff] %v5962_v6 }
 0x13f   :  { %v1254_v44 = vpop.f32.mrf.mxu3 }
 0x140   :  { %v1255_v63 = vadd.f32 %v1254_v44, %v5838_v11  ;;  %v1305_v7 = vpop.f32.mrf.mxu0 }
 0x141   :  { %1596 = vmatmul.bf16.gmra.mxu2 %v5731_v34  ;;  %v1306_v3 = vadd.f32 %v1305_v7, %v5929_v61 }
 0x142   :  { %v1354_v59 = vpop.f32.mrf.mxu1  ;;  %v1888_v56 = vmax.f32 %v1255_v63, 0.0 }
 0x143   :  { %v1355_v52 = vadd.f32 %v1354_v59, %v1306_v3 }
 0x144   :  { %v1401_v46 = vpop.f32.mrf.mxu2 }
 0x145   :  { %v5968_v39 = vadd.f32 %v1401_v46, %v1353_v62  ;;  %v4610_v62 = vld [vmem:[#allocation5 + $0x348] sm:$0xf] }
 0x147   :  { %v1256_v43 = vpop.f32.mrf.mxu3 }
 0x148   :  { %v1257_v15 = vadd.f32 %v1256_v43, %v5845_v38  ;;  %v1308_v33 = vpop.f32.mrf.mxu0  ;;  %v5247_v38 = vld [vmem:[#allocation5 + $0x354] sm:$0xf0] }
 0x149   :  { %v1309_v22 = vadd.f32 %v1308_v33, %v5929_v61  ;;  %v4611_v3 = vor.u32 %v5247_v38, %v4610_v62 }
 0x14a   :  { %v1892_v51 = vmax.f32 %v1257_v15, 0.0  ;;  %v1357_v11 = vpop.f32.mrf.mxu1 }
 0x14b   :  { %v1358_v6 = vadd.f32 %v1357_v11, %v1309_v22  ;;  %1503 = vmatmul.bf16.gmra.mxu0 %v5741_v14  ;;  %1632 = vmatpush.bf16.msrb.mxu3 %v4611_v3  ;;  %v4308_v3 = vld [vmem:[#allocation5 + $0xf8] sm:$0xf0] }
 0x14c   :  { %v1403_v44 = vpop.f32.mrf.mxu2  ;;  %1454 = vmatmul.bf16.gmra.mxu3 %v5841_v21  ;;  %v5976_v7 = vpack.c.bf16 %v1892_v51, %v1888_v56 }
 0x14d   :  { %v5974_v60 = vadd.f32 %v1403_v44, %v1355_v52  ;;  %1552 = vmatmul.bf16.gmra.mxu1 %v5743_v48 }
 0x14e   :  { %6956 = vst [vmem:[#allocation20_spill] sm:$0xff] %v5976_v7  ;;  %v5169_v7 = vld [vmem:[#allocation5 + $0xec] sm:$0xf] }
 0x14f   :  { %v1259_v63 = vpop.f32.mrf.mxu3 }
 0x150   :  { %v1260_v59 = vadd.f32 %v1259_v63, %v5854_v55  ;;  %v1310_v46 = vpop.f32.mrf.mxu0 }
 0x151   :  { %1601 = vmatmul.bf16.gmra.mxu2 %v5748_v26  ;;  %v1311_v43 = vadd.f32 %v1310_v46, %v5929_v61  ;;  %v5201_v26 = vld [vmem:[#allocation5 + $0x1ec] sm:$0xf]  ;;  %v4311_v46 = vor.u32 %v5169_v7, %v4308_v3 }
 0x152   :  { %v1359_v15 = vpop.f32.mrf.mxu1  ;;  %v1896_v44 = vmax.f32 %v1260_v59, 0.0  ;;  %v5243_v59 = vld [vmem:[#allocation5 + $0x334] sm:$0xf0] }
 0x153   :  { %v1360_v52 = vadd.f32 %v1359_v15, %v1311_v43  ;;  %v4436_v43 = vld [vmem:[#allocation5 + $0x1f8] sm:$0xf0]  ;;  %1676 = vmatpush.bf16.msrb.mxu0 %v4311_v46  ;;  %v5161_v46 = vld [vmem:[#allocation5 + $0xac] sm:$0xf] }
 0x154   :  { %v1406_v33 = vpop.f32.mrf.mxu2  ;;  %v4439_v15 = vor.u32 %v5201_v26, %v4436_v43  ;;  %v4276_v43 = vld [vmem:[#allocation5 + $0xb8] sm:$0xf0] }
 0x155   :  { %v5982_v22 = vadd.f32 %v1406_v33, %v1358_v6 }
 0x156   :  { %1725 = vmatpush.bf16.msrb.mxu1 %v4439_v15 }
 0x157   :  { %v1261_v56 = vpop.f32.mrf.mxu3 }
 0x158   :  { %v1262_v51 = vadd.f32 %v1261_v56, %v5862_v19  ;;  %v1313_v11 = vpop.f32.mrf.mxu0  ;;  %v4594_v19 = vld [vmem:[#allocation5 + $0x328] sm:$0xf] }
 0x159   :  { %v1314_v38 = vadd.f32 %v1313_v11, %v5929_v61  ;;  %v4595_v56 = vor.u32 %v5243_v59, %v4594_v19  ;;  %v5165_v11 = vld [vmem:[#allocation5 + $0xcc] sm:$0xf] }
 0x15a   :  { %v1900_v62 = vmax.f32 %v1262_v51, 0.0  ;;  %v1362_v55 = vpop.f32.mrf.mxu1  ;;  %v5193_v19 = vld [vmem:[#allocation5 + $0x1ac] sm:$0xf] }
 0x15b   :  { %v1363_v48 = vadd.f32 %v1362_v55, %v1314_v38  ;;  %1508 = vmatmul.bf16.gmra.mxu0 %v5755_v0  ;;  %v4292_v38 = vld [vmem:[#allocation5 + $0xd8] sm:$0xf0]  ;;  %v5197_v55 = vld [vmem:[#allocation5 + $0x1cc] sm:$0xf]  ;;  %1633 = vmatpush.bf16.msrb.mxu3 %v4595_v56 }
 0x15c   :  { %v1408_v63 = vpop.f32.mrf.mxu2  ;;  %1459 = vmatmul.bf16.gmra.mxu3 %v5858_v2  ;;  %v5991_v33 = vpack.c.bf16 %v1900_v62, %v1896_v44  ;;  %v4295_v7 = vor.u32 %v5165_v11, %v4292_v38  ;;  %v5157_v11 = vld [vmem:[#allocation5 + $0x8c] sm:$0xf]  ;;  %v4260_v38 = vld [vmem:[#allocation5 + $0x98] sm:$0xf0] }
 0x15d   :  { %v5988_v6 = vadd.f32 %v1408_v63, %v1360_v52  ;;  %1557 = vmatmul.bf16.gmra.mxu1 %v5760_v1  ;;  %v4420_v52 = vld [vmem:[#allocation5 + $0x1d8] sm:$0xf0] }
 0x15e   :  { %6957 = vst [vmem:[#allocation21_spill] sm:$0xff] %v5991_v33  ;;  %v4423_v3 = vor.u32 %v5197_v55, %v4420_v52  ;;  %1677 = vmatpush.bf16.msrb.mxu0 %v4295_v7  ;;  %v5189_v55 = vld [vmem:[#allocation5 + $0x18c] sm:$0xf]  ;;  %v4263_v7 = vor.u32 %v5157_v11, %v4260_v38 }
 0x15f   :  { %v1264_v51 = vpop.f32.mrf.mxu3  ;;  %v5233_v11 = vld [vmem:[#allocation5 + $0x2ec] sm:$0xf] }
 0x160   :  { %v1265_v0 = vadd.f32 %v1264_v51, %v5872_v12  ;;  %v1315_v63 = vpop.f32.mrf.mxu0  ;;  %1726 = vmatpush.bf16.msrb.mxu1 %v4423_v3  ;;  %v4279_v12 = vor.u32 %v5161_v46, %v4276_v43  ;;  %v4404_v51 = vld [vmem:[#allocation5 + $0x1b8] sm:$0xf0] }
 0x161   :  { %1606 = vmatmul.bf16.gmra.mxu2 %v5764_v4  ;;  %v1316_v26 = vadd.f32 %v1315_v63, %v5929_v61  ;;  %v4407_v33 = vor.u32 %v5193_v19, %v4404_v51  ;;  %v4388_v63 = vld [vmem:[#allocation5 + $0x198] sm:$0xf0]  ;;  %v5239_v51 = vld [vmem:[#allocation5 + $0x314] sm:$0xf0] }
 0x162   :  { %v1364_v44 = vpop.f32.mrf.mxu1  ;;  %1678 = vmatpush.bf16.msrb.mxu0 %v4279_v12  ;;  %v4391_v4 = vor.u32 %v5189_v55, %v4388_v63  ;;  %v1904_v1 = vmax.f32 %v1265_v0, 0.0  ;;  %v4244_v46 = vld [vmem:[#allocation5 + $0x78] sm:$0xf0]  ;;  %v4578_v0 = vld [vmem:[#allocation5 + $0x308] sm:$0xf] }
 0x163   :  { %v1365_v59 = vadd.f32 %v1364_v44, %v1316_v26  ;;  %v4372_v12 = vld [vmem:[#allocation5 + $0x178] sm:$0xf0]  ;;  %v5149_v63 = vld [vmem:[#allocation5 + $0x4c] sm:$0xf] }
 0x164   :  { %v1411_v62 = vpop.f32.mrf.mxu2  ;;  %1727 = vmatpush.bf16.msrb.mxu1 %v4407_v33  ;;  %v5185_v33 = vld [vmem:[#allocation5 + $0x16c] sm:$0xf]  ;;  %v4564_v55 = vld [vmem:[#allocation5 + $0x2f8] sm:$0xf0] }
 0x165   :  { %v5996_v15 = vadd.f32 %v1411_v62, %v1363_v48  ;;  %v5153_v62 = vld [vmem:[#allocation5 + $0x6c] sm:$0xf] }
 0x166   :  { %1679 = vmatpush.bf16.msrb.mxu0 %v4263_v7  ;;  %v4247_v19 = vor.u32 %v5153_v62, %v4244_v46  ;;  %v4567_v7 = vor.u32 %v5233_v11, %v4564_v55  ;;  %v4356_v62 = vld [vmem:[#allocation5 + $0x158] sm:$0xf0] }
 0x167   :  { %v1266_v56 = vpop.f32.mrf.mxu3  ;;  %v4212_v11 = vld [vmem:[#allocation5 + $0x38] sm:$0xf0] }
 0x168   :  { %v1267_v52 = vadd.f32 %v1266_v56, %v5881_v5  ;;  %v1318_v3 = vpop.f32.mrf.mxu0  ;;  %1728 = vmatpush.bf16.msrb.mxu1 %v4391_v4  ;;  %v4375_v56 = vor.u32 %v5185_v33, %v4372_v12  ;;  %v4579_v4 = vor.u32 %v5239_v51, %v4578_v0  ;;  %1774 = vmatpush.bf16.msrb.mxu2 %v4567_v7  ;;  %v4548_v33 = vld [vmem:[#allocation5 + $0x2d8] sm:$0xf0] }
 0x169   :  { %v1319_v48 = vadd.f32 %v1318_v3, %v5929_v61  ;;  %v4228_v3 = vld [vmem:[#allocation5 + $0x58] sm:$0xf0] }
 0x16a   :  { %v1908_v2 = vmax.f32 %v1267_v52, 0.0  ;;  %v1367_v26 = vpop.f32.mrf.mxu1  ;;  %1680 = vmatpush.bf16.msrb.mxu0 %v4247_v19  ;;  %1634 = vmatpush.bf16.msrb.mxu3 %v4579_v4 }
 0x16b   :  { %v1368_v43 = vadd.f32 %v1367_v26, %v1319_v48  ;;  %1513 = vmatmul.bf16.gmra.mxu0 %v5771_v31  ;;  %v6959_v26 = vld [vmem:[#allocation15_spill] sm:$0xff] }
 0x16c   :  { %v1413_v44 = vpop.f32.mrf.mxu2  ;;  %1464 = vmatmul.bf16.gmra.mxu3 %v5877_v50  ;;  %v6005_v38 = vpack.c.bf16 %v1908_v2, %v1904_v1  ;;  %1729 = vmatpush.bf16.msrb.mxu1 %v4375_v56  ;;  %v5229_v2 = vld [vmem:[#allocation5 + $0x2cc] sm:$0xf] }
 0x16d   :  { %v6002_v5 = vadd.f32 %v1413_v44, %v1365_v59  ;;  %1562 = vmatmul.bf16.gmra.mxu1 %v5775_v8  ;;  %v5181_v59 = vld [vmem:[#allocation5 + $0x14c] sm:$0xf]  ;;  %v4231_v44 = vor.u32 %v5149_v63, %v4228_v3  ;;  %v4551_v0 = vor.u32 %v5229_v2, %v4548_v33  ;;  %v4340_v63 = vld [vmem:[#allocation5 + $0x138] sm:$0xf0] }
 0x16e   :  { %6958 = vst [vmem:[#allocation22_spill] sm:$0xff] %v6005_v38  ;;  %v4359_v1 = vor.u32 %v5181_v59, %v4356_v62  ;;  %v5145_v56 = vld [vmem:[#allocation5 + $0x2c] sm:$0xf]  ;;  %v4532_v59 = vld [vmem:[#allocation5 + $0x2b8] sm:$0xf0] }
 0x16f   :  { %v1269_v52 = vpop.f32.mrf.mxu3  ;;  %1681 = vmatpush.bf16.msrb.mxu0 %v4231_v44  ;;  %v4215_v4 = vor.u32 %v5145_v56, %v4212_v11  ;;  %1775 = vmatpush.bf16.msrb.mxu2 %v4551_v0  ;;  %v5225_v3 = vld [vmem:[#allocation5 + $0x2ac] sm:$0xf]  ;;  %v4196_v2 = vld [vmem:[#allocation5 + $0x18] sm:$0xf0] }
 0x170   :  { %v1270_v48 = vadd.f32 %v1269_v52, %v5892_v41  ;;  %v1320_v46 = vpop.f32.mrf.mxu0  ;;  %1730 = vmatpush.bf16.msrb.mxu1 %v4359_v1  ;;  %v5177_v41 = vld [vmem:[#allocation5 + $0x12c] sm:$0xf]  ;;  %v4535_v62 = vor.u32 %v5225_v3, %v4532_v59 }
 0x171   :  { %1611 = vmatmul.bf16.gmra.mxu2 %v6959_v26  ;;  %v1321_v19 = vadd.f32 %v1320_v46, %v5929_v61  ;;  %v4343_v7 = vor.u32 %v5177_v41, %v4340_v63  ;;  %v5141_v44 = vld [vmem:[#allocation5 + $0xc] sm:$0xf]  ;;  %v4324_v26 = vld [vmem:[#allocation5 + $0x118] sm:$0xf0] }
 0x172   :  { %v1369_v12 = vpop.f32.mrf.mxu1  ;;  %v5173_v33 = vld [vmem:[#allocation5 + $0x10c] sm:$0xf]  ;;  %v4199_v38 = vor.u32 %v5141_v44, %v4196_v2  ;;  %v1912_v0 = vmax.f32 %v1270_v48, 0.0 }
 0x173   :  { %v1370_v55 = vadd.f32 %v1369_v12, %v1321_v19  ;;  %1682 = vmatpush.bf16.msrb.mxu0 %v4215_v4  ;;  %1776 = vmatpush.bf16.msrb.mxu2 %v4535_v62  ;;  %v5221_v12 = vld [vmem:[#allocation5 + $0x28c] sm:$0xf] }
 0x174   :  { %v1416_v51 = vpop.f32.mrf.mxu2  ;;  %1731 = vmatpush.bf16.msrb.mxu1 %v4343_v7  ;;  %v5265_v48 = vld [vmem:[#allocation5 + $0x3ec] sm:$0xf] }
 0x175   :  { %v6010_v52 = vadd.f32 %v1416_v51, %v1368_v43  ;;  %v4327_v43 = vor.u32 %v5173_v33, %v4324_v26  ;;  %v4516_v51 = vld [vmem:[#allocation5 + $0x298] sm:$0xf0]  ;;  %v5217_v59 = vld [vmem:[#allocation5 + $0x26c] sm:$0xf] }
 0x176   :  { %v4519_v4 = vor.u32 %v5221_v12, %v4516_v51  ;;  %v4692_v26 = vld [vmem:[#allocation5 + $0x3f8] sm:$0xf0] }
 0x177   :  { %v1271_v46 = vpop.f32.mrf.mxu3  ;;  %1683 = vmatpush.bf16.msrb.mxu0 %v4199_v38  ;;  %v4695_v62 = vor.u32 %v5265_v48, %v4692_v26  ;;  %v4500_v38 = vld [vmem:[#allocation5 + $0x278] sm:$0xf0]  ;;  %v5205_v26 = vld [vmem:[#allocation5 + $0x20c] sm:$0xf] }
 0x178   :  { %v1272_v1 = vadd.f32 %v1271_v46, %v5900_v40  ;;  %v1323_v19 = vpop.f32.mrf.mxu0  ;;  %1732 = vmatpush.bf16.msrb.mxu1 %v4327_v43  ;;  %1777 = vmatpush.bf16.msrb.mxu2 %v4519_v4  ;;  %v4503_v44 = vor.u32 %v5217_v59, %v4500_v38  ;;  %v4452_v59 = vld [vmem:[#allocation5 + $0x218] sm:$0xf0] }
 0x179   :  { %v1324_v11 = vadd.f32 %v1323_v19, %v5929_v61  ;;  %1823 = vmatpush.bf16.msra.mxu3 %v4695_v62 }
 0x17a   :  { %v1916_v56 = vmax.f32 %v1272_v1, 0.0  ;;  %v1372_v41 = vpop.f32.mrf.mxu1  ;;  %v4484_v1 = vld [vmem:[#allocation5 + $0x258] sm:$0xf0] }
 0x17b   :  { %v1373_v7 = vadd.f32 %v1372_v41, %v1324_v11  ;;  %1518 = vmatmul.bf16.gmra.mxu0 %v5787_v29  ;;  %v5209_v11 = vld [vmem:[#allocation5 + $0x22c] sm:$0xf]  ;;  %v4468_v41 = vld [vmem:[#allocation5 + $0x238] sm:$0xf0] }
 0x17c   :  { %v1418_v63 = vpop.f32.mrf.mxu2  ;;  %1469 = vmatmul.bf16.gmra.mxu3 %v5895_v10  ;;  %v6018_v3 = vpack.c.bf16 %v1916_v56, %v1912_v0  ;;  %1778 = vmatpush.bf16.msrb.mxu2 %v4503_v44  ;;  %v4471_v4 = vor.u32 %v5209_v11, %v4468_v41  ;;  %v6960_v11 = vld [vmem:[#allocation16_spill] sm:$0xff] }
 0x17d   :  { %v6016_v40 = vadd.f32 %v1418_v63, %v1370_v55  ;;  %1567 = vmatmul.bf16.gmra.mxu1 %v5791_v32  ;;  %v5213_v55 = vld [vmem:[#allocation5 + $0x24c] sm:$0xf] }
 0x17e   :  { %v4487_v12 = vor.u32 %v5213_v55, %v4484_v1 }
 0x17f   :  { %v1274_v46 = vpop.f32.mrf.mxu3 }
 0x180   :  { %v1275_v2 = vadd.f32 %v1274_v46, %v5910_v9  ;;  %v1325_v33 = vpop.f32.mrf.mxu0  ;;  %1779 = vmatpush.bf16.msrb.mxu2 %v4487_v12 }
 0x181   :  { %1616 = vmatmul.bf16.gmra.mxu2 %v5795_v42  ;;  %v1326_v19 = vadd.f32 %v1325_v33, %v5929_v61  ;;  %v4455_v33 = vor.u32 %v5205_v26, %v4452_v59  ;;  %v6043_v26 = vld [vmem:[%s6952_s28] sm:$0xf] }
 0x182   :  { %v1374_v43 = vpop.f32.mrf.mxu1  ;;  %v1920_v62 = vmax.f32 %v1275_v2, 0.0  ;;  %v4676_v2 = vld [vmem:[#allocation5 + $0x3d8] sm:$0xf0]  ;;  %v6046_v59 = vperm.slane %v6043_v26, 2 }
 0x183   :  { %v1375_v0 = vadd.f32 %v1374_v43, %v1326_v19 }
 0x184   :  { %v1421_v51 = vpop.f32.mrf.mxu2  ;;  %1780 = vmatpush.bf16.msrb.mxu2 %v4471_v4 }
 0x185   :  { %v6024_v56 = vadd.f32 %v1421_v51, %v1373_v7 }
 0x187   :  { %v1276_v9 = vpop.f32.mrf.mxu3 }
 0x188   :  { %v1277_v63 = vadd.f32 %v1276_v9, %v5918_v20  ;;  %v1328_v48 = vpop.f32.mrf.mxu0  ;;  %1781 = vmatpush.bf16.msrb.mxu2 %v4455_v33  ;;  %v5261_v20 = vld [vmem:[#allocation5 + $0x3cc] sm:$0xf] }
 0x189   :  { %v1329_v46 = vadd.f32 %v1328_v48, %v5929_v61  ;;  %v4679_v43 = vor.u32 %v5261_v20, %v4676_v2 }
 0x18a   :  { %v1924_v38 = vmax.f32 %v1277_v63, 0.0  ;;  %v1377_v44 = vpop.f32.mrf.mxu1 }
 0x18b   :  { %v1378_v7 = vadd.f32 %v1377_v44, %v1329_v46  ;;  %1523 = vmatmul.bf16.gmra.mxu0 %v5799_v13  ;;  %1824 = vmatpush.bf16.msra.mxu3 %v4679_v43  ;;  %v5257_v43 = vld [vmem:[#allocation5 + $0x3ac] sm:$0xf] }
 0x18c   :  { %v1423_v55 = vpop.f32.mrf.mxu2  ;;  %1474 = vmatmul.bf16.gmra.mxu3 %v5913_v54  ;;  %v6032_v19 = vpack.c.bf16 %v1924_v38, %v1920_v62 }
 0x18d   :  { %v6030_v1 = vadd.f32 %v1423_v55, %v1375_v0  ;;  %1572 = vmatmul.bf16.gmra.mxu1 %v5803_v17 }
 0x18f   :  { %v1279_v12 = vpop.f32.mrf.mxu3 }
 0x190   :  { %v1280_v51 = vadd.f32 %v1279_v12, %v5926_v18  ;;  %v1330_v41 = vpop.f32.mrf.mxu0 }
 0x191   :  { %1621 = vmatmul.bf16.gmra.mxu2 %v6960_v11  ;;  %v1331_v4 = vadd.f32 %v1330_v41, %v5929_v61 }
 0x192   :  { %v1379_v9 = vpop.f32.mrf.mxu1  ;;  %v1928_v46 = vmax.f32 %v1280_v51, 0.0 }
 0x193   :  { %v1380_v63 = vadd.f32 %v1379_v9, %v1331_v4 }
 0x194   :  { %v1426_v0 = vpop.f32.mrf.mxu2 }
 0x195   :  { %v6038_v48 = vadd.f32 %v1426_v0, %v1378_v7 }
 0x197   :  { %v1281_v18 = vpop.f32.mrf.mxu3 }
 0x198   :  { %v1282_v62 = vadd.f32 %v1281_v18, %v5933_v27  ;;  %v1489_v38 = vpop.f32.mrf.mxu0  ;;  %v4660_v27 = vld [vmem:[#allocation5 + $0x3b8] sm:$0xf0] }
 0x199   :  { %v1490_v61 = vadd.f32 %v1489_v38, %v6046_v59  ;;  %v4663_v12 = vor.u32 %v5257_v43, %v4660_v27 }
 0x19a   :  { %v1932_v44 = vmax.f32 %v1282_v62, 0.0  ;;  %v1538_v33 = vpop.f32.mrf.mxu1 }
 0x19b   :  { %v1539_v7 = vadd.f32 %v1538_v33, %v1490_v61  ;;  %1684 = vmatmul.bf16.vlgmr.msrb.gmra.mxu0 %v5719_v23  ;;  %1825 = vmatpush.bf16.msra.mxu3 %v4663_v12 }
 0x19c   :  { %v1428_v55 = vpop.f32.mrf.mxu2  ;;  %1635 = vmatmul.bf16.vlgmr.msrb.gmra.mxu3 %v5811_v45  ;;  %v6054_v2 = vpack.c.bf16 %v1932_v44, %v1928_v46 }
 0x19d   :  { %v6052_v20 = vadd.f32 %v1428_v55, %v1380_v63  ;;  %1733 = vmatmul.bf16.vlgmr.msrb.gmra.mxu1 %v5757_v53 }
 0x19e   :  { %6961 = vst [vmem:[#allocation16_spill] sm:$0xff] %v6054_v2 }
 0x19f   :  { %v1440_v51 = vpop.f32.mrf.mxu3 }
 0x1a0   :  { %v1441_v41 = vadd.f32 %v1440_v51, %v5941_v49  ;;  %v1491_v4 = vpop.f32.mrf.mxu0 }
 0x1a1   :  { %1782 = vmatmul.bf16.vlgmr.msrb.gmra.mxu2 %v5789_v30  ;;  %v1492_v9 = vadd.f32 %v1491_v4, %v6046_v59 }
 0x1a2   :  { %v1540_v0 = vpop.f32.mrf.mxu1  ;;  %v1873_v46 = vmax.f32 %v1441_v41, 0.0 }
 0x1a3   :  { %v1541_v63 = vadd.f32 %v1540_v0, %v1492_v9 }
 0x1a4   :  { %v1587_v23 = vpop.f32.mrf.mxu2 }
 0x1a5   :  { %v6060_v18 = vadd.f32 %v1587_v23, %v1539_v7  ;;  %v5253_v7 = vld [vmem:[#allocation5 + $0x38c] sm:$0xf] }
 0x1a7   :  { %v1442_v62 = vpop.f32.mrf.mxu3 }
 0x1a8   :  { %v1443_v53 = vadd.f32 %v1442_v62, %v5949_v57  ;;  %v1494_v38 = vpop.f32.mrf.mxu0  ;;  %v4644_v57 = vld [vmem:[#allocation5 + $0x398] sm:$0xf0] }
 0x1a9   :  { %v1495_v61 = vadd.f32 %v1494_v38, %v6046_v59  ;;  %v4647_v27 = vor.u32 %v5253_v7, %v4644_v57 }
 0x1aa   :  { %v1877_v44 = vmax.f32 %v1443_v53, 0.0  ;;  %v1543_v49 = vpop.f32.mrf.mxu1 }
 0x1ab   :  { %v1544_v55 = vadd.f32 %v1543_v49, %v1495_v61  ;;  %1689 = vmatmul.bf16.gmra.mxu0 %v5739_v47  ;;  %1826 = vmatpush.bf16.msra.mxu3 %v4647_v27 }
 0x1ac   :  { %v1589_v33 = vpop.f32.mrf.mxu2  ;;  %v6064_v30 = vpack.c.bf16 %v1877_v44, %v1873_v46  ;;  %1640 = vmatmul.bf16.gmra.mxu3 %v5817_v35 }
 0x1ad   :  { %v6068_v43 = vadd.f32 %v1589_v33, %v1541_v63  ;;  %1738 = vmatmul.bf16.gmra.mxu1 %v5773_v37  ;;  %v5249_v33 = vld [vmem:[#allocation5 + $0x36c] sm:$0xf] }
 0x1af   :  { %v1445_v12 = vpop.f32.mrf.mxu3 }
 0x1b0   :  { %v1446_v51 = vadd.f32 %v1445_v12, %v5955_v36  ;;  %v1496_v41 = vpop.f32.mrf.mxu0 }
 0x1b1   :  { %1787 = vmatmul.bf16.gmra.mxu2 %v5801_v16  ;;  %v1497_v4 = vadd.f32 %v1496_v41, %v6046_v59 }
 0x1b2   :  { %v1545_v9 = vpop.f32.mrf.mxu1  ;;  %v1881_v53 = vmax.f32 %v1446_v51, 0.0 }
 0x1b3   :  { %v1546_v23 = vadd.f32 %v1545_v9, %v1497_v4 }
 0x1b4   :  { %v1592_v0 = vpop.f32.mrf.mxu2 }
 0x1b5   :  { %v6074_v47 = vadd.f32 %v1592_v0, %v1544_v55 }
 0x1b7   :  { %v1447_v63 = vpop.f32.mrf.mxu3 }
 0x1b8   :  { %v1448_v37 = vadd.f32 %v1447_v63, %v5960_v28  ;;  %v1499_v62 = vpop.f32.mrf.mxu0  ;;  %v4628_v28 = vld [vmem:[#allocation5 + $0x378] sm:$0xf0] }
 0x1b9   :  { %v1500_v46 = vadd.f32 %v1499_v62, %v6046_v59  ;;  %v4631_v55 = vor.u32 %v5249_v33, %v4628_v28  ;;  %v6963_v28 = vld [vmem:[#allocation11_spill] sm:$0xff] }
 0x1ba   :  { %v1885_v38 = vmax.f32 %v1448_v37, 0.0  ;;  %v1548_v36 = vpop.f32.mrf.mxu1 }
 0x1bb   :  { %v1549_v16 = vadd.f32 %v1548_v36, %v1500_v46  ;;  %1694 = vmatmul.bf16.gmra.mxu0 %v5721_v24  ;;  %1827 = vmatpush.bf16.msra.mxu3 %v4631_v55  ;;  %v6962_v46 = vld [vmem:[#allocation10_spill] sm:$0xff]  ;;  %v5245_v36 = vld [vmem:[#allocation5 + $0x34c] sm:$0xf] }
 0x1bc   :  { %v1594_v44 = vpop.f32.mrf.mxu2  ;;  %1645 = vmatmul.bf16.gmra.mxu3 %v5823_v58  ;;  %v6082_v49 = vpack.c.bf16 %v1885_v38, %v1881_v53 }
 0x1bd   :  { %v6080_v61 = vadd.f32 %v1594_v44, %v1546_v23  ;;  %1743 = vmatmul.bf16.gmra.mxu1 %v5723_v25 }
 0x1bf   :  { %v1450_v7 = vpop.f32.mrf.mxu3 }
 0x1c0   :  { %v1451_v57 = vadd.f32 %v1450_v7, %v5968_v39  ;;  %v1501_v27 = vpop.f32.mrf.mxu0 }
 0x1c1   :  { %1792 = vmatmul.bf16.gmra.mxu2 %v5731_v34  ;;  %v1502_v12 = vadd.f32 %v1501_v27, %v6046_v59 }
 0x1c2   :  { %v1550_v51 = vpop.f32.mrf.mxu1  ;;  %v1889_v23 = vmax.f32 %v1451_v57, 0.0 }
 0x1c3   :  { %v1551_v41 = vadd.f32 %v1550_v51, %v1502_v12 }
 0x1c4   :  { %v1597_v24 = vpop.f32.mrf.mxu2 }
 0x1c5   :  { %v6088_v4 = vadd.f32 %v1597_v24, %v1549_v16 }
 0x1c7   :  { %v1452_v9 = vpop.f32.mrf.mxu3 }
 0x1c8   :  { %v1453_v25 = vadd.f32 %v1452_v9, %v5974_v60  ;;  %v1504_v0 = vpop.f32.mrf.mxu0  ;;  %v4612_v60 = vld [vmem:[#allocation5 + $0x358] sm:$0xf0] }
 0x1c9   :  { %v1505_v37 = vadd.f32 %v1504_v0, %v6046_v59  ;;  %v4615_v44 = vor.u32 %v5245_v36, %v4612_v60  ;;  %v6965_v36 = vld [vmem:[#allocation12_spill] sm:$0xff] }
 0x1ca   :  { %v1893_v63 = vmax.f32 %v1453_v25, 0.0  ;;  %v1553_v39 = vpop.f32.mrf.mxu1 }
 0x1cb   :  { %v1554_v34 = vadd.f32 %v1553_v39, %v1505_v37  ;;  %1699 = vmatmul.bf16.gmra.mxu0 %v5741_v14  ;;  %1828 = vmatpush.bf16.msra.mxu3 %v4615_v44  ;;  %v5283_v37 = vld [vmem:[#allocation7 + $0x74] sm:$0xf0]  ;;  %v4818_v39 = vld [vmem:[#allocation7 + $0xf0] sm:$0xf] }
 0x1cc   :  { %v1599_v62 = vpop.f32.mrf.mxu2  ;;  %1650 = vmatmul.bf16.gmra.mxu3 %v5841_v21  ;;  %v6096_v38 = vpack.c.bf16 %v1893_v63, %v1889_v23  ;;  %v4754_v63 = vld [vmem:[#allocation7 + $0x70] sm:$0xf]  ;;  %v6966_v44 = vld [vmem:[#allocation13_spill] sm:$0xff] }
 0x1cd   :  { %v6094_v53 = vadd.f32 %v1599_v62, %v1551_v41  ;;  %1748 = vmatmul.bf16.gmra.mxu1 %v6962_v46  ;;  %v6964_v46 = vld [vmem:[#allocation17_spill] sm:$0xff]  ;;  %v4755_v60 = vor.u32 %v5283_v37, %v4754_v63 }
 0x1cf   :  { %v1455_v16 = vpop.f32.mrf.mxu3  ;;  %2358 = vmatpush.bf16.msra.mxu0 %v4755_v60  ;;  %v4802_v60 = vld [vmem:[#allocation7 + $0xd0] sm:$0xf] }
 0x1d0   :  { %v1456_v33 = vadd.f32 %v1455_v16, %v5982_v22  ;;  %v1506_v55 = vpop.f32.mrf.mxu0  ;;  %v5241_v16 = vld [vmem:[#allocation5 + $0x32c] sm:$0xf] }
 0x1d1   :  { %1797 = vmatmul.bf16.gmra.mxu2 %v6963_v28  ;;  %v1507_v7 = vadd.f32 %v1506_v55, %v6046_v59 }
 0x1d2   :  { %v1555_v57 = vpop.f32.mrf.mxu1  ;;  %v1897_v9 = vmax.f32 %v1456_v33, 0.0  ;;  %v4596_v33 = vld [vmem:[#allocation5 + $0x338] sm:$0xf0] }
 0x1d3   :  { %v1556_v27 = vadd.f32 %v1555_v57, %v1507_v7  ;;  %v4599_v7 = vor.u32 %v5241_v16, %v4596_v33 }
 0x1d4   :  { %v1602_v14 = vpop.f32.mrf.mxu2 }
 0x1d5   :  { %v6102_v12 = vadd.f32 %v1602_v14, %v1554_v34  ;;  %v4746_v14 = vld [vmem:[#allocation7 + $0x60] sm:$0xf]  ;;  %1829 = vmatpush.bf16.msra.mxu3 %v4599_v7  ;;  %v5277_v7 = vld [vmem:[#allocation7 + $0x44] sm:$0xf0] }
 0x1d7   :  { %v1457_v51 = vpop.f32.mrf.mxu3 }
 0x1d8   :  { %v1458_v24 = vadd.f32 %v1457_v51, %v5988_v6  ;;  %v1509_v41 = vpop.f32.mrf.mxu0  ;;  %v5299_v6 = vld [vmem:[#allocation7 + $0xf4] sm:$0xf0]  ;;  %v5281_v51 = vld [vmem:[#allocation7 + $0x64] sm:$0xf0] }
 0x1d9   :  { %v1510_v0 = vadd.f32 %v1509_v41, %v6046_v59  ;;  %v4819_v28 = vor.u32 %v5299_v6, %v4818_v39  ;;  %v4738_v39 = vld [vmem:[#allocation7 + $0x50] sm:$0xf] }
 0x1da   :  { %v1901_v25 = vmax.f32 %v1458_v24, 0.0  ;;  %v1558_v22 = vpop.f32.mrf.mxu1  ;;  %v4810_v24 = vld [vmem:[#allocation7 + $0xe0] sm:$0xf] }
 0x1db   :  { %v6106_v62 = vadd.f32 %v1558_v22, %v1510_v0  ;;  %1704 = vmatmul.bf16.gmra.mxu0 %v6965_v36  ;;  %2407 = vmatpush.bf16.msra.mxu1 %v4819_v28  ;;  %v4747_v0 = vor.u32 %v5281_v51, %v4746_v14  ;;  %v5297_v22 = vld [vmem:[#allocation7 + $0xe4] sm:$0xf0]  ;;  %v5279_v36 = vld [vmem:[#allocation7 + $0x54] sm:$0xf0]  ;;  %v4730_v28 = vld [vmem:[#allocation7 + $0x40] sm:$0xf] }
 0x1dc   :  { %v1604_v23 = vpop.f32.mrf.mxu2  ;;  %1655 = vmatmul.bf16.gmra.mxu3 %v6964_v46  ;;  %v6113_v55 = vpack.c.bf16 %v1901_v25, %v1897_v9  ;;  %v4811_v63 = vor.u32 %v5297_v22, %v4810_v24  ;;  %v4731_v51 = vor.u32 %v5277_v7, %v4730_v28  ;;  %v5293_v24 = vld [vmem:[#allocation7 + $0xc4] sm:$0xf0]  ;;  %v4882_v28 = vld [vmem:[#allocation7 + $0x170] sm:$0xf] }
 0x1dd   :  { %v6110_v34 = vadd.f32 %v1604_v23, %v1556_v27  ;;  %1753 = vmatmul.bf16.gmra.mxu1 %v6966_v44  ;;  %v6968_v27 = vld [vmem:[#allocation14_spill] sm:$0xff]  ;;  %2359 = vmatpush.bf16.msra.mxu0 %v4747_v0  ;;  %v5295_v44 = vld [vmem:[#allocation7 + $0xd4] sm:$0xf0] }
 0x1de   :  { %6967 = vst [vmem:[#allocation10_spill] sm:$0xff] %v6113_v55  ;;  %v4803_v16 = vor.u32 %v5295_v44, %v4802_v60  ;;  %v4786_v60 = vld [vmem:[#allocation7 + $0xb0] sm:$0xf]  ;;  %v5291_v44 = vld [vmem:[#allocation7 + $0xb4] sm:$0xf0] }
 0x1df   :  { %v1460_v57 = vpop.f32.mrf.mxu3  ;;  %2408 = vmatpush.bf16.msra.mxu1 %v4811_v63 }
 0x1e0   :  { %v1461_v41 = vadd.f32 %v1460_v57, %v5996_v15  ;;  %v1511_v23 = vpop.f32.mrf.mxu0  ;;  %v4739_v15 = vor.u32 %v5279_v36, %v4738_v39  ;;  %v4794_v57 = vld [vmem:[#allocation7 + $0xc0] sm:$0xf]  ;;  %v4722_v39 = vld [vmem:[#allocation7 + $0x30] sm:$0xf]  ;;  %v5275_v36 = vld [vmem:[#allocation7 + $0x34] sm:$0xf0] }
 0x1e1   :  { %1802 = vmatmul.bf16.gmra.mxu2 %v6968_v27  ;;  %v1512_v37 = vadd.f32 %v1511_v23, %v6046_v59  ;;  %v4795_v0 = vor.u32 %v5293_v24, %v4794_v57 }
 0x1e2   :  { %v1560_v9 = vpop.f32.mrf.mxu1  ;;  %2360 = vmatpush.bf16.msra.mxu0 %v4739_v15  ;;  %v1905_v22 = vmax.f32 %v1461_v41, 0.0  ;;  %v5237_v41 = vld [vmem:[#allocation5 + $0x30c] sm:$0xf] }
 0x1e3   :  { %v6120_v6 = vadd.f32 %v1560_v9, %v1512_v37  ;;  %2409 = vmatpush.bf16.msra.mxu1 %v4803_v16  ;;  %v4580_v16 = vld [vmem:[#allocation5 + $0x318] sm:$0xf0] }
 0x1e4   :  { %v6118_v25 = vpop.f32.mrf.mxu2  ;;  %v4583_v57 = vor.u32 %v5237_v41, %v4580_v16 }
 0x1e6   :  { %2361 = vmatpush.bf16.msra.mxu0 %v4731_v51  ;;  %1830 = vmatpush.bf16.msra.mxu3 %v4583_v57 }
 0x1e7   :  { %v1462_v33 = vpop.f32.mrf.mxu3  ;;  %2410 = vmatpush.bf16.msra.mxu1 %v4795_v0  ;;  %v5273_v0 = vld [vmem:[#allocation7 + $0x24] sm:$0xf0] }
 0x1e8   :  { %v1463_v14 = vadd.f32 %v1462_v33, %v6002_v5  ;;  %v1514_v27 = vpop.f32.mrf.mxu0  ;;  %v4723_v5 = vor.u32 %v5275_v36, %v4722_v39  ;;  %v4787_v33 = vor.u32 %v5291_v44, %v4786_v60  ;;  %v5289_v39 = vld [vmem:[#allocation7 + $0xa4] sm:$0xf0] }
 0x1e9   :  { %v1515_v63 = vadd.f32 %v1514_v27, %v6046_v59  ;;  %v4714_v27 = vld [vmem:[#allocation7 + $0x20] sm:$0xf]  ;;  %v5313_v60 = vld [vmem:[#allocation7 + $0x164] sm:$0xf0] }
 0x1ea   :  { %v1909_v23 = vmax.f32 %v1463_v14, 0.0  ;;  %v1563_v37 = vpop.f32.mrf.mxu1  ;;  %2362 = vmatpush.bf16.msra.mxu0 %v4723_v5  ;;  %v5315_v14 = vld [vmem:[#allocation7 + $0x174] sm:$0xf0] }
 0x1eb   :  { %v6126_v15 = vadd.f32 %v1563_v37, %v1515_v63  ;;  %1709 = vmatmul.bf16.gmra.mxu0 %v5771_v31  ;;  %2411 = vmatpush.bf16.msra.mxu1 %v4787_v33  ;;  %v4883_v24 = vor.u32 %v5315_v14, %v4882_v28  ;;  %v4778_v63 = vld [vmem:[#allocation7 + $0xa0] sm:$0xf]  ;;  %v6970_v37 = vld [vmem:[#allocation15_spill] sm:$0xff]  ;;  %v4706_v33 = vld [vmem:[#allocation7 + $0x10] sm:$0xf] }
 0x1ec   :  { %v6124_v9 = vpop.f32.mrf.mxu2  ;;  %1660 = vmatmul.bf16.gmra.mxu3 %v5877_v50  ;;  %v6131_v7 = vpack.c.bf16 %v1909_v23, %v1905_v22  ;;  %v4779_v22 = vor.u32 %v5289_v39, %v4778_v63  ;;  %v4874_v23 = vld [vmem:[#allocation7 + $0x160] sm:$0xf]  ;;  %v4770_v28 = vld [vmem:[#allocation7 + $0x90] sm:$0xf]  ;;  %v5269_v39 = vld [vmem:[#allocation7 + $0x4] sm:$0xf0] }
 0x1ed   :  { %1758 = vmatmul.bf16.gmra.mxu1 %v5775_v8  ;;  %v4715_v8 = vor.u32 %v5273_v0, %v4714_v27  ;;  %2456 = vmatpush.bf16.msra.mxu2 %v4883_v24  ;;  %v4875_v41 = vor.u32 %v5313_v60, %v4874_v23  ;;  %v4866_v27 = vld [vmem:[#allocation7 + $0x150] sm:$0xf]  ;;  %v5311_v0 = vld [vmem:[#allocation7 + $0x154] sm:$0xf0]  ;;  %v5285_v60 = vld [vmem:[#allocation7 + $0x84] sm:$0xf0] }
 0x1ee   :  { %6969 = vst [vmem:[#allocation11_spill] sm:$0xff] %v6131_v7  ;;  %v4867_v63 = vor.u32 %v5311_v0, %v4866_v27  ;;  %v5307_v0 = vld [vmem:[#allocation7 + $0x134] sm:$0xf0] }
 0x1ef   :  { %v1465_v51 = vpop.f32.mrf.mxu3  ;;  %2363 = vmatpush.bf16.msra.mxu0 %v4715_v8  ;;  %2412 = vmatpush.bf16.msra.mxu1 %v4779_v22  ;;  %v4698_v8 = vld [vmem:[#allocation7] sm:$0xf] }
 0x1f0   :  { %v1466_v31 = vadd.f32 %v1465_v51, %v6010_v52  ;;  %v1516_v36 = vpop.f32.mrf.mxu0  ;;  %v5271_v52 = vld [vmem:[#allocation7 + $0x14] sm:$0xf0]  ;;  %v4699_v23 = vor.u32 %v5269_v39, %v4698_v8  ;;  %v4842_v39 = vld [vmem:[#allocation7 + $0x120] sm:$0xf] }
 0x1f1   :  { %1807 = vmatmul.bf16.gmra.mxu2 %v6970_v37  ;;  %v1517_v5 = vadd.f32 %v1516_v36, %v6046_v59  ;;  %v4707_v57 = vor.u32 %v5271_v52, %v4706_v33  ;;  %v5287_v51 = vld [vmem:[#allocation7 + $0x94] sm:$0xf0]  ;;  %v4762_v36 = vld [vmem:[#allocation7 + $0x80] sm:$0xf]  ;;  %v5309_v33 = vld [vmem:[#allocation7 + $0x144] sm:$0xf0] }
 0x1f2   :  { %v1565_v44 = vpop.f32.mrf.mxu1  ;;  %2457 = vmatpush.bf16.msra.mxu2 %v4875_v41  ;;  %v4771_v24 = vor.u32 %v5287_v51, %v4770_v28  ;;  %v1913_v41 = vmax.f32 %v1466_v31, 0.0  ;;  %v4850_v31 = vld [vmem:[#allocation7 + $0x130] sm:$0xf] }
 0x1f3   :  { %v6138_v14 = vadd.f32 %v1565_v44, %v1517_v5  ;;  %2364 = vmatpush.bf16.msra.mxu0 %v4707_v57  ;;  %v4763_v5 = vor.u32 %v5285_v60, %v4762_v36  ;;  %v4858_v44 = vld [vmem:[#allocation7 + $0x140] sm:$0xf]  ;;  %v5305_v36 = vld [vmem:[#allocation7 + $0x124] sm:$0xf0] }
 0x1f4   :  { %v6136_v16 = vpop.f32.mrf.mxu2  ;;  %2413 = vmatpush.bf16.msra.mxu1 %v4771_v24  ;;  %v4859_v51 = vor.u32 %v5309_v33, %v4858_v44  ;;  %v5303_v44 = vld [vmem:[#allocation7 + $0x114] sm:$0xf0] }
 0x1f6   :  { %2458 = vmatpush.bf16.msra.mxu2 %v4867_v63 }
 0x1f7   :  { %v1467_v37 = vpop.f32.mrf.mxu3  ;;  %2365 = vmatpush.bf16.msra.mxu0 %v4699_v23  ;;  %v4843_v23 = vor.u32 %v5305_v36, %v4842_v39 }
 0x1f8   :  { %v1468_v22 = vadd.f32 %v1467_v37, %v6016_v40  ;;  %v1519_v2 = vpop.f32.mrf.mxu0  ;;  %2414 = vmatpush.bf16.msra.mxu1 %v4763_v5  ;;  %v4834_v5 = vld [vmem:[#allocation7 + $0x110] sm:$0xf] }
 0x1f9   :  { %v1520_v28 = vadd.f32 %v1519_v2, %v6046_v59  ;;  %v4851_v2 = vor.u32 %v5307_v0, %v4850_v31  ;;  %v4835_v33 = vor.u32 %v5303_v44, %v4834_v5 }
 0x1fa   :  { %v1917_v52 = vmax.f32 %v1468_v22, 0.0  ;;  %v1568_v57 = vpop.f32.mrf.mxu1  ;;  %2459 = vmatpush.bf16.msra.mxu2 %v4859_v51 }
 0x1fb   :  { %v6144_v27 = vadd.f32 %v1568_v57, %v1520_v28  ;;  %1714 = vmatmul.bf16.gmra.mxu0 %v5787_v29  ;;  %v5301_v28 = vld [vmem:[#allocation7 + $0x104] sm:$0xf0] }
 0x1fc   :  { %v6142_v24 = vpop.f32.mrf.mxu2  ;;  %1665 = vmatmul.bf16.gmra.mxu3 %v5895_v10  ;;  %v6148_v40 = vpack.c.bf16 %v1917_v52, %v1913_v41  ;;  %v4826_v52 = vld [vmem:[#allocation7 + $0x100] sm:$0xf] }
 0x1fd   :  { %1763 = vmatmul.bf16.gmra.mxu1 %v5791_v32 }
 0x1fe   :  { %2460 = vmatpush.bf16.msra.mxu2 %v4851_v2  ;;  %v4827_v2 = vor.u32 %v5301_v28, %v4826_v52 }
 0x1ff   :  { %v1470_v63 = vpop.f32.mrf.mxu3 }
 0x200   :  { %v1471_v37 = vadd.f32 %v1470_v63, %v6024_v56  ;;  %v1521_v8 = vpop.f32.mrf.mxu0 }
 0x201   :  { %1812 = vmatmul.bf16.gmra.mxu2 %v5795_v42  ;;  %v1522_v22 = vadd.f32 %v1521_v8, %v6046_v59 }
 0x202   :  { %v1570_v29 = vpop.f32.mrf.mxu1  ;;  %2461 = vmatpush.bf16.msra.mxu2 %v4843_v23  ;;  %v1921_v57 = vmax.f32 %v1471_v37, 0.0  ;;  %v5331_v37 = vld [vmem:[#allocation7 + $0x1f4] sm:$0xf0] }
 0x203   :  { %v6156_v32 = vadd.f32 %v1570_v29, %v1522_v22 }
 0x204   :  { %v6154_v60 = vpop.f32.mrf.mxu2 }
 0x206   :  { %2462 = vmatpush.bf16.msra.mxu2 %v4835_v33 }
 0x207   :  { %v1472_v41 = vpop.f32.mrf.mxu3 }
 0x208   :  { %v1473_v56 = vadd.f32 %v1472_v41, %v6030_v1  ;;  %v1524_v42 = vpop.f32.mrf.mxu0  ;;  %v4946_v1 = vld [vmem:[#allocation7 + $0x1f0] sm:$0xf] }
 0x209   :  { %v1525_v31 = vadd.f32 %v1524_v42, %v6046_v59  ;;  %v4947_v22 = vor.u32 %v5331_v37, %v4946_v1 }
 0x20a   :  { %v1925_v51 = vmax.f32 %v1473_v56, 0.0  ;;  %v1573_v0 = vpop.f32.mrf.mxu1  ;;  %2463 = vmatpush.bf16.msra.mxu2 %v4827_v2 }
 0x20b   :  { %v6162_v8 = vadd.f32 %v1573_v0, %v1525_v31  ;;  %1719 = vmatmul.bf16.gmra.mxu0 %v5799_v13  ;;  %2505 = vmatpush.bf16.msrb.mxu3 %v4947_v22 }
 0x20c   :  { %v6160_v63 = vpop.f32.mrf.mxu2  ;;  %1670 = vmatmul.bf16.gmra.mxu3 %v5913_v54  ;;  %v6166_v39 = vpack.c.bf16 %v1925_v51, %v1921_v57  ;;  %v6971_v51 = vld [vmem:[#allocation18_spill] sm:$0xff] }
 0x20d   :  { %1768 = vmatmul.bf16.gmra.mxu1 %v5803_v17  ;;  %v6177_v17 = vperm.slane %v6043_v26, 3  ;;  %v4938_v26 = vld [vmem:[#allocation7 + $0x1e0] sm:$0xf] }
 0x20f   :  { %v1475_v36 = vpop.f32.mrf.mxu3 }
 0x210   :  { %v1476_v29 = vadd.f32 %v1475_v36, %v6038_v48  ;;  %v1526_v23 = vpop.f32.mrf.mxu0 }
 0x211   :  { %1817 = vmatmul.bf16.gmra.mxu2 %v6960_v11  ;;  %v1527_v5 = vadd.f32 %v1526_v23, %v6046_v59 }
 0x212   :  { %v1575_v44 = vpop.f32.mrf.mxu1  ;;  %v1929_v52 = vmax.f32 %v1476_v29, 0.0 }
 0x213   :  { %v6174_v13 = vadd.f32 %v1575_v44, %v1527_v5 }
 0x214   :  { %v6172_v33 = vpop.f32.mrf.mxu2 }
 0x217   :  { %v1477_v41 = vpop.f32.mrf.mxu3 }
 0x218   :  { %v1478_v56 = vadd.f32 %v1477_v41, %v6052_v20  ;;  %v1685_v42 = vpop.f32.mrf.mxu0  ;;  %v5329_v20 = vld [vmem:[#allocation7 + $0x1e4] sm:$0xf0] }
 0x219   :  { %v1686_v11 = vadd.f32 %v1685_v42, %v6177_v17  ;;  %v4939_v2 = vor.u32 %v5329_v20, %v4938_v26  ;;  %v6972_v26 = vld [vmem:[#allocation19_spill] sm:$0xff] }
 0x21a   :  { %v1933_v48 = vmax.f32 %v1478_v56, 0.0  ;;  %v1734_v28 = vpop.f32.mrf.mxu1 }
 0x21b   :  { %v6183_v59 = vadd.f32 %v1734_v28, %v1686_v11  ;;  %2366 = vmatmul.bf16.vlgmr.msra.gmra.mxu0 %v6971_v51  ;;  %2506 = vmatpush.bf16.msrb.mxu3 %v4939_v2 }
 0x21c   :  { %v6181_v57 = vpop.f32.mrf.mxu2  ;;  %1831 = vmatmul.bf16.vlgmr.msra.gmra.mxu3 %v5811_v45  ;;  %v6187_v31 = vpack.c.bf16 %v1933_v48, %v1929_v52 }
 0x21d   :  { %2415 = vmatmul.bf16.vlgmr.msra.gmra.mxu1 %v6064_v30 }
 0x21f   :  { %v1636_v0 = vpop.f32.mrf.mxu3 }
 0x220   :  { %v1687_v1 = vpop.f32.mrf.mxu0  ;;  %v1637_v45 = vadd.f32 %v1636_v0, %v6060_v18  ;;  %v4930_v18 = vld [vmem:[#allocation7 + $0x1d0] sm:$0xf] }
 0x221   :  { %v1688_v37 = vadd.f32 %v1687_v1, %v6177_v17 }
 0x222   :  { %v1736_v36 = vpop.f32.mrf.mxu1  ;;  %v1874_v41 = vmax.f32 %v1637_v45, 0.0 }
 0x223   :  { %v6193_v29 = vadd.f32 %v1736_v36, %v1688_v37 }
 0x224   :  { %v6191_v22 = vpop.f32.mrf.mxu2 }
 0x227   :  { %v1638_v23 = vpop.f32.mrf.mxu3 }
 0x228   :  { %v1639_v5 = vadd.f32 %v1638_v23, %v6068_v43  ;;  %v1690_v44 = vpop.f32.mrf.mxu0  ;;  %v5327_v43 = vld [vmem:[#allocation7 + $0x1d4] sm:$0xf0] }
 0x229   :  { %v1691_v42 = vadd.f32 %v1690_v44, %v6177_v17  ;;  %v4931_v0 = vor.u32 %v5327_v43, %v4930_v18 }
 0x22a   :  { %v1878_v56 = vmax.f32 %v1639_v5, 0.0  ;;  %v1739_v52 = vpop.f32.mrf.mxu1 }
 0x22b   :  { %v6202_v28 = vadd.f32 %v1739_v52, %v1691_v42  ;;  %2371 = vmatmul.bf16.gmra.mxu0 %v6972_v26  ;;  %2507 = vmatpush.bf16.msrb.mxu3 %v4931_v0  ;;  %v6974_v0 = vld [vmem:[#allocation20_spill] sm:$0xff] }
 0x22c   :  { %v6198_v48 = vpop.f32.mrf.mxu2  ;;  %v6200_v11 = vpack.c.bf16 %v1878_v56, %v1874_v41  ;;  %1836 = vmatmul.bf16.gmra.mxu3 %v5817_v35 }
 0x22d   :  { %2420 = vmatmul.bf16.gmra.mxu1 %v6082_v49 }
 0x22e   :  { %2464 = vmatmul.bf16.vlgmr.msra.gmra.mxu2 %v6200_v11 }
 0x22f   :  { %v1641_v20 = vpop.f32.mrf.mxu3 }
 0x230   :  { %v1692_v2 = vpop.f32.mrf.mxu0  ;;  %v1642_v35 = vadd.f32 %v1641_v20, %v6074_v47  ;;  %v4922_v47 = vld [vmem:[#allocation7 + $0x1c0] sm:$0xf] }
 0x231   :  { %v1693_v1 = vadd.f32 %v1692_v2, %v6177_v17 }
 0x232   :  { %v1741_v37 = vpop.f32.mrf.mxu1  ;;  %v1882_v41 = vmax.f32 %v1642_v35, 0.0 }
 0x233   :  { %v6211_v45 = vadd.f32 %v1741_v37, %v1693_v1 }
 0x234   :  { %v6209_v36 = vpop.f32.mrf.mxu2 }
 0x237   :  { %v1643_v23 = vpop.f32.mrf.mxu3 }
 0x238   :  { %v1644_v5 = vadd.f32 %v1643_v23, %v6080_v61  ;;  %v1695_v44 = vpop.f32.mrf.mxu0  ;;  %v5325_v61 = vld [vmem:[#allocation7 + $0x1c4] sm:$0xf0] }
 0x239   :  { %v1696_v42 = vadd.f32 %v1695_v44, %v6177_v17  ;;  %v4923_v1 = vor.u32 %v5325_v61, %v4922_v47 }
 0x23a   :  { %v1886_v56 = vmax.f32 %v1644_v5, 0.0  ;;  %v1744_v52 = vpop.f32.mrf.mxu1 }
 0x23b   :  { %v6218_v43 = vadd.f32 %v1744_v52, %v1696_v42  ;;  %2376 = vmatmul.bf16.gmra.mxu0 %v6974_v0  ;;  %2508 = vmatpush.bf16.msrb.mxu3 %v4923_v1 }
 0x23c   :  { %v6216_v18 = vpop.f32.mrf.mxu2  ;;  %1841 = vmatmul.bf16.gmra.mxu3 %v5823_v58  ;;  %v6222_v2 = vpack.c.bf16 %v1886_v56, %v1882_v41 }
 0x23d   :  { %6973 = vst [vmem:[#allocation17_spill] sm:$0xff] %v6218_v43  ;;  %2425 = vmatmul.bf16.gmra.mxu1 %v6096_v38 }
 0x23e   :  { %6975 = vst [vmem:[#allocation12_spill] sm:$0xff] %v6222_v2  ;;  %2469 = vmatmul.bf16.gmra.mxu2 %v6222_v2 }
 0x23f   :  { %v1646_v20 = vpop.f32.mrf.mxu3 }
 0x240   :  { %v1697_v37 = vpop.f32.mrf.mxu0  ;;  %v1647_v44 = vadd.f32 %v1646_v20, %v6088_v4  ;;  %v4914_v4 = vld [vmem:[#allocation7 + $0x1b0] sm:$0xf] }
 0x241   :  { %v1698_v35 = vadd.f32 %v1697_v37, %v6177_v17  ;;  %v6978_v37 = vld [vmem:[#allocation21_spill] sm:$0xff] }
 0x242   :  { %v1746_v23 = vpop.f32.mrf.mxu1  ;;  %v1890_v52 = vmax.f32 %v1647_v44, 0.0 }
 0x243   :  { %v6229_v58 = vadd.f32 %v1746_v23, %v1698_v35 }
 0x244   :  { %v6227_v5 = vpop.f32.mrf.mxu2 }
 0x247   :  { %v1648_v41 = vpop.f32.mrf.mxu3 }
 0x248   :  { %v1649_v56 = vadd.f32 %v1648_v41, %v6094_v53  ;;  %v1700_v42 = vpop.f32.mrf.mxu0  ;;  %v5323_v53 = vld [vmem:[#allocation7 + $0x1b4] sm:$0xf0] }
 0x249   :  { %v1701_v2 = vadd.f32 %v1700_v42, %v6177_v17  ;;  %v4915_v23 = vor.u32 %v5323_v53, %v4914_v4 }
 0x24a   :  { %v1894_v43 = vmax.f32 %v1649_v56, 0.0  ;;  %v1749_v47 = vpop.f32.mrf.mxu1 }
 0x24b   :  { %v6236_v1 = vadd.f32 %v1749_v47, %v1701_v2  ;;  %2381 = vmatmul.bf16.gmra.mxu0 %v6978_v37  ;;  %2509 = vmatpush.bf16.msrb.mxu3 %v4915_v23  ;;  %v5282_v23 = vld [vmem:[#allocation7 + $0x74] sm:$0xf] }
 0x24c   :  { %v6234_v61 = vpop.f32.mrf.mxu2  ;;  %1846 = vmatmul.bf16.gmra.mxu3 %v5841_v21  ;;  %v6240_v35 = vpack.c.bf16 %v1894_v43, %v1890_v52  ;;  %v5298_v37 = vld [vmem:[#allocation7 + $0xf4] sm:$0xf] }
 0x24d   :  { %6976 = vst [vmem:[#allocation13_spill] sm:$0xff] %v6234_v61  ;;  %2430 = vmatmul.bf16.gmra.mxu1 %v6113_v55 }
 0x24e   :  { %6977 = vst [vmem:[#allocation14_spill] sm:$0xff] %v6236_v1  ;;  %2474 = vmatmul.bf16.gmra.mxu2 %v6240_v35 }
 0x24f   :  { %6979 = vst [vmem:[#allocation15_spill] sm:$0xff] %v6240_v35  ;;  %v1651_v20 = vpop.f32.mrf.mxu3 }
 0x250   :  { %v1702_v44 = vpop.f32.mrf.mxu0  ;;  %v1652_v43 = vadd.f32 %v1651_v20, %v6102_v12 }
 0x251   :  { %v1703_v41 = vadd.f32 %v1702_v44, %v6177_v17  ;;  %v4756_v44 = vld [vmem:[#allocation7 + $0x78] sm:$0xf0] }
 0x252   :  { %v1751_v2 = vpop.f32.mrf.mxu1  ;;  %v1898_v1 = vmax.f32 %v1652_v43, 0.0  ;;  %v4759_v20 = vor.u32 %v5282_v23, %v4756_v44  ;;  %v4906_v43 = vld [vmem:[#allocation7 + $0x1a0] sm:$0xf]  ;;  %v1608_v23 = vadd.f32 %v6118_v25, %v6106_v62  ;;  %v5276_v25 = vld [vmem:[#allocation7 + $0x44] sm:$0xf] }
 0x253   :  { %v6247_v21 = vadd.f32 %v1751_v2, %v1703_v41  ;;  %v6982_v41 = vld [vmem:[#allocation22_spill] sm:$0xff] }
 0x254   :  { %v6245_v56 = vpop.f32.mrf.mxu2  ;;  %2554 = vmatpush.bf16.msrb.mxu0 %v4759_v20  ;;  %v5278_v20 = vld [vmem:[#allocation7 + $0x54] sm:$0xf] }
 0x257   :  { %v1653_v42 = vpop.f32.mrf.mxu3 }
 0x258   :  { %v1654_v52 = vadd.f32 %v1653_v42, %v6110_v34  ;;  %v1705_v47 = vpop.f32.mrf.mxu0  ;;  %v4820_v34 = vld [vmem:[#allocation7 + $0xf8] sm:$0xf0]  ;;  %v5321_v42 = vld [vmem:[#allocation7 + $0x1a4] sm:$0xf0] }
 0x259   :  { %v1706_v55 = vadd.f32 %v1705_v47, %v6177_v17  ;;  %v4823_v2 = vor.u32 %v5298_v37, %v4820_v34  ;;  %v5280_v47 = vld [vmem:[#allocation7 + $0x64] sm:$0xf] }
 0x25a   :  { %v1902_v35 = vmax.f32 %v1654_v52, 0.0  ;;  %v1754_v4 = vpop.f32.mrf.mxu1 }
 0x25b   :  { %v6254_v61 = vadd.f32 %v1754_v4, %v1706_v55  ;;  %2386 = vmatmul.bf16.gmra.mxu0 %v6982_v41  ;;  %2603 = vmatpush.bf16.msrb.mxu1 %v4823_v2  ;;  %v4907_v55 = vor.u32 %v5321_v42, %v4906_v43  ;;  %v4748_v4 = vld [vmem:[#allocation7 + $0x68] sm:$0xf0]  ;;  %v4740_v2 = vld [vmem:[#allocation7 + $0x58] sm:$0xf0]  ;;  %v5294_v43 = vld [vmem:[#allocation7 + $0xd4] sm:$0xf] }
 0x25c   :  { %v6252_v53 = vpop.f32.mrf.mxu2  ;;  %1851 = vmatmul.bf16.gmra.mxu3 %v6964_v46  ;;  %v6258_v12 = vpack.c.bf16 %v1902_v35, %v1898_v1  ;;  %v5296_v46 = vld [vmem:[#allocation7 + $0xe4] sm:$0xf]  ;;  %v4812_v41 = vld [vmem:[#allocation7 + $0xe8] sm:$0xf0] }
 0x25d   :  { %6980 = vst [vmem:[#allocation18_spill] sm:$0xff] %v6252_v53  ;;  %2435 = vmatmul.bf16.gmra.mxu1 %v6131_v7  ;;  %2510 = vmatpush.bf16.msrb.mxu3 %v4907_v55  ;;  %v4815_v35 = vor.u32 %v5296_v46, %v4812_v41  ;;  %v1610_v41 = vadd.f32 %v6124_v9, %v6120_v6  ;;  %v4732_v46 = vld [vmem:[#allocation7 + $0x48] sm:$0xf0]  ;;  %v5274_v6 = vld [vmem:[#allocation7 + $0x34] sm:$0xf] }
 0x25e   :  { %6981 = vst [vmem:[#allocation19_spill] sm:$0xff] %v6254_v61  ;;  %2479 = vmatmul.bf16.gmra.mxu2 %v6258_v12  ;;  %v4751_v61 = vor.u32 %v5280_v47, %v4748_v4  ;;  %v4743_v47 = vor.u32 %v5278_v20, %v4740_v2  ;;  %v4804_v4 = vld [vmem:[#allocation7 + $0xd8] sm:$0xf0] }
 0x25f   :  { %6983 = vst [vmem:[#allocation20_spill] sm:$0xff] %v6258_v12  ;;  %v1656_v52 = vpop.f32.mrf.mxu3  ;;  %2604 = vmatpush.bf16.msrb.mxu1 %v4815_v35  ;;  %v4807_v12 = vor.u32 %v5294_v43, %v4804_v4  ;;  %v4735_v35 = vor.u32 %v5276_v25, %v4732_v46  ;;  %v4724_v9 = vld [vmem:[#allocation7 + $0x38] sm:$0xf0]  ;;  %v5314_v4 = vld [vmem:[#allocation7 + $0x174] sm:$0xf] }
 0x260   :  { %v1707_v1 = vpop.f32.mrf.mxu0  ;;  %2555 = vmatpush.bf16.msrb.mxu0 %v4751_v61  ;;  %v1657_v55 = vadd.f32 %v1656_v52, %v1608_v23  ;;  %v5272_v46 = vld [vmem:[#allocation7 + $0x24] sm:$0xf] }
 0x261   :  { %v1708_v37 = vadd.f32 %v1707_v1, %v6177_v17  ;;  %v5292_v1 = vld [vmem:[#allocation7 + $0xc4] sm:$0xf] }
 0x262   :  { %v1756_v44 = vpop.f32.mrf.mxu1 }
 0x263   :  { %v6267_v42 = vadd.f32 %v1756_v44, %v1708_v37  ;;  %2605 = vmatpush.bf16.msrb.mxu1 %v4807_v12  ;;  %v1906_v37 = vmax.f32 %v1657_v55, 0.0  ;;  %v5290_v12 = vld [vmem:[#allocation7 + $0xb4] sm:$0xf]  ;;  %v5319_v55 = vld [vmem:[#allocation7 + $0x194] sm:$0xf0] }
 0x264   :  { %v6265_v34 = vpop.f32.mrf.mxu2  ;;  %2556 = vmatpush.bf16.msrb.mxu0 %v4743_v47 }
 0x265   :  { %6984 = vst [vmem:[#allocation23_spill] sm:$0xff] %v6265_v34  ;;  %v4796_v34 = vld [vmem:[#allocation7 + $0xc8] sm:$0xf0] }
 0x266   :  { %v4799_v53 = vor.u32 %v5292_v1, %v4796_v34  ;;  %v4788_v34 = vld [vmem:[#allocation7 + $0xb8] sm:$0xf0]  ;;  %v4716_v1 = vld [vmem:[#allocation7 + $0x28] sm:$0xf0] }
 0x267   :  { %v1658_v62 = vpop.f32.mrf.mxu3  ;;  %v4791_v47 = vor.u32 %v5290_v12, %v4788_v34 }
 0x268   :  { %v1659_v61 = vadd.f32 %v1658_v62, %v1610_v41  ;;  %v1710_v7 = vpop.f32.mrf.mxu0  ;;  %2557 = vmatpush.bf16.msrb.mxu0 %v4735_v35  ;;  %2606 = vmatpush.bf16.msrb.mxu1 %v4799_v53  ;;  %v4884_v41 = vld [vmem:[#allocation7 + $0x178] sm:$0xf0]  ;;  %v4898_v53 = vld [vmem:[#allocation7 + $0x190] sm:$0xf]  ;;  %v4719_v35 = vor.u32 %v5272_v46, %v4716_v1  ;;  %v5310_v1 = vld [vmem:[#allocation7 + $0x154] sm:$0xf] }
 0x269   :  { %v1711_v20 = vadd.f32 %v1710_v7, %v6177_v17  ;;  %v4727_v7 = vor.u32 %v5274_v6, %v4724_v9  ;;  %v4887_v62 = vor.u32 %v5314_v4, %v4884_v41  ;;  %v4876_v6 = vld [vmem:[#allocation7 + $0x168] sm:$0xf0]  ;;  %v1613_v9 = vadd.f32 %v6136_v16, %v6126_v15  ;;  %v4708_v4 = vld [vmem:[#allocation7 + $0x18] sm:$0xf0]  ;;  %v5286_v41 = vld [vmem:[#allocation7 + $0x94] sm:$0xf] }
 0x26a   :  { %v1910_v44 = vmax.f32 %v1659_v61, 0.0  ;;  %v1759_v2 = vpop.f32.mrf.mxu1  ;;  %v5288_v61 = vld [vmem:[#allocation7 + $0xa4] sm:$0xf]  ;;  %v1615_v15 = vadd.f32 %v6142_v24, %v6138_v14 }
 0x26b   :  { %v6274_v52 = vadd.f32 %v1759_v2, %v1711_v20  ;;  %2391 = vmatmul.bf16.gmra.mxu0 %v6018_v3  ;;  %2652 = vmatpush.bf16.msrb.mxu2 %v4887_v62  ;;  %v5312_v2 = vld [vmem:[#allocation7 + $0x164] sm:$0xf]  ;;  %v4772_v62 = vld [vmem:[#allocation7 + $0x98] sm:$0xf0] }
 0x26c   :  { %v6272_v43 = vpop.f32.mrf.mxu2  ;;  %1856 = vmatmul.bf16.gmra.mxu3 %v5877_v50  ;;  %v6278_v23 = vpack.c.bf16 %v1910_v44, %v1906_v37  ;;  %2558 = vmatpush.bf16.msrb.mxu0 %v4727_v7  ;;  %v4899_v50 = vor.u32 %v5319_v55, %v4898_v53  ;;  %v4780_v37 = vld [vmem:[#allocation7 + $0xa8] sm:$0xf0]  ;;  %v4879_v7 = vor.u32 %v5312_v2, %v4876_v6  ;;  %v5284_v2 = vld [vmem:[#allocation7 + $0x84] sm:$0xf] }
 0x26d   :  { %2440 = vmatmul.bf16.gmra.mxu1 %v6148_v40  ;;  %v4783_v20 = vor.u32 %v5288_v61, %v4780_v37  ;;  %v4775_v46 = vor.u32 %v5286_v41, %v4772_v62  ;;  %v4868_v61 = vld [vmem:[#allocation7 + $0x158] sm:$0xf0]  ;;  %v4860_v41 = vld [vmem:[#allocation7 + $0x148] sm:$0xf0] }
 0x26e   :  { %2484 = vmatmul.bf16.gmra.mxu2 %v6278_v23  ;;  %2607 = vmatpush.bf16.msrb.mxu1 %v4791_v47  ;;  %v5270_v47 = vld [vmem:[#allocation7 + $0x14] sm:$0xf]  ;;  %v4871_v37 = vor.u32 %v5310_v1, %v4868_v61  ;;  %v4852_v1 = vld [vmem:[#allocation7 + $0x138] sm:$0xf0]  ;;  %v4890_v61 = vld [vmem:[#allocation7 + $0x180] sm:$0xf] }
 0x26f   :  { %v1661_v25 = vpop.f32.mrf.mxu3  ;;  %2511 = vmatpush.bf16.msrb.mxu3 %v4899_v50  ;;  %2653 = vmatpush.bf16.msrb.mxu2 %v4879_v7  ;;  %v4711_v55 = vor.u32 %v5270_v47, %v4708_v4  ;;  %v5308_v4 = vld [vmem:[#allocation7 + $0x144] sm:$0xf] }
 0x270   :  { %v1712_v44 = vpop.f32.mrf.mxu0  ;;  %2559 = vmatpush.bf16.msrb.mxu0 %v4719_v35  ;;  %v1662_v16 = vadd.f32 %v1661_v25, %v1613_v9  ;;  %v4863_v25 = vor.u32 %v5308_v4, %v4860_v41  ;;  %v4836_v4 = vld [vmem:[#allocation7 + $0x118] sm:$0xf0]  ;;  %v1620_v41 = vadd.f32 %v6160_v63, %v6156_v32  ;;  %v6986_v32 = vld [vmem:[#allocation16_spill] sm:$0xff] }
 0x271   :  { %v1713_v12 = vadd.f32 %v1712_v44, %v6177_v17  ;;  %v5268_v44 = vld [vmem:[#allocation7 + $0x4] sm:$0xf] }
 0x272   :  { %v1761_v34 = vpop.f32.mrf.mxu1  ;;  %2608 = vmatpush.bf16.msrb.mxu1 %v4783_v20  ;;  %v4700_v20 = vld [vmem:[#allocation7 + $0x8] sm:$0xf0]  ;;  %v1914_v62 = vmax.f32 %v1662_v16, 0.0 }
 0x273   :  { %v6285_v53 = vadd.f32 %v1761_v34, %v1713_v12  ;;  %2654 = vmatpush.bf16.msrb.mxu2 %v4871_v37  ;;  %v4703_v12 = vor.u32 %v5268_v44, %v4700_v20  ;;  %v4764_v34 = vld [vmem:[#allocation7 + $0x88] sm:$0xf0] }
 0x274   :  { %v6287_v50 = vpop.f32.mrf.mxu2  ;;  %2560 = vmatpush.bf16.msrb.mxu0 %v4711_v55  ;;  %v4767_v47 = vor.u32 %v5284_v2, %v4764_v34  ;;  %v1618_v2 = vadd.f32 %v6154_v60, %v6144_v27  ;;  %v5300_v27 = vld [vmem:[#allocation7 + $0x104] sm:$0xf]  ;;  %v4828_v60 = vld [vmem:[#allocation7 + $0x108] sm:$0xf0] }
 0x275   :  { %6985 = vst [vmem:[#allocation24_spill] sm:$0xff] %v6285_v53 }
 0x276   :  { %2609 = vmatpush.bf16.msrb.mxu1 %v4775_v46  ;;  %v5306_v46 = vld [vmem:[#allocation7 + $0x134] sm:$0xf] }
 0x277   :  { %v1663_v35 = vpop.f32.mrf.mxu3  ;;  %2655 = vmatpush.bf16.msrb.mxu2 %v4863_v25  ;;  %v4855_v16 = vor.u32 %v5306_v46, %v4852_v1 }
 0x278   :  { %v1664_v6 = vadd.f32 %v1663_v35, %v1615_v15  ;;  %v1715_v7 = vpop.f32.mrf.mxu0  ;;  %2561 = vmatpush.bf16.msrb.mxu0 %v4703_v12  ;;  %v5317_v15 = vld [vmem:[#allocation7 + $0x184] sm:$0xf0] }
 0x279   :  { %v1716_v14 = vadd.f32 %v1715_v7, %v6177_v17  ;;  %v4891_v44 = vor.u32 %v5317_v15, %v4890_v61 }
 0x27a   :  { %v1918_v53 = vmax.f32 %v1664_v6, 0.0  ;;  %v1764_v24 = vpop.f32.mrf.mxu1  ;;  %2610 = vmatpush.bf16.msrb.mxu1 %v4767_v47  ;;  %v5302_v47 = vld [vmem:[#allocation7 + $0x114] sm:$0xf] }
 0x27b   :  { %v6292_v9 = vadd.f32 %v1764_v24, %v1716_v14  ;;  %2396 = vmatmul.bf16.gmra.mxu0 %v6032_v19  ;;  %2512 = vmatpush.bf16.msrb.mxu3 %v4891_v44  ;;  %v4839_v14 = vor.u32 %v5302_v47, %v4836_v4 }
 0x27c   :  { %1861 = vmatmul.bf16.gmra.mxu3 %v5895_v10  ;;  %v6296_v55 = vpack.c.bf16 %v1918_v53, %v1914_v62  ;;  %v6300_v35 = vpop.f32.mrf.mxu2  ;;  %2656 = vmatpush.bf16.msrb.mxu2 %v4855_v16  ;;  %v5304_v10 = vld [vmem:[#allocation7 + $0x124] sm:$0xf]  ;;  %v4844_v53 = vld [vmem:[#allocation7 + $0x128] sm:$0xf0] }
 0x27d   :  { %2445 = vmatmul.bf16.gmra.mxu1 %v6166_v39  ;;  %v4847_v34 = vor.u32 %v5304_v10, %v4844_v53  ;;  %v4948_v53 = vld [vmem:[#allocation7 + $0x1f8] sm:$0xf0] }
 0x27e   :  { %2489 = vmatmul.bf16.gmra.mxu2 %v6296_v55 }
 0x27f   :  { %v1666_v37 = vpop.f32.mrf.mxu3 }
 0x280   :  { %v1717_v20 = vpop.f32.mrf.mxu0  ;;  %2657 = vmatpush.bf16.msrb.mxu2 %v4847_v34  ;;  %v1667_v62 = vadd.f32 %v1666_v37, %v1618_v2  ;;  %v5330_v37 = vld [vmem:[#allocation7 + $0x1f4] sm:$0xf]  ;;  %v1623_v34 = vadd.f32 %v6172_v33, %v6162_v8 }
 0x281   :  { %v1718_v6 = vadd.f32 %v1717_v20, %v6177_v17  ;;  %v4831_v20 = vor.u32 %v5300_v27, %v4828_v60 }
 0x282   :  { %v1766_v12 = vpop.f32.mrf.mxu1  ;;  %v1922_v61 = vmax.f32 %v1667_v62, 0.0 }
 0x283   :  { %v6305_v7 = vadd.f32 %v1766_v12, %v1718_v6  ;;  %v4951_v6 = vor.u32 %v5330_v37, %v4948_v53 }
 0x284   :  { %v6309_v1 = vpop.f32.mrf.mxu2  ;;  %2658 = vmatpush.bf16.msrb.mxu2 %v4839_v14  ;;  %v1625_v14 = vadd.f32 %v6181_v57, %v6174_v13  ;;  %v5328_v57 = vld [vmem:[#allocation7 + $0x1e4] sm:$0xf] }
 0x285   :  { %2701 = vmatpush.bf16.msra.mxu3 %v4951_v6 }
 0x287   :  { %v1668_v24 = vpop.f32.mrf.mxu3 }
 0x288   :  { %v1669_v25 = vadd.f32 %v1668_v24, %v1620_v41  ;;  %v1720_v46 = vpop.f32.mrf.mxu0  ;;  %2659 = vmatpush.bf16.msrb.mxu2 %v4831_v20  ;;  %v6328_v41 = vld [vmem:[%s6987_s22] sm:$0x3] }
 0x289   :  { %v1721_v16 = vadd.f32 %v1720_v46, %v6177_v17 }
 0x28a   :  { %v1926_v15 = vmax.f32 %v1669_v25, 0.0  ;;  %v1769_v44 = vpop.f32.mrf.mxu1  ;;  %v6335_v25 = vperm.slane %v6328_v41, 0 }
 0x28b   :  { %v6312_v10 = vadd.f32 %v1769_v44, %v1721_v16  ;;  %2401 = vmatmul.bf16.gmra.mxu0 %v6986_v32  ;;  %v4940_v44 = vld [vmem:[#allocation7 + $0x1e8] sm:$0xf0] }
 0x28c   :  { %1866 = vmatmul.bf16.gmra.mxu3 %v5913_v54  ;;  %v6316_v63 = vpack.c.bf16 %v1926_v15, %v1922_v61  ;;  %v6323_v4 = vpop.f32.mrf.mxu2  ;;  %v4943_v37 = vor.u32 %v5328_v57, %v4940_v44  ;;  %v1789_v44 = vadd.f32 %v6209_v36, %v6202_v28 }
 0x28d   :  { %2450 = vmatmul.bf16.gmra.mxu1 %v6187_v31 }
 0x28e   :  { %2494 = vmatmul.bf16.gmra.mxu2 %v6316_v63  ;;  %2702 = vmatpush.bf16.msra.mxu3 %v4943_v37 }
 0x28f   :  { %v1671_v2 = vpop.f32.mrf.mxu3 }
 0x290   :  { %v1722_v12 = vpop.f32.mrf.mxu0  ;;  %v1672_v24 = vadd.f32 %v1671_v2, %v1623_v34  ;;  %v1784_v2 = vadd.f32 %v6191_v22, %v6183_v59  ;;  %v5326_v22 = vld [vmem:[#allocation7 + $0x1d4] sm:$0xf] }
 0x291   :  { %v1723_v54 = vadd.f32 %v1722_v12, %v6177_v17 }
 0x292   :  { %v1771_v47 = vpop.f32.mrf.mxu1  ;;  %v1930_v46 = vmax.f32 %v1672_v24, 0.0 }
 0x293   :  { %v6330_v62 = vadd.f32 %v1771_v47, %v1723_v54 }
 0x294   :  { %v6342_v13 = vpop.f32.mrf.mxu2 }
 0x297   :  { %v1673_v8 = vpop.f32.mrf.mxu3 }
 0x298   :  { %v1674_v33 = vadd.f32 %v1673_v8, %v1625_v14  ;;  %v2367_v17 = vpop.f32.mrf.mxu0 }
 0x299   :  { %v2368_v60 = vadd.f32 %v2367_v17, %v6335_v25 }
 0x29a   :  { %v1934_v27 = vmax.f32 %v1674_v33, 0.0  ;;  %v2416_v61 = vpop.f32.mrf.mxu1 }
 0x29b   :  { %v2417_v15 = vadd.f32 %v2416_v61, %v2368_v60  ;;  %2562 = vmatmul.bf16.vlgmr.msrb.gmra.mxu0 %v6971_v51 }
 0x29c   :  { %v6339_v16 = vpack.c.bf16 %v1934_v27, %v1930_v46  ;;  %v6350_v47 = vpop.f32.mrf.mxu2 }
 0x29d   :  { %2611 = vmatmul.bf16.vlgmr.msrb.gmra.mxu1 %v6064_v30  ;;  %v1786_v30 = vadd.f32 %v6198_v48, %v6193_v29  ;;  %v4932_v29 = vld [vmem:[#allocation7 + $0x1d8] sm:$0xf0] }
 0x29e   :  { %2499 = vmatmul.bf16.gmra.mxu2 %v6339_v16  ;;  %v4935_v60 = vor.u32 %v5326_v22, %v4932_v29 }
 0x29f   :  { %v1832_v20 = vpop.f32.mrf.mxu3 }
 0x2a0   :  { %v2369_v53 = vpop.f32.mrf.mxu0  ;;  %v1833_v34 = vadd.f32 %v1832_v20, %v1784_v2  ;;  %2703 = vmatpush.bf16.msra.mxu3 %v4935_v60 }
 0x2a1   :  { %v2370_v6 = vadd.f32 %v2369_v53, %v6335_v25  ;;  %v1791_v53 = vadd.f32 %v6216_v18, %v6211_v45  ;;  %v6988_v45 = vld [vmem:[#allocation12_spill] sm:$0xff]  ;;  %v5324_v18 = vld [vmem:[#allocation7 + $0x1c4] sm:$0xf] }
 0x2a2   :  { %v2418_v51 = vpop.f32.mrf.mxu1  ;;  %v1875_v8 = vmax.f32 %v1833_v34, 0.0 }
 0x2a3   :  { %v2419_v12 = vadd.f32 %v2418_v51, %v2370_v6 }
 0x2a7   :  { %v1834_v54 = vpop.f32.mrf.mxu3 }
 0x2a8   :  { %v1835_v14 = vadd.f32 %v1834_v54, %v1786_v30  ;;  %v2372_v24 = vpop.f32.mrf.mxu0 }
 0x2a9   :  { %v2373_v17 = vadd.f32 %v2372_v24, %v6335_v25 }
 0x2aa   :  { %v1879_v33 = vmax.f32 %v1835_v14, 0.0  ;;  %v2421_v46 = vpop.f32.mrf.mxu1 }
 0x2ab   :  { %v2422_v59 = vadd.f32 %v2421_v46, %v2373_v17  ;;  %2567 = vmatmul.bf16.gmra.mxu0 %v6972_v26 }
 0x2ac   :  { %v6353_v27 = vpack.c.bf16 %v1879_v33, %v1875_v8  ;;  %v4924_v8 = vld [vmem:[#allocation7 + $0x1c8] sm:$0xf0] }
 0x2ad   :  { %2616 = vmatmul.bf16.gmra.mxu1 %v6082_v49  ;;  %v4927_v17 = vor.u32 %v5324_v18, %v4924_v8 }
 0x2ae   :  { %2513 = vmatmul.bf16.vlgmr.msrb.gmra.mxu3 %v6353_v27  ;;  %2660 = vmatmul.bf16.vlgmr.msrb.gmra.mxu2 %v6200_v11 }
 0x2af   :  { %v1837_v48 = vpop.f32.mrf.mxu3  ;;  %2704 = vmatpush.bf16.msra.mxu3 %v4927_v17 }
 0x2b0   :  { %v2374_v61 = vpop.f32.mrf.mxu0  ;;  %v1838_v11 = vadd.f32 %v1837_v48, %v1789_v44 }
 0x2b1   :  { %v2465_v57 = vpop.f32.mrf.mxu2  ;;  %v2375_v20 = vadd.f32 %v2374_v61, %v6335_v25  ;;  %v6990_v61 = vld [vmem:[#allocation13_spill] sm:$0xff] }
 0x2b2   :  { %v2423_v37 = vpop.f32.mrf.mxu1  ;;  %v6362_v26 = vadd.f32 %v2465_v57, %v2417_v15  ;;  %v1883_v34 = vmax.f32 %v1838_v11, 0.0  ;;  %v1796_v57 = vadd.f32 %v6990_v61, %v6229_v58  ;;  %v6993_v58 = vld [vmem:[#allocation15_spill] sm:$0xff] }
 0x2b3   :  { %v2424_v49 = vadd.f32 %v2423_v37, %v2375_v20 }
 0x2b7   :  { %v1839_v2 = vpop.f32.mrf.mxu3 }
 0x2b8   :  { %v1840_v6 = vadd.f32 %v1839_v2, %v1791_v53  ;;  %v2377_v51 = vpop.f32.mrf.mxu0 }
 0x2b9   :  { %v2467_v30 = vpop.f32.mrf.mxu2  ;;  %v2378_v14 = vadd.f32 %v2377_v51, %v6335_v25 }
 0x2ba   :  { %v1887_v54 = vmax.f32 %v1840_v6, 0.0  ;;  %v2426_v24 = vpop.f32.mrf.mxu1  ;;  %v6367_v28 = vadd.f32 %v2467_v30, %v2419_v12  ;;  %v6989_v12 = vld [vmem:[#allocation17_spill] sm:$0xff] }
 0x2bb   :  { %v2427_v36 = vadd.f32 %v2426_v24, %v2378_v14  ;;  %2572 = vmatmul.bf16.gmra.mxu0 %v6974_v0  ;;  %v1794_v29 = vadd.f32 %v6227_v5, %v6989_v12  ;;  %v6992_v14 = vld [vmem:[#allocation10_spill] sm:$0xff]  ;;  %v5322_v24 = vld [vmem:[#allocation7 + $0x1b4] sm:$0xf] }
 0x2bc   :  { %v6370_v15 = vpack.c.bf16 %v1887_v54, %v1883_v34  ;;  %v6991_v54 = vld [vmem:[#allocation21_spill] sm:$0xff] }
 0x2bd   :  { %2621 = vmatmul.bf16.gmra.mxu1 %v6096_v38 }
 0x2be   :  { %2518 = vmatmul.bf16.gmra.mxu3 %v6370_v15  ;;  %2665 = vmatmul.bf16.gmra.mxu2 %v6988_v45  ;;  %v4916_v45 = vld [vmem:[#allocation7 + $0x1b8] sm:$0xf0] }
 0x2bf   :  { %v1842_v33 = vpop.f32.mrf.mxu3  ;;  %v4919_v8 = vor.u32 %v5322_v24, %v4916_v45  ;;  %v6999_v24 = vld [vmem:[#allocation19_spill] sm:$0xff] }
 0x2c0   :  { %v2379_v46 = vpop.f32.mrf.mxu0  ;;  %v1843_v44 = vadd.f32 %v1842_v33, %v1794_v29  ;;  %v7000_v45 = vld [vmem:[#allocation23_spill] sm:$0xff] }
 0x2c1   :  { %v2470_v22 = vpop.f32.mrf.mxu2  ;;  %v2380_v0 = vadd.f32 %v2379_v46, %v6335_v25  ;;  %2705 = vmatpush.bf16.msra.mxu3 %v4919_v8  ;;  %v1806_v8 = vadd.f32 %v6272_v43, %v6267_v42  ;;  %v4900_v42 = vld [vmem:[#allocation7 + $0x198] sm:$0xf0] }
 0x2c2   :  { %v2428_v48 = vpop.f32.mrf.mxu1  ;;  %v6378_v60 = vadd.f32 %v2470_v22, %v2422_v59  ;;  %v1891_v2 = vmax.f32 %v1843_v44, 0.0 }
 0x2c3   :  { %v2429_v38 = vadd.f32 %v2428_v48, %v2380_v0  ;;  %v6995_v48 = vld [vmem:[#allocation18_spill] sm:$0xff] }
 0x2c4   :  { %v1801_v61 = vadd.f32 %v6995_v48, %v6247_v21  ;;  %v4908_v21 = vld [vmem:[#allocation7 + $0x1a8] sm:$0xf0] }
 0x2c7   :  { %v1844_v20 = vpop.f32.mrf.mxu3 }
 0x2c8   :  { %v1845_v37 = vadd.f32 %v1844_v20, %v1796_v57  ;;  %v2382_v53 = vpop.f32.mrf.mxu0 }
 0x2c9   :  { %v2472_v11 = vpop.f32.mrf.mxu2  ;;  %v2383_v51 = vadd.f32 %v2382_v53, %v6335_v25 }
 0x2ca   :  { %v1895_v6 = vmax.f32 %v1845_v37, 0.0  ;;  %v2431_v30 = vpop.f32.mrf.mxu1  ;;  %v6383_v5 = vadd.f32 %v2472_v11, %v2424_v49  ;;  %v6994_v49 = vld [vmem:[#allocation14_spill] sm:$0xff] }
 0x2cb   :  { %v2432_v34 = vadd.f32 %v2431_v30, %v2383_v51  ;;  %2577 = vmatmul.bf16.gmra.mxu0 %v6991_v54  ;;  %v1799_v46 = vadd.f32 %v6245_v56, %v6994_v49  ;;  %v6997_v51 = vld [vmem:[#allocation11_spill] sm:$0xff]  ;;  %v5320_v30 = vld [vmem:[#allocation7 + $0x1a4] sm:$0xf] }
 0x2cc   :  { %v6386_v59 = vpack.c.bf16 %v1895_v6, %v1891_v2  ;;  %v6996_v6 = vld [vmem:[#allocation22_spill] sm:$0xff] }
 0x2cd   :  { %2626 = vmatmul.bf16.gmra.mxu1 %v6992_v14  ;;  %v4911_v14 = vor.u32 %v5320_v30, %v4908_v21 }
 0x2ce   :  { %2523 = vmatmul.bf16.gmra.mxu3 %v6386_v59  ;;  %2670 = vmatmul.bf16.gmra.mxu2 %v6993_v58 }
 0x2cf   :  { %v1847_v18 = vpop.f32.mrf.mxu3  ;;  %2706 = vmatpush.bf16.msra.mxu3 %v4911_v14 }
 0x2d0   :  { %v2384_v33 = vpop.f32.mrf.mxu0  ;;  %v1848_v57 = vadd.f32 %v1847_v18, %v1799_v46 }
 0x2d1   :  { %v2475_v17 = vpop.f32.mrf.mxu2  ;;  %v2385_v22 = vadd.f32 %v2384_v33, %v6335_v25 }
 0x2d2   :  { %v6394_v12 = vadd.f32 %v2475_v17, %v2427_v36  ;;  %v2433_v29 = vpop.f32.mrf.mxu1  ;;  %v1899_v53 = vmax.f32 %v1848_v57, 0.0  ;;  %v6998_v36 = vld [vmem:[#allocation20_spill] sm:$0xff] }
 0x2d3   :  { %v2434_v0 = vadd.f32 %v2433_v29, %v2385_v22 }
 0x2d7   :  { %v1849_v44 = vpop.f32.mrf.mxu3 }
 0x2d8   :  { %v1850_v20 = vadd.f32 %v1849_v44, %v1801_v61  ;;  %v1809_v44 = vadd.f32 %v6287_v50, %v6274_v52  ;;  %v4892_v52 = vld [vmem:[#allocation7 + $0x188] sm:$0xf0] }
 0x2d9   :  { %v2477_v37 = vpop.f32.mrf.mxu2 }
 0x2da   :  { %v1903_v11 = vmax.f32 %v1850_v20, 0.0  ;;  %v6398_v2 = vadd.f32 %v2477_v37, %v2429_v38  ;;  %v1804_v38 = vadd.f32 %v7000_v45, %v6999_v24  ;;  %v5334_v24 = vld [vmem:[%s7002_s16 + $0x10] sm:$0xff] }
 0x2db   :  { %2582 = vmatmul.bf16.gmra.mxu0 %v6996_v6 }
 0x2dc   :  { %v6401_v56 = vpack.c.bf16 %v1903_v11, %v1899_v53 }
 0x2dd   :  { %2631 = vmatmul.bf16.gmra.mxu1 %v6997_v51 }
 0x2de   :  { %2528 = vmatmul.bf16.gmra.mxu3 %v6401_v56  ;;  %2675 = vmatmul.bf16.gmra.mxu2 %v6998_v36 }
 0x2df   :  { %v1852_v54 = vpop.f32.mrf.mxu3 }
 0x2e0   :  { %v1853_v33 = vadd.f32 %v1852_v54, %v1804_v38  ;;  %v5337_v54 = vld [vmem:[%s7002_s16 + $0x28] sm:$0xff] }
 0x2e1   :  { %v2480_v58 = vpop.f32.mrf.mxu2 }
 0x2e2   :  { %v6408_v18 = vadd.f32 %v2480_v58, %v2432_v34  ;;  %v1907_v22 = vmax.f32 %v1853_v33, 0.0  ;;  %v5318_v34 = vld [vmem:[#allocation7 + $0x194] sm:$0xf]  ;;  %v6465_v33 = vpop.f32.mrf.mxu0 }
 0x2e3   :  { %v4903_v57 = vor.u32 %v5318_v34, %v4900_v42 }
 0x2e5   :  { %2707 = vmatpush.bf16.msra.mxu3 %v4903_v57 }
 0x2e7   :  { %v1854_v17 = vpop.f32.mrf.mxu3 }
 0x2e8   :  { %v1855_v49 = vadd.f32 %v1854_v17, %v1806_v8  ;;  %v5333_v8 = vld [vmem:[%s7002_s16 + $0x8] sm:$0xff] }
 0x2e9   :  { %v2482_v46 = vpop.f32.mrf.mxu2 }
 0x2ea   :  { %v1911_v29 = vmax.f32 %v1855_v49, 0.0  ;;  %v6412_v48 = vadd.f32 %v2482_v46, %v2434_v0  ;;  %v7001_v0 = vld [vmem:[#allocation24_spill] sm:$0xff]  ;;  %v5332_v49 = vld [vmem:[%s7002_s16] sm:$0xff] }
 0x2eb   :  { %2587 = vmatmul.bf16.gmra.mxu0 %v6018_v3  ;;  %v1811_v20 = vadd.f32 %v6300_v35, %v7001_v0  ;;  %v5339_v35 = vld [vmem:[%s7002_s16 + $0x38] sm:$0xff]  ;;  %v2436_v0 = vpop.f32.mrf.mxu1 }
 0x2ec   :  { %v6415_v61 = vpack.c.bf16 %v1911_v29, %v1907_v22  ;;  %2930 = vmatpush.bf16.msra.mxu0 %v5339_v35  ;;  %v5346_v22 = vld [vmem:[%s7002_s16 + $0x70] sm:$0xff]  ;;  %v5344_v35 = vld [vmem:[%s7002_s16 + $0x60] sm:$0xff] }
 0x2ed   :  { %2636 = vmatmul.bf16.gmra.mxu1 %v6148_v40 }
 0x2ee   :  { %2533 = vmatmul.bf16.gmra.mxu3 %v6415_v61  ;;  %2680 = vmatmul.bf16.gmra.mxu2 %v6278_v23  ;;  %v5316_v23 = vld [vmem:[#allocation7 + $0x184] sm:$0xf] }
 0x2ef   :  { %v1857_v43 = vpop.f32.mrf.mxu3  ;;  %v4895_v51 = vor.u32 %v5316_v23, %v4892_v52 }
 0x2f0   :  { %v1858_v3 = vadd.f32 %v1857_v43, %v1809_v44 }
 0x2f1   :  { %2708 = vmatpush.bf16.msra.mxu3 %v4895_v51 }
 0x2f2   :  { %v1915_v11 = vmax.f32 %v1858_v3, 0.0  ;;  %v5345_v3 = vld [vmem:[%s7002_s16 + $0x68] sm:$0xff] }
 0x2f7   :  { %v1859_v37 = vpop.f32.mrf.mxu3 }
 0x2f8   :  { %v1860_v53 = vadd.f32 %v1859_v37, %v1811_v20 }
 0x2fa   :  { %v1919_v40 = vmax.f32 %v1860_v53, 0.0 }
 0x2fb   :  { %2592 = vmatmul.bf16.gmra.mxu0 %v6032_v19  ;;  %v1814_v19 = vadd.f32 %v6309_v1, %v6292_v9  ;;  %v5336_v1 = vld [vmem:[%s7002_s16 + $0x20] sm:$0xff] }
 0x2fc   :  { %v6425_v6 = vpack.c.bf16 %v1919_v40, %v1915_v11 }
 0x2fd   :  { %2641 = vmatmul.bf16.gmra.mxu1 %v6166_v39  ;;  %v5338_v39 = vld [vmem:[%s7002_s16 + $0x30] sm:$0xff] }
 0x2fe   :  { %2538 = vmatmul.bf16.gmra.mxu3 %v6425_v6  ;;  %2685 = vmatmul.bf16.gmra.mxu2 %v6296_v55  ;;  %v1816_v55 = vadd.f32 %v6323_v4, %v6305_v7  ;;  %v5335_v4 = vld [vmem:[%s7002_s16 + $0x18] sm:$0xff] }
 0x2ff   :  { %v1862_v50 = vpop.f32.mrf.mxu3  ;;  %2931 = vmatpush.bf16.msra.mxu0 %v5338_v39 }
 0x300   :  { %v1863_v36 = vadd.f32 %v1862_v50, %v1814_v19 }
 0x302   :  { %v1923_v14 = vmax.f32 %v1863_v36, 0.0 }
 0x303   :  { %2932 = vmatpush.bf16.msra.mxu0 %v5337_v54 }
 0x307   :  { %v1864_v30 = vpop.f32.mrf.mxu3  ;;  %2933 = vmatpush.bf16.msra.mxu0 %v5336_v1 }
 0x308   :  { %v1865_v21 = vadd.f32 %v1864_v30, %v1816_v55 }
 0x30a   :  { %v1927_v58 = vmax.f32 %v1865_v21, 0.0 }
 0x30b   :  { %2597 = vmatmul.bf16.gmra.mxu0 %v6986_v32  ;;  %v1819_v32 = vadd.f32 %v6342_v13, %v6312_v10 }
 0x30c   :  { %v6444_v9 = vpack.c.bf16 %v1927_v58, %v1923_v14  ;;  %2934 = vmatpush.bf16.msra.mxu0 %v5335_v4 }
 0x30d   :  { %2646 = vmatmul.bf16.gmra.mxu1 %v6187_v31  ;;  %v1821_v31 = vadd.f32 %v6350_v47, %v6330_v62  ;;  %v5347_v62 = vld [vmem:[%s7002_s16 + $0x78] sm:$0xff]  ;;  %v6477_v47 = vpop.f32.mrf.mxu0 }
 0x30e   :  { %2543 = vmatmul.bf16.gmra.mxu3 %v6444_v9  ;;  %2690 = vmatmul.bf16.gmra.mxu2 %v6316_v63 }
 0x30f   :  { %v1867_v7 = vpop.f32.mrf.mxu3  ;;  %2979 = vmatpush.bf16.msra.mxu1 %v5347_v62  ;;  %v2390_v62 = vadd.f32 %v6477_v47, %v6335_v25 }
 0x310   :  { %v1868_v45 = vadd.f32 %v1867_v7, %v1819_v32  ;;  %2935 = vmatpush.bf16.msra.mxu0 %v5334_v24  ;;  %v5343_v7 = vld [vmem:[%s7002_s16 + $0x58] sm:$0xff] }
 0x312   :  { %v1931_v17 = vmax.f32 %v1868_v45, 0.0 }
 0x313   :  { %2980 = vmatpush.bf16.msra.mxu1 %v5346_v22 }
 0x314   :  { %2936 = vmatpush.bf16.msra.mxu0 %v5333_v8  ;;  %v2388_v8 = vadd.f32 %v6465_v33, %v6335_v25 }
 0x315   :  { %v6479_v46 = vpop.f32.mrf.mxu0 }
 0x316   :  { %v2393_v47 = vadd.f32 %v6479_v46, %v6335_v25 }
 0x317   :  { %v1869_v38 = vpop.f32.mrf.mxu3  ;;  %2981 = vmatpush.bf16.msra.mxu1 %v5345_v3 }
 0x318   :  { %v1870_v63 = vadd.f32 %v1869_v38, %v1821_v31  ;;  %2937 = vmatpush.bf16.msra.mxu0 %v5332_v49 }
 0x31a   :  { %v1935_v10 = vmax.f32 %v1870_v63, 0.0 }
 0x31b   :  { %2982 = vmatpush.bf16.msra.mxu1 %v5344_v35 }
 0x31c   :  { %v6467_v13 = vpack.c.bf16 %v1935_v10, %v1931_v17  ;;  %v5342_v10 = vld [vmem:[%s7002_s16 + $0x50] sm:$0xff] }
 0x31d   :  { %v6485_v34 = vpop.f32.mrf.mxu0 }
 0x31e   :  { %2548 = vmatmul.bf16.gmra.mxu3 %v6467_v13  ;;  %2695 = vmatmul.bf16.gmra.mxu2 %v6339_v16 }
 0x31f   :  { %2983 = vmatpush.bf16.msra.mxu1 %v5343_v7 }
 0x323   :  { %2984 = vmatpush.bf16.msra.mxu1 %v5342_v10 }
 0x325   :  { %v6493_v53 = vpop.f32.mrf.mxu0 }
 0x32d   :  { %v6497_v52 = vpop.f32.mrf.mxu0 }
 0x32e   :  { %2709 = vmatmul.bf16.vlgmr.msra.gmra.mxu3 %v6353_v27  ;;  %v2485_v27 = vpop.f32.mrf.mxu2 }
 0x331   :  { %v2514_v29 = vpop.f32.mrf.mxu3 }
 0x332   :  { %v2515_v16 = vadd.f32 %v2514_v29, %v6362_v26  ;;  %v2438_v26 = vpop.f32.mrf.mxu1 }
 0x334   :  { %v2750_v57 = vmax.f32 %v2515_v16, 0.0 }
 0x335   :  { %v6503_v55 = vpop.f32.mrf.mxu0 }
 0x336   :  { %v2403_v10 = vadd.f32 %v6503_v55, %v6335_v25 }
 0x339   :  { %v2516_v42 = vpop.f32.mrf.mxu3 }
 0x33a   :  { %v2517_v43 = vadd.f32 %v2516_v42, %v6367_v28  ;;  %v2487_v28 = vpop.f32.mrf.mxu2  ;;  %v2441_v39 = vpop.f32.mrf.mxu1 }
 0x33c   :  { %v2752_v44 = vmax.f32 %v2517_v43, 0.0 }
 0x33d   :  { %v6508_v1 = vpop.f32.mrf.mxu0 }
 0x33e   :  { %v2782_v20 = vpack.c.bf16 %v2752_v44, %v2750_v57  ;;  %2714 = vmatmul.bf16.gmra.mxu3 %v6370_v15 }
 0x340   :  { %2938 = vmatmul.bf16.vlgmr.msra.gmra.mxu0 %v2782_v20 }
 0x341   :  { %v2519_v37 = vpop.f32.mrf.mxu3 }
 0x342   :  { %v2520_v11 = vadd.f32 %v2519_v37, %v6378_v60  ;;  %v2490_v60 = vpop.f32.mrf.mxu2  ;;  %v2443_v21 = vpop.f32.mrf.mxu1 }
 0x344   :  { %v2754_v15 = vmax.f32 %v2520_v11, 0.0 }
 0x345   :  { %v6516_v31 = vpop.f32.mrf.mxu0 }
 0x349   :  { %v2521_v40 = vpop.f32.mrf.mxu3 }
 0x34a   :  { %v2522_v23 = vadd.f32 %v2521_v40, %v6383_v5  ;;  %v2492_v14 = vpop.f32.mrf.mxu2 }
 0x34c   :  { %v2756_v50 = vmax.f32 %v2522_v23, 0.0 }
 0x34d   :  { %v6527_v22 = vpop.f32.mrf.mxu0 }
 0x34e   :  { %2719 = vmatmul.bf16.gmra.mxu3 %v6386_v59  ;;  %v2784_v51 = vpack.c.bf16 %v2756_v50, %v2754_v15 }
 0x350   :  { %2943 = vmatmul.bf16.gmra.mxu0 %v2784_v51 }
 0x351   :  { %v2524_v19 = vpop.f32.mrf.mxu3 }
 0x352   :  { %v2525_v5 = vadd.f32 %v2524_v19, %v6394_v12  ;;  %v2446_v12 = vpop.f32.mrf.mxu1  ;;  %v6513_v32 = vpop.f32.mrf.mxu2 }
 0x354   :  { %v2758_v54 = vmax.f32 %v2525_v5, 0.0 }
 0x355   :  { %v6529_v37 = vpop.f32.mrf.mxu0 }
 0x359   :  { %v2526_v36 = vpop.f32.mrf.mxu3 }
 0x35a   :  { %v2527_v30 = vadd.f32 %v2526_v36, %v6398_v2  ;;  %v2448_v17 = vpop.f32.mrf.mxu1 }
 0x35c   :  { %v2760_v59 = vmax.f32 %v2527_v30, 0.0 }
 0x35d   :  { %v6539_v51 = vpop.f32.mrf.mxu0 }
 0x35e   :  { %2724 = vmatmul.bf16.gmra.mxu3 %v6401_v56  ;;  %v2786_v58 = vpack.c.bf16 %v2760_v59, %v2758_v54 }
 0x360   :  { %2948 = vmatmul.bf16.gmra.mxu0 %v2786_v58 }
 0x361   :  { %v2529_v4 = vpop.f32.mrf.mxu3 }
 0x362   :  { %v2530_v2 = vadd.f32 %v2529_v4, %v6408_v18  ;;  %v2497_v18 = vpop.f32.mrf.mxu2  ;;  %v2451_v43 = vpop.f32.mrf.mxu1 }
 0x364   :  { %v2762_v45 = vmax.f32 %v2530_v2, 0.0 }
 0x369   :  { %v2531_v24 = vpop.f32.mrf.mxu3 }
 0x36a   :  { %v2532_v56 = vadd.f32 %v2531_v24, %v6412_v48  ;;  %v2437_v48 = vadd.f32 %v2436_v0, %v2388_v8  ;;  %v2500_v44 = vpop.f32.mrf.mxu2  ;;  %v5341_v0 = vld [vmem:[%s7002_s16 + $0x48] sm:$0xff]  ;;  %v2453_v40 = vpop.f32.mrf.mxu1 }
 0x36b   :  { %2985 = vmatpush.bf16.msra.mxu1 %v5341_v0 }
 0x36c   :  { %v2764_v38 = vmax.f32 %v2532_v56, 0.0  ;;  %v2486_v29 = vadd.f32 %v2485_v27, %v2437_v48 }
 0x36e   :  { %2729 = vmatmul.bf16.gmra.mxu3 %v6415_v61  ;;  %v2788_v63 = vpack.c.bf16 %v2764_v38, %v2762_v45  ;;  %v2439_v61 = vadd.f32 %v2438_v26, %v2390_v62  ;;  %v2395_v26 = vadd.f32 %v6485_v34, %v6335_v25  ;;  %v2398_v34 = vadd.f32 %v6493_v53, %v6335_v25 }
 0x370   :  { %2953 = vmatmul.bf16.gmra.mxu0 %v2788_v63  ;;  %v2488_v16 = vadd.f32 %v2487_v28, %v2439_v61  ;;  %v2442_v28 = vadd.f32 %v2441_v39, %v2393_v47  ;;  %v2444_v15 = vadd.f32 %v2443_v21, %v2395_v26  ;;  %v5340_v39 = vld [vmem:[%s7002_s16 + $0x40] sm:$0xff]  ;;  %v2400_v21 = vadd.f32 %v6497_v52, %v6335_v25  ;;  %s7003_s16 = sld [smem:[#allocation31_spill]] }
 0x371   :  { %v2534_v49 = vpop.f32.mrf.mxu3  ;;  %2986 = vmatpush.bf16.msra.mxu1 %v5340_v39  ;;  %v2447_v58 = vadd.f32 %v2446_v12, %v2398_v34 }
 0x372   :  { %v2535_v42 = vadd.f32 %v2534_v49, %v2486_v29  ;;  %v2502_v23 = vpop.f32.mrf.mxu2  ;;  %v2491_v50 = vadd.f32 %v2490_v60, %v2442_v28  ;;  %v2612_v30 = vpop.f32.mrf.mxu1  ;;  %v2449_v7 = vadd.f32 %v2448_v17, %v2400_v21  ;;  %v2452_v49 = vadd.f32 %v2451_v43, %v2403_v10 }
 0x374   :  { %v2766_v20 = vmax.f32 %v2535_v42, 0.0  ;;  %v2498_v4 = vadd.f32 %v2497_v18, %v2449_v7  ;;  %v2501_v48 = vadd.f32 %v2500_v44, %v2452_v49 }
 0x379   :  { %v2536_v33 = vpop.f32.mrf.mxu3 }
 0x37a   :  { %v2537_v57 = vadd.f32 %v2536_v33, %v2488_v16  ;;  %v2661_v59 = vpop.f32.mrf.mxu2  ;;  %v2614_v2 = vpop.f32.mrf.mxu1  ;;  %v6562_v33 = vperm.slane %v6328_v41, 1  ;;  %v5355_v41 = vld [vmem:[%s6894_s7 + $0x38] sm:$0xff] }
 0x37b   :  { %3211 = vmatpush.bf16.msra.mxu2 %v5355_v41 }
 0x37c   :  { %v2768_v3 = vmax.f32 %v2537_v57, 0.0  ;;  %v2566_v44 = vadd.f32 %v6527_v22, %v6562_v33  ;;  %v2569_v22 = vadd.f32 %v6529_v37, %v6562_v33 }
 0x37e   :  { %2734 = vmatmul.bf16.gmra.mxu3 %v6425_v6  ;;  %v2790_v11 = vpack.c.bf16 %v2768_v3, %v2766_v20  ;;  %v2493_v6 = vadd.f32 %v2492_v14, %v2444_v15  ;;  %v6549_v14 = vpop.f32.mrf.mxu0  ;;  %v2615_v0 = vadd.f32 %v2614_v2, %v2566_v44 }
 0x380   :  { %2958 = vmatmul.bf16.gmra.mxu0 %v2790_v11 }
 0x381   :  { %v2539_v27 = vpop.f32.mrf.mxu3 }
 0x382   :  { %v2540_v35 = vadd.f32 %v2539_v27, %v2491_v50  ;;  %v2663_v53 = vpop.f32.mrf.mxu2  ;;  %v2617_v17 = vpop.f32.mrf.mxu1 }
 0x384   :  { %v2770_v5 = vmax.f32 %v2540_v35, 0.0 }
 0x386   :  { %v6552_v38 = vpop.f32.mrf.mxu0 }
 0x389   :  { %v2541_v46 = vpop.f32.mrf.mxu3 }
 0x38a   :  { %v2542_v19 = vadd.f32 %v2541_v46, %v2493_v6  ;;  %v2666_v18 = vpop.f32.mrf.mxu2  ;;  %v2619_v55 = vpop.f32.mrf.mxu1 }
 0x38c   :  { %v2772_v36 = vmax.f32 %v2542_v19, 0.0 }
 0x38e   :  { %2739 = vmatmul.bf16.gmra.mxu3 %v6444_v9  ;;  %v2792_v54 = vpack.c.bf16 %v2772_v36, %v2770_v5  ;;  %v2496_v9 = vadd.f32 %v6513_v32, %v2447_v58  ;;  %v2405_v32 = vadd.f32 %v6508_v1, %v6335_v25  ;;  %v6559_v61 = vpop.f32.mrf.mxu0  ;;  %v2564_v25 = vadd.f32 %v6516_v31, %v6562_v33 }
 0x38f   :  { %v2571_v36 = vadd.f32 %v6539_v51, %v6562_v33  ;;  %v2574_v51 = vadd.f32 %v6549_v14, %v6562_v33 }
 0x390   :  { %2963 = vmatmul.bf16.gmra.mxu0 %v2792_v54  ;;  %v2454_v62 = vadd.f32 %v2453_v40, %v2405_v32  ;;  %v2613_v47 = vadd.f32 %v2612_v30, %v2564_v25  ;;  %v2664_v40 = vadd.f32 %v2663_v53, %v2615_v0  ;;  %v2618_v30 = vadd.f32 %v2617_v17, %v2569_v22  ;;  %v5354_v54 = vld [vmem:[%s6894_s7 + $0x30] sm:$0xff] }
 0x391   :  { %v2544_v60 = vpop.f32.mrf.mxu3  ;;  %3212 = vmatpush.bf16.msra.mxu2 %v5354_v54 }
 0x392   :  { %v2545_v24 = vadd.f32 %v2544_v60, %v2496_v9  ;;  %v2503_v29 = vadd.f32 %v2502_v23, %v2454_v62  ;;  %v2668_v3 = vpop.f32.mrf.mxu2  ;;  %v2662_v27 = vadd.f32 %v2661_v59, %v2613_v47  ;;  %v2622_v26 = vpop.f32.mrf.mxu1  ;;  %v2620_v59 = vadd.f32 %v2619_v55, %v2571_v36 }
 0x393   :  { %v2667_v34 = vadd.f32 %v2666_v18, %v2618_v30 }
 0x394   :  { %v2774_v63 = vmax.f32 %v2545_v24, 0.0  ;;  %v2669_v39 = vadd.f32 %v2668_v3, %v2620_v59  ;;  %v5352_v3 = vld [vmem:[%s6894_s7 + $0x20] sm:$0xff] }
 0x396   :  { %v6566_v1 = vpop.f32.mrf.mxu0 }
 0x399   :  { %v2546_v56 = vpop.f32.mrf.mxu3 }
 0x39a   :  { %v2547_v45 = vadd.f32 %v2546_v56, %v2498_v4  ;;  %v2671_v28 = vpop.f32.mrf.mxu2  ;;  %v2624_v46 = vpop.f32.mrf.mxu1  ;;  %v2576_v56 = vadd.f32 %v6552_v38, %v6562_v33 }
 0x39c   :  { %v2776_v8 = vmax.f32 %v2547_v45, 0.0  ;;  %v2623_v45 = vadd.f32 %v2622_v26, %v2574_v51  ;;  %v2625_v10 = vadd.f32 %v2624_v46, %v2576_v56 }
 0x39e   :  { %2744 = vmatmul.bf16.gmra.mxu3 %v6467_v13  ;;  %v2794_v52 = vpack.c.bf16 %v2776_v8, %v2774_v63  ;;  %v2583_v2 = vpop.f32.mrf.mxu0  ;;  %v5353_v8 = vld [vmem:[%s6894_s7 + $0x28] sm:$0xff] }
 0x39f   :  { %3213 = vmatpush.bf16.msra.mxu2 %v5353_v8 }
 0x3a0   :  { %2968 = vmatmul.bf16.gmra.mxu0 %v2794_v52 }
 0x3a1   :  { %v2549_v12 = vpop.f32.mrf.mxu3 }
 0x3a2   :  { %v2550_v16 = vadd.f32 %v2549_v12, %v2501_v48  ;;  %v2673_v19 = vpop.f32.mrf.mxu2  ;;  %v2627_v58 = vpop.f32.mrf.mxu1  ;;  %v2672_v12 = vadd.f32 %v2671_v28, %v2623_v45 }
 0x3a3   :  { %v2674_v17 = vadd.f32 %v2673_v19, %v2625_v10  ;;  %3214 = vmatpush.bf16.msra.mxu2 %v5352_v3  ;;  %v3028_v3 = vld [vmem:[%s6907_s20] sm:$0x1] }
 0x3a4   :  { %v2778_v57 = vmax.f32 %v2550_v16, 0.0 }
 0x3a6   :  { %v2585_v32 = vpop.f32.mrf.mxu0 }
 0x3a9   :  { %v2551_v42 = vpop.f32.mrf.mxu3 }
 0x3aa   :  { %v2552_v13 = vadd.f32 %v2551_v42, %v2503_v29  ;;  %v2676_v7 = vpop.f32.mrf.mxu2  ;;  %v2629_v63 = vpop.f32.mrf.mxu1  ;;  %v2579_v42 = vadd.f32 %v6559_v61, %v6562_v33 }
 0x3ac   :  { %v2780_v20 = vmax.f32 %v2552_v13, 0.0 }
 0x3ae   :  { %v2796_v11 = vpack.c.bf16 %v2780_v20, %v2778_v57  ;;  %v2588_v13 = vpop.f32.mrf.mxu0  ;;  %v2581_v57 = vadd.f32 %v6566_v1, %v6562_v33  ;;  %v2628_v20 = vadd.f32 %v2627_v58, %v2579_v42  ;;  %v2584_v1 = vadd.f32 %v2583_v2, %v6562_v33  ;;  %v5350_v2 = vld [vmem:[%s6894_s7 + $0x10] sm:$0xff] }
 0x3b0   :  { %2973 = vmatmul.bf16.gmra.mxu0 %v2796_v11  ;;  %v2630_v11 = vadd.f32 %v2629_v63, %v2581_v57  ;;  %v2677_v25 = vadd.f32 %v2676_v7, %v2628_v20 }
 0x3b1   :  { %v2710_v43 = vpop.f32.mrf.mxu3 }
 0x3b2   :  { %v2711_v23 = vadd.f32 %v2710_v43, %v2662_v27  ;;  %v2678_v52 = vpop.f32.mrf.mxu2  ;;  %v2632_v29 = vpop.f32.mrf.mxu1 }
 0x3b3   :  { %v2679_v44 = vadd.f32 %v2678_v52, %v2630_v11 }
 0x3b4   :  { %v2751_v50 = vmax.f32 %v2711_v23, 0.0 }
 0x3b6   :  { %v2590_v27 = vpop.f32.mrf.mxu0 }
 0x3b9   :  { %v2712_v31 = vpop.f32.mrf.mxu3 }
 0x3ba   :  { %v2713_v15 = vadd.f32 %v2712_v31, %v2664_v40  ;;  %v2681_v38 = vpop.f32.mrf.mxu2  ;;  %v2634_v43 = vpop.f32.mrf.mxu1  ;;  %v2586_v31 = vadd.f32 %v2585_v32, %v6562_v33 }
 0x3bc   :  { %v2753_v6 = vmax.f32 %v2713_v15, 0.0  ;;  %v2635_v46 = vadd.f32 %v2634_v43, %v2586_v31 }
 0x3be   :  { %v2783_v35 = vpack.c.bf16 %v2753_v6, %v2751_v50  ;;  %v2633_v6 = vadd.f32 %v2632_v29, %v2584_v1  ;;  %v2593_v22 = vpop.f32.mrf.mxu0 }
 0x3c0   :  { %2987 = vmatmul.bf16.vlgmr.msra.gmra.mxu1 %v2783_v35  ;;  %v5351_v35 = vld [vmem:[%s6894_s7 + $0x18] sm:$0xff]  ;;  %v2682_v19 = vadd.f32 %v2681_v38, %v2633_v6 }
 0x3c1   :  { %v2715_v5 = vpop.f32.mrf.mxu3  ;;  %3215 = vmatpush.bf16.msra.mxu2 %v5351_v35 }
 0x3c2   :  { %v2716_v60 = vadd.f32 %v2715_v5, %v2667_v34  ;;  %v2683_v41 = vpop.f32.mrf.mxu2  ;;  %v2637_v15 = vpop.f32.mrf.mxu1 }
 0x3c3   :  { %v2684_v5 = vadd.f32 %v2683_v41, %v2635_v46  ;;  %v5348_v46 = vld [vmem:[%s6894_s7] sm:$0xff] }
 0x3c4   :  { %v2755_v9 = vmax.f32 %v2716_v60, 0.0 }
 0x3c5   :  { %3216 = vmatpush.bf16.msra.mxu2 %v5350_v2 }
 0x3c6   :  { %v2595_v58 = vpop.f32.mrf.mxu0 }
 0x3c7   :  { %v2596_v29 = vadd.f32 %v2595_v58, %v6562_v33 }
 0x3c9   :  { %v2717_v21 = vpop.f32.mrf.mxu3 }
 0x3ca   :  { %v2718_v37 = vadd.f32 %v2717_v21, %v2669_v39  ;;  %v2686_v50 = vpop.f32.mrf.mxu2  ;;  %v2639_v59 = vpop.f32.mrf.mxu1 }
 0x3cc   :  { %v2757_v4 = vmax.f32 %v2718_v37, 0.0  ;;  %v2589_v37 = vadd.f32 %v2588_v13, %v6562_v33 }
 0x3ce   :  { %v2785_v24 = vpack.c.bf16 %v2757_v4, %v2755_v9  ;;  %v2591_v9 = vadd.f32 %v2590_v27, %v6562_v33  ;;  %v2638_v4 = vadd.f32 %v2637_v15, %v2589_v37  ;;  %v2598_v8 = vpop.f32.mrf.mxu0 }
 0x3cf   :  { %v2599_v27 = vadd.f32 %v2598_v8, %v6562_v33  ;;  %v6636_v8 = vld [vmem:[%s6904_s17] ss:$0 sm:$0xff] }
 0x3d0   :  { %2992 = vmatmul.bf16.gmra.mxu1 %v2785_v24  ;;  %v2640_v24 = vadd.f32 %v2639_v59, %v2591_v9  ;;  %v6626_v9 = vld [vmem:[%s6906_s19] ss:$0 sm:$0xff] }
 0x3d1   :  { %v2720_v53 = vpop.f32.mrf.mxu3 }
 0x3d2   :  { %v2721_v18 = vadd.f32 %v2720_v53, %v2672_v12  ;;  %v2688_v60 = vpop.f32.mrf.mxu2  ;;  %v2642_v51 = vpop.f32.mrf.mxu1  ;;  %v2687_v53 = vadd.f32 %v2686_v50, %v2638_v4 }
 0x3d3   :  { %v2689_v45 = vadd.f32 %v2688_v60, %v2640_v24 }
 0x3d4   :  { %v2759_v62 = vmax.f32 %v2721_v18, 0.0  ;;  %v2594_v18 = vadd.f32 %v2593_v22, %v6562_v33 }
 0x3d6   :  { %v2643_v38 = vadd.f32 %v2642_v51, %v2594_v18 }
 0x3d9   :  { %v2722_v49 = vpop.f32.mrf.mxu3 }
 0x3da   :  { %v2723_v14 = vadd.f32 %v2722_v49, %v2674_v17  ;;  %v2691_v56 = vpop.f32.mrf.mxu2  ;;  %v2644_v49 = vpop.f32.mrf.mxu1 }
 0x3db   :  { %v2645_v42 = vadd.f32 %v2644_v49, %v2596_v29  ;;  %v2692_v13 = vadd.f32 %v2691_v56, %v2643_v38 }
 0x3dc   :  { %v2761_v48 = vmax.f32 %v2723_v14, 0.0  ;;  %v5349_v14 = vld [vmem:[%s6894_s7 + $0x8] sm:$0xff] }
 0x3dd   :  { %3217 = vmatpush.bf16.msra.mxu2 %v5349_v14 }
 0x3de   :  { %v2787_v16 = vpack.c.bf16 %v2761_v48, %v2759_v62 }
 0x3e0   :  { %2997 = vmatmul.bf16.gmra.mxu1 %v2787_v16  ;;  %v2600_v16 = vpop.f32.mrf.mxu0 }
 0x3e1   :  { %v2725_v55 = vpop.f32.mrf.mxu3  ;;  %3218 = vmatpush.bf16.msra.mxu2 %v5348_v46 }
 0x3e2   :  { %v2726_v47 = vadd.f32 %v2725_v55, %v2677_v25  ;;  %v2693_v62 = vpop.f32.mrf.mxu2  ;;  %v2647_v11 = vpop.f32.mrf.mxu1 }
 0x3e3   :  { %v2694_v55 = vadd.f32 %v2693_v62, %v2645_v42 }
 0x3e4   :  { %v2763_v26 = vmax.f32 %v2726_v47, 0.0 }
 0x3e9   :  { %v2727_v0 = vpop.f32.mrf.mxu3 }
 0x3ea   :  { %v2728_v61 = vadd.f32 %v2727_v0, %v2679_v44  ;;  %v2696_v43 = vpop.f32.mrf.mxu2  ;;  %v2939_v44 = vpop.f32.mrf.mxu0  ;;  %v3029_v0 = vadd.f32 1e-05, %v3028_v3 }
 0x3eb   :  { %v2649_v1 = vpop.f32.mrf.mxu1 }
 0x3ec   :  { %v2765_v28 = vmax.f32 %v2728_v61, 0.0  ;;  %5403 = vrsqrt.f32 %v3029_v0  ;;  %vm3036_vm0 = vweird.f32 %v3029_v0 }
 0x3ee   :  { %v2789_v40 = vpack.c.bf16 %v2765_v28, %v2763_v26  ;;  %v2601_v28 = vadd.f32 %v2600_v16, %v6562_v33 }
 0x3f0   :  { %3002 = vmatmul.bf16.gmra.mxu1 %v2789_v40  ;;  %v2648_v40 = vadd.f32 %v2647_v11, %v2599_v27  ;;  %v2650_v50 = vadd.f32 %v2649_v1, %v2601_v28 }
 0x3f1   :  { %v2730_v23 = vpop.f32.mrf.mxu3 }
 0x3f2   :  { %v2731_v36 = vadd.f32 %v2730_v23, %v2682_v19  ;;  %v2698_v23 = vpop.f32.mrf.mxu2  ;;  %v2941_v31 = vpop.f32.mrf.mxu0  ;;  %v2697_v6 = vadd.f32 %v2696_v43, %v2648_v40 }
 0x3f3   :  { %v5404_v15 = vpop.eup %5403  ;;  %v2699_v35 = vadd.f32 %v2698_v23, %v2650_v50 }
 0x3f4   :  { %v2767_v34 = vmax.f32 %v2731_v36, 0.0  ;;  %vm3037_vm1 = vweird.f32 %v5404_v15 }
 0x3f5   :  { %vm3038_vm2 = vmor %vm3036_vm0, %vm3037_vm1 }
 0x3f9   :  { %v2732_v30 = vpop.f32.mrf.mxu3 }
 0x3fa   :  { %v2733_v54 = vadd.f32 %v2732_v30, %v2684_v5  ;;  %v3031_v5 = vmul.f32 %v5404_v15, %v3029_v0 }
 0x3fc   :  { %v2769_v39 = vmax.f32 %v2733_v54, 0.0  ;;  %v3032_v33 = vmul.f32 %v5404_v15, %v3031_v5 }
 0x3fe   :  { %v2791_v21 = vpack.c.bf16 %v2769_v39, %v2767_v34  ;;  %v2944_v34 = vpop.f32.mrf.mxu0  ;;  %v3033_v39 = vmul.f32 0.5, %v3032_v33 }
 0x400   :  { %3007 = vmatmul.bf16.gmra.mxu1 %v2791_v21  ;;  %v3034_v60 = vsub.f32 1.5, %v3033_v39  ;;  %v6620_v21 = vld [vmem:[%s6893_s6] ss:$0 sm:$0xff]  ;;  %v5358_v39 = vld [vmem:[%s6896_s9 + $0x10] sm:$0xff]  ;;  %s7004_s6 = sld [smem:[#allocation32_spill]] }
 0x401   :  { %v2735_v7 = vpop.f32.mrf.mxu3  ;;  %v2945_v49 = vadd.f32 %v6620_v21, %v2944_v34 }
 0x402   :  { %v2736_v63 = vadd.f32 %v2735_v7, %v2687_v53  ;;  %v3035_v37 = vmul.f32 %v5404_v15, %v3034_v60  ;;  %v2940_v7 = vadd.f32 %v6620_v21, %v2939_v44 }
 0x404   :  { %v2771_v12 = vmax.f32 %v2736_v63, 0.0  ;;  %v3039_v2 = vsel %vm3038_vm2, %v5404_v15, %v3035_v37 }
 0x405   :  { %v6629_v53 = vperm.slane %v3039_v2, 0 }
 0x406   :  { %v2946_v58 = vpop.f32.mrf.mxu0 }
 0x407   :  { %v2947_v3 = vadd.f32 %v6620_v21, %v2946_v58 }
 0x409   :  { %v2737_v52 = vpop.f32.mrf.mxu3 }
 0x40a   :  { %v2738_v10 = vadd.f32 %v2737_v52, %v2689_v45  ;;  %v2942_v45 = vadd.f32 %v6620_v21, %v2941_v31 }
 0x40c   :  { %v2773_v32 = vmax.f32 %v2738_v10, 0.0 }
 0x40e   :  { %v2793_v17 = vpack.c.bf16 %v2773_v32, %v2771_v12  ;;  %v2949_v56 = vpop.f32.mrf.mxu0  ;;  %v6642_v32 = vld [vmem:[%s6905_s18] ss:$0 sm:$0xff] }
 0x410   :  { %3012 = vmatmul.bf16.gmra.mxu1 %v2793_v17 }
 0x411   :  { %v2740_v48 = vpop.f32.mrf.mxu3 }
 0x412   :  { %v2741_v57 = vadd.f32 %v2740_v48, %v2692_v13  ;;  %v5359_v48 = vld [vmem:[%s6896_s9 + $0x18] sm:$0xff] }
 0x413   :  { %3349 = vmatpush.bf16.msrb.mxu3 %v5359_v48 }
 0x414   :  { %v2775_v47 = vmax.f32 %v2741_v57, 0.0 }
 0x416   :  { %v2951_v29 = vpop.f32.mrf.mxu0 }
 0x417   :  { %3350 = vmatpush.bf16.msrb.mxu3 %v5358_v39 }
 0x419   :  { %v2742_v20 = vpop.f32.mrf.mxu3 }
 0x41a   :  { %v2743_v25 = vadd.f32 %v2742_v20, %v2694_v55 }
 0x41c   :  { %v2777_v41 = vmax.f32 %v2743_v25, 0.0 }
 0x41e   :  { %v2795_v61 = vpack.c.bf16 %v2777_v41, %v2775_v47  ;;  %v2954_v44 = vpop.f32.mrf.mxu0 }
 0x41f   :  { %v2955_v33 = vadd.f32 %v6620_v21, %v2954_v44 }
 0x420   :  { %3017 = vmatmul.bf16.gmra.mxu1 %v2795_v61  ;;  %v2950_v61 = vadd.f32 %v6620_v21, %v2949_v56 }
 0x421   :  { %v2745_v26 = vpop.f32.mrf.mxu3 }
 0x422   :  { %v2746_v22 = vadd.f32 %v2745_v26, %v2697_v6 }
 0x424   :  { %v2779_v30 = vmax.f32 %v2746_v22, 0.0 }
 0x426   :  { %v2956_v50 = vpop.f32.mrf.mxu0 }
 0x429   :  { %v2747_v19 = vpop.f32.mrf.mxu3 }
 0x42a   :  { %v2748_v36 = vadd.f32 %v2747_v19, %v2699_v35  ;;  %v2952_v35 = vadd.f32 %v6620_v21, %v2951_v29 }
 0x42c   :  { %v2781_v54 = vmax.f32 %v2748_v36, 0.0 }
 0x42e   :  { %v2797_v59 = vpack.c.bf16 %v2781_v54, %v2779_v30  ;;  %v2959_v54 = vpop.f32.mrf.mxu0 }
 0x430   :  { %3022 = vmatmul.bf16.gmra.mxu1 %v2797_v59 }
 0x43d   :  { %v2988_v4 = vpop.f32.mrf.mxu1 }
 0x43e   :  { %v2989_v24 = vadd.f32 %v2988_v4, %v2940_v7 }
 0x440   :  { %v3044_v51 = vsub.f32 %v2989_v24, %v6626_v9 }
 0x442   :  { %v3063_v63 = vmul.f32 %v6629_v53, %v3044_v51  ;;  %v2957_v51 = vadd.f32 %v6620_v21, %v2956_v50 }
 0x444   :  { %v3083_v12 = vmul.f32 %v6636_v8, %v3063_v63 }
 0x445   :  { %v2990_v52 = vpop.f32.mrf.mxu1 }
 0x446   :  { %v2991_v10 = vadd.f32 %v2990_v52, %v2942_v45  ;;  %v3103_v14 = vadd.f32 %v6642_v32, %v3083_v12  ;;  %v2961_v45 = vpop.f32.mrf.mxu0 }
 0x448   :  { %v3045_v17 = vsub.f32 %v2991_v10, %v6626_v9  ;;  %v3119_v13 = vmax.f32 %v3103_v14, 0.0 }
 0x44a   :  { %v3064_v18 = vmul.f32 %v6629_v53, %v3045_v17 }
 0x44c   :  { %v3084_v62 = vmul.f32 %v6636_v8, %v3064_v18  ;;  %v2960_v18 = vadd.f32 %v6620_v21, %v2959_v54 }
 0x44d   :  { %v2993_v16 = vpop.f32.mrf.mxu1 }
 0x44e   :  { %v3104_v38 = vadd.f32 %v6642_v32, %v3084_v62  ;;  %v2994_v42 = vadd.f32 %v2993_v16, %v2945_v49  ;;  %v2964_v16 = vpop.f32.mrf.mxu0 }
 0x450   :  { %v3120_v55 = vmax.f32 %v3104_v38, 0.0  ;;  %v3046_v57 = vsub.f32 %v2994_v42, %v6626_v9 }
 0x452   :  { %v3135_v20 = vpack.c.bf16 %v3120_v55, %v3119_v13  ;;  %v3065_v11 = vmul.f32 %v6629_v53, %v3046_v57  ;;  %v2962_v57 = vadd.f32 %v6620_v21, %v2961_v45 }
 0x454   :  { %3219 = vmatmul.bf16.vlgmr.msra.gmra.mxu2 %v3135_v20  ;;  %v3085_v47 = vmul.f32 %v6636_v8, %v3065_v11 }
 0x455   :  { %v2995_v25 = vpop.f32.mrf.mxu1 }
 0x456   :  { %v2996_v43 = vadd.f32 %v2995_v25, %v2947_v3  ;;  %v3105_v26 = vadd.f32 %v6642_v32, %v3085_v47  ;;  %v2966_v44 = vpop.f32.mrf.mxu0 }
 0x458   :  { %v3047_v41 = vsub.f32 %v2996_v43, %v6626_v9  ;;  %v3121_v31 = vmax.f32 %v3105_v26, 0.0 }
 0x45a   :  { %v3066_v0 = vmul.f32 %v6629_v53, %v3047_v41  ;;  %v2965_v41 = vadd.f32 %v6620_v21, %v2964_v16 }
 0x45c   :  { %v3086_v27 = vmul.f32 %v6636_v8, %v3066_v0 }
 0x45d   :  { %v2998_v28 = vpop.f32.mrf.mxu1 }
 0x45e   :  { %v2999_v40 = vadd.f32 %v2998_v28, %v2950_v61  ;;  %v3106_v1 = vadd.f32 %v6642_v32, %v3086_v27  ;;  %v5357_v27 = vld [vmem:[%s6896_s9 + $0x8] sm:$0xff]  ;;  %v2969_v50 = vpop.f32.mrf.mxu0 }
 0x45f   :  { %3351 = vmatpush.bf16.msrb.mxu3 %v5357_v27 }
 0x460   :  { %v3048_v23 = vsub.f32 %v2999_v40, %v6626_v9  ;;  %v3122_v15 = vmax.f32 %v3106_v1, 0.0 }
 0x462   :  { %v3136_v6 = vpack.c.bf16 %v3122_v15, %v3121_v31  ;;  %v3067_v22 = vmul.f32 %v6629_v53, %v3048_v23 }
 0x464   :  { %3224 = vmatmul.bf16.gmra.mxu2 %v3136_v6  ;;  %v3087_v5 = vmul.f32 %v6636_v8, %v3067_v22  ;;  %v2967_v6 = vadd.f32 %v6620_v21, %v2966_v44 }
 0x465   :  { %v3000_v46 = vpop.f32.mrf.mxu1 }
 0x466   :  { %v3001_v19 = vadd.f32 %v3000_v46, %v2952_v35  ;;  %v3107_v34 = vadd.f32 %v6642_v32, %v3087_v5 }
 0x468   :  { %v3049_v36 = vsub.f32 %v3001_v19, %v6626_v9  ;;  %v3123_v4 = vmax.f32 %v3107_v34, 0.0 }
 0x46a   :  { %v3068_v30 = vmul.f32 %v6629_v53, %v3049_v36 }
 0x46c   :  { %v3088_v59 = vmul.f32 %v6636_v8, %v3068_v30  ;;  %v2970_v30 = vadd.f32 %v6620_v21, %v2969_v50 }
 0x46d   :  { %v3003_v60 = vpop.f32.mrf.mxu1 }
 0x46e   :  { %v3004_v58 = vadd.f32 %v3003_v60, %v2955_v33  ;;  %v3108_v37 = vadd.f32 %v6642_v32, %v3088_v59  ;;  %v2971_v59 = vpop.f32.mrf.mxu0 }
 0x470   :  { %v3050_v7 = vsub.f32 %v3004_v58, %v6626_v9  ;;  %v3124_v2 = vmax.f32 %v3108_v37, 0.0 }
 0x472   :  { %v3137_v24 = vpack.c.bf16 %v3124_v2, %v3123_v4  ;;  %v3069_v56 = vmul.f32 %v6629_v53, %v3050_v7  ;;  %v2972_v2 = vadd.f32 %v6620_v21, %v2971_v59 }
 0x474   :  { %3229 = vmatmul.bf16.gmra.mxu2 %v3137_v24  ;;  %v3089_v10 = vmul.f32 %v6636_v8, %v3069_v56 }
 0x475   :  { %v3005_v63 = vpop.f32.mrf.mxu1 }
 0x476   :  { %v3006_v52 = vadd.f32 %v3005_v63, %v2957_v51  ;;  %v3109_v14 = vadd.f32 %v6642_v32, %v3089_v10  ;;  %v5356_v51 = vld [vmem:[%s6896_s9] sm:$0xff]  ;;  %v2974_v63 = vpop.f32.mrf.mxu0 }
 0x477   :  { %3352 = vmatpush.bf16.msrb.mxu3 %v5356_v51 }
 0x478   :  { %v3051_v12 = vsub.f32 %v3006_v52, %v6626_v9  ;;  %v3125_v42 = vmax.f32 %v3109_v14, 0.0 }
 0x47a   :  { %v3070_v17 = vmul.f32 %v6629_v53, %v3051_v12 }
 0x47c   :  { %v3090_v49 = vmul.f32 %v6636_v8, %v3070_v17  ;;  %v2975_v17 = vadd.f32 %v6620_v21, %v2974_v63 }
 0x47d   :  { %v3008_v62 = vpop.f32.mrf.mxu1 }
 0x47e   :  { %v3009_v48 = vadd.f32 %v3008_v62, %v2960_v18  ;;  %v3110_v29 = vadd.f32 %v6642_v32, %v3090_v49 }
 0x480   :  { %v3052_v38 = vsub.f32 %v3009_v48, %v6626_v9  ;;  %v3126_v13 = vmax.f32 %v3110_v29, 0.0 }
 0x482   :  { %v3138_v55 = vpack.c.bf16 %v3126_v13, %v3125_v42  ;;  %v3071_v20 = vmul.f32 %v6629_v53, %v3052_v38  ;;  %v2976_v42 = vpop.f32.mrf.mxu0 }
 0x484   :  { %3234 = vmatmul.bf16.gmra.mxu2 %v3138_v55  ;;  %v3091_v25 = vmul.f32 %v6636_v8, %v3071_v20  ;;  %v2977_v55 = vadd.f32 %v6620_v21, %v2976_v42 }
 0x485   :  { %v3010_v3 = vpop.f32.mrf.mxu1 }
 0x486   :  { %v3011_v11 = vadd.f32 %v3010_v3, %v2962_v57  ;;  %v3111_v61 = vadd.f32 %v6642_v32, %v3091_v25 }
 0x488   :  { %v3053_v43 = vsub.f32 %v3011_v11, %v6626_v9  ;;  %v3127_v23 = vmax.f32 %v3111_v61, 0.0 }
 0x48a   :  { %v3072_v47 = vmul.f32 %v6629_v53, %v3053_v43 }
 0x48c   :  { %v3092_v0 = vmul.f32 %v6636_v8, %v3072_v47 }
 0x48d   :  { %v3013_v26 = vpop.f32.mrf.mxu1 }
 0x48e   :  { %v3014_v28 = vadd.f32 %v3013_v26, %v2965_v41  ;;  %v3112_v40 = vadd.f32 %v6642_v32, %v3092_v0  ;;  %v6734_v26 = vld [vmem:[%s6895_s8] ss:$0 sm:$0xff] }
 0x490   :  { %v3054_v1 = vsub.f32 %v3014_v28, %v6626_v9  ;;  %v3128_v31 = vmax.f32 %v3112_v40, 0.0 }
 0x492   :  { %v3139_v15 = vpack.c.bf16 %v3128_v31, %v3127_v23  ;;  %v3073_v35 = vmul.f32 %v6629_v53, %v3054_v1 }
 0x494   :  { %3239 = vmatmul.bf16.gmra.mxu2 %v3139_v15  ;;  %v3093_v19 = vmul.f32 %v6636_v8, %v3073_v35 }
 0x495   :  { %v3015_v22 = vpop.f32.mrf.mxu1 }
 0x496   :  { %v3016_v46 = vadd.f32 %v3015_v22, %v2967_v6  ;;  %v3113_v33 = vadd.f32 %v6642_v32, %v3093_v19 }
 0x498   :  { %v3055_v5 = vsub.f32 %v3016_v46, %v6626_v9  ;;  %v3129_v37 = vmax.f32 %v3113_v33, 0.0 }
 0x49a   :  { %v3074_v36 = vmul.f32 %v6629_v53, %v3055_v5 }
 0x49c   :  { %v3094_v54 = vmul.f32 %v6636_v8, %v3074_v36 }
 0x49d   :  { %v3018_v34 = vpop.f32.mrf.mxu1 }
 0x49e   :  { %v3019_v39 = vadd.f32 %v3018_v34, %v2970_v30  ;;  %v3114_v60 = vadd.f32 %v6642_v32, %v3094_v54 }
 0x4a0   :  { %v3056_v58 = vsub.f32 %v3019_v39, %v6626_v9  ;;  %v3130_v7 = vmax.f32 %v3114_v60, 0.0 }
 0x4a2   :  { %v3140_v4 = vpack.c.bf16 %v3130_v7, %v3129_v37  ;;  %v3075_v24 = vmul.f32 %v6629_v53, %v3056_v58 }
 0x4a4   :  { %3244 = vmatmul.bf16.gmra.mxu2 %v3140_v4  ;;  %v3095_v52 = vmul.f32 %v6636_v8, %v3075_v24 }
 0x4a5   :  { %v3020_v56 = vpop.f32.mrf.mxu1 }
 0x4a6   :  { %v3021_v45 = vadd.f32 %v3020_v56, %v2972_v2  ;;  %v3115_v49 = vadd.f32 %v6642_v32, %v3095_v52  ;;  %v5360_v2 = vld [vmem:[%s6898_s11] sm:$0xff] }
 0x4a8   :  { %v3057_v10 = vsub.f32 %v3021_v45, %v6626_v9  ;;  %v3131_v16 = vmax.f32 %v3115_v49, 0.0 }
 0x4aa   :  { %v3076_v12 = vmul.f32 %v6629_v53, %v3057_v10 }
 0x4ac   :  { %v3096_v18 = vmul.f32 %v6636_v8, %v3076_v12 }
 0x4ad   :  { %v3023_v14 = vpop.f32.mrf.mxu1 }
 0x4ae   :  { %v3024_v62 = vadd.f32 %v3023_v14, %v2975_v17  ;;  %v3116_v48 = vadd.f32 %v6642_v32, %v3096_v18 }
 0x4b0   :  { %v3058_v29 = vsub.f32 %v3024_v62, %v6626_v9  ;;  %v3132_v38 = vmax.f32 %v3116_v48, 0.0 }
 0x4b2   :  { %v3141_v13 = vpack.c.bf16 %v3132_v38, %v3131_v16  ;;  %v3077_v57 = vmul.f32 %v6629_v53, %v3058_v29 }
 0x4b4   :  { %3249 = vmatmul.bf16.gmra.mxu2 %v3141_v13  ;;  %v3097_v11 = vmul.f32 %v6636_v8, %v3077_v57 }
 0x4b5   :  { %v3025_v20 = vpop.f32.mrf.mxu1 }
 0x4b6   :  { %v3026_v3 = vadd.f32 %v3025_v20, %v2977_v55  ;;  %v3117_v47 = vadd.f32 %v6642_v32, %v3097_v11 }
 0x4b8   :  { %v3059_v25 = vsub.f32 %v3026_v3, %v6626_v9  ;;  %v3133_v0 = vmax.f32 %v3117_v47, 0.0  ;;  %v5361_v9 = vld [vmem:[%s6898_s11 + $0x8] sm:$0xff]  ;;  %v5362_v47 = vld [vmem:[%s6900_s13] sm:$0xff] }
 0x4b9   :  { %3469 = vmatpush.bf16.msrb.mxu0 %v5361_v9  ;;  %3580 = vmatpush.bf16.msrb.mxu1 %v5362_v47 }
 0x4ba   :  { %v3078_v43 = vmul.f32 %v6629_v53, %v3059_v25 }
 0x4bc   :  { %v3098_v44 = vmul.f32 %v6636_v8, %v3078_v43 }
 0x4bd   :  { %3470 = vmatpush.bf16.msrb.mxu0 %v5360_v2 }
 0x4be   :  { %v3118_v41 = vadd.f32 %v6642_v32, %v3098_v44 }
 0x4c0   :  { %v3134_v61 = vmax.f32 %v3118_v41, 0.0 }
 0x4c2   :  { %v3142_v21 = vpack.c.bf16 %v3134_v61, %v3133_v0  ;;  %v5399_v0 = vld [vmem:[%s6897_s10] ss:$0 sm:$0xff] }
 0x4c4   :  { %3254 = vmatmul.bf16.gmra.mxu2 %v3142_v21 }
 0x4d7   :  { %v3220_v27 = vpop.f32.mrf.mxu2 }
 0x4d8   :  { %v3221_v53 = vadd.f32 %v6734_v26, %v3220_v27 }
 0x4da   :  { %v3260_v28 = vmax.f32 %v3221_v53, 0.0 }
 0x4df   :  { %v3222_v8 = vpop.f32.mrf.mxu2 }
 0x4e0   :  { %v3223_v32 = vadd.f32 %v6734_v26, %v3222_v8 }
 0x4e2   :  { %v3261_v40 = vmax.f32 %v3223_v32, 0.0 }
 0x4e4   :  { %v3276_v1 = vpack.c.bf16 %v3261_v40, %v3260_v28 }
 0x4e6   :  { %5064 = vmatmul.msk.bf16.vlgmr.msrb.gmra.mxu3 %vm3320_vm3, %v3276_v1 }
 0x4e7   :  { %v3225_v23 = vpop.f32.mrf.mxu2 }
 0x4e8   :  { %v3226_v31 = vadd.f32 %v6734_v26, %v3225_v23 }
 0x4ea   :  { %v3262_v6 = vmax.f32 %v3226_v31, 0.0 }
 0x4ef   :  { %v3227_v15 = vpop.f32.mrf.mxu2 }
 0x4f0   :  { %v3228_v50 = vadd.f32 %v6734_v26, %v3227_v15 }
 0x4f2   :  { %v3263_v35 = vmax.f32 %v3228_v50, 0.0 }
 0x4f4   :  { %v3277_v22 = vpack.c.bf16 %v3263_v35, %v3262_v6 }
 0x4f6   :  { %5065 = vmatmul.msk.bf16.gmra.mxu3 %vm3320_vm3, %v3277_v22 }
 0x4f7   :  { %v3230_v46 = vpop.f32.mrf.mxu2 }
 0x4f8   :  { %v3231_v19 = vadd.f32 %v6734_v26, %v3230_v46 }
 0x4fa   :  { %v3264_v30 = vmax.f32 %v3231_v19, 0.0 }
 0x4ff   :  { %v3232_v5 = vpop.f32.mrf.mxu2 }
 0x500   :  { %v3233_v36 = vadd.f32 %v6734_v26, %v3232_v5 }
 0x502   :  { %v3265_v54 = vmax.f32 %v3233_v36, 0.0 }
 0x504   :  { %v3278_v33 = vpack.c.bf16 %v3265_v54, %v3264_v30 }
 0x506   :  { %5066 = vmatmul.msk.bf16.gmra.mxu3 %vm3320_vm3, %v3278_v33 }
 0x507   :  { %v3235_v59 = vpop.f32.mrf.mxu2 }
 0x508   :  { %v3236_v34 = vadd.f32 %v6734_v26, %v3235_v59 }
 0x50a   :  { %v3266_v58 = vmax.f32 %v3236_v34, 0.0 }
 0x50f   :  { %v3237_v39 = vpop.f32.mrf.mxu2 }
 0x510   :  { %v3238_v60 = vadd.f32 %v6734_v26, %v3237_v39 }
 0x512   :  { %v3267_v37 = vmax.f32 %v3238_v60, 0.0 }
 0x514   :  { %v3279_v7 = vpack.c.bf16 %v3267_v37, %v3266_v58 }
 0x516   :  { %5067 = vmatmul.msk.bf16.gmra.mxu3 %vm3320_vm3, %v3279_v7 }
 0x517   :  { %v3240_v4 = vpop.f32.mrf.mxu2 }
 0x518   :  { %v3241_v24 = vadd.f32 %v6734_v26, %v3240_v4 }
 0x51a   :  { %v3268_v45 = vmax.f32 %v3241_v24, 0.0 }
 0x51f   :  { %v3242_v51 = vpop.f32.mrf.mxu2 }
 0x520   :  { %v3243_v56 = vadd.f32 %v6734_v26, %v3242_v51 }
 0x522   :  { %v3269_v63 = vmax.f32 %v3243_v56, 0.0 }
 0x524   :  { %v3280_v52 = vpack.c.bf16 %v3269_v63, %v3268_v45 }
 0x526   :  { %5068 = vmatmul.msk.bf16.gmra.mxu3 %vm3320_vm3, %v3280_v52 }
 0x527   :  { %v3245_v10 = vpop.f32.mrf.mxu2 }
 0x528   :  { %v3246_v12 = vadd.f32 %v6734_v26, %v3245_v10 }
 0x52a   :  { %v3270_v49 = vmax.f32 %v3246_v12, 0.0 }
 0x52f   :  { %v3247_v17 = vpop.f32.mrf.mxu2 }
 0x530   :  { %v3248_v18 = vadd.f32 %v6734_v26, %v3247_v17 }
 0x532   :  { %v3271_v14 = vmax.f32 %v3248_v18, 0.0 }
 0x534   :  { %v3281_v62 = vpack.c.bf16 %v3271_v14, %v3270_v49 }
 0x536   :  { %5069 = vmatmul.msk.bf16.gmra.mxu3 %vm3320_vm3, %v3281_v62 }
 0x537   :  { %v3250_v48 = vpop.f32.mrf.mxu2 }
 0x538   :  { %v3251_v29 = vadd.f32 %v6734_v26, %v3250_v48 }
 0x53a   :  { %v3272_v42 = vmax.f32 %v3251_v29, 0.0 }
 0x53f   :  { %v3252_v16 = vpop.f32.mrf.mxu2 }
 0x540   :  { %v3253_v38 = vadd.f32 %v6734_v26, %v3252_v16 }
 0x542   :  { %v3273_v13 = vmax.f32 %v3253_v38, 0.0 }
 0x544   :  { %v3282_v55 = vpack.c.bf16 %v3273_v13, %v3272_v42 }
 0x546   :  { %5070 = vmatmul.msk.bf16.gmra.mxu3 %vm3320_vm3, %v3282_v55 }
 0x547   :  { %v3255_v57 = vpop.f32.mrf.mxu2 }
 0x548   :  { %v3256_v20 = vadd.f32 %v6734_v26, %v3255_v57 }
 0x54a   :  { %v3274_v25 = vmax.f32 %v3256_v20, 0.0  ;;  %v3646_v20 = vld [vmem:[%s6902_s15] sm:$0xf] }
 0x54f   :  { %v3257_v3 = vpop.f32.mrf.mxu2 }
 0x550   :  { %v3258_v11 = vadd.f32 %v6734_v26, %v3257_v3  ;;  %v3678_v3 = vsel %vm3676_vm5, %v3646_v20, 0 }
 0x551   :  { %3687 = vmatpush.bf16.msrb.mxu2 %v3678_v3 }
 0x552   :  { %v3275_v43 = vmax.f32 %v3258_v11, 0.0 }
 0x554   :  { %v3283_v44 = vpack.c.bf16 %v3275_v43, %v3274_v25  ;;  %v5400_v25 = vld [vmem:[%s6899_s12] ss:$0 sm:$0xff] }
 0x556   :  { %5071 = vmatmul.msk.bf16.gmra.mxu3 %vm3320_vm3, %v3283_v44 }
 0x569   :  { %v3354_v41 = vpop.f32.mrf.mxu3 }
 0x56a   :  { %v3355_v61 = vadd.f32 %v5399_v0, %v3354_v41 }
 0x56c   :  { %v3394_v9 = vmax.f32 %v3355_v61, 0.0 }
 0x571   :  { %v3356_v21 = vpop.f32.mrf.mxu3 }
 0x572   :  { %v3357_v27 = vadd.f32 %v5399_v0, %v3356_v21 }
 0x574   :  { %v3395_v26 = vmax.f32 %v3357_v27, 0.0 }
 0x576   :  { %v3410_v53 = vpack.c.bf16 %v3395_v26, %v3394_v9 }
 0x578   :  { %5080 = vmatmul.msk.bf16.vlgmr.msrb.gmra.mxu0 %vm3438_vm4, %v3410_v53 }
 0x579   :  { %v3359_v8 = vpop.f32.mrf.mxu3 }
 0x57a   :  { %v3360_v32 = vadd.f32 %v5399_v0, %v3359_v8 }
 0x57c   :  { %v3396_v1 = vmax.f32 %v3360_v32, 0.0 }
 0x581   :  { %v3361_v28 = vpop.f32.mrf.mxu3 }
 0x582   :  { %v3362_v40 = vadd.f32 %v5399_v0, %v3361_v28 }
 0x584   :  { %v3397_v23 = vmax.f32 %v3362_v40, 0.0 }
 0x586   :  { %v3411_v31 = vpack.c.bf16 %v3397_v23, %v3396_v1 }
 0x588   :  { %5081 = vmatmul.msk.bf16.gmra.mxu0 %vm3438_vm4, %v3411_v31 }
 0x589   :  { %v3364_v15 = vpop.f32.mrf.mxu3 }
 0x58a   :  { %v3365_v50 = vadd.f32 %v5399_v0, %v3364_v15 }
 0x58c   :  { %v3398_v22 = vmax.f32 %v3365_v50, 0.0 }
 0x591   :  { %v3366_v6 = vpop.f32.mrf.mxu3 }
 0x592   :  { %v3367_v35 = vadd.f32 %v5399_v0, %v3366_v6 }
 0x594   :  { %v3399_v46 = vmax.f32 %v3367_v35, 0.0 }
 0x596   :  { %v3412_v19 = vpack.c.bf16 %v3399_v46, %v3398_v22 }
 0x598   :  { %5082 = vmatmul.msk.bf16.gmra.mxu0 %vm3438_vm4, %v3412_v19 }
 0x599   :  { %v3369_v5 = vpop.f32.mrf.mxu3 }
 0x59a   :  { %v3370_v36 = vadd.f32 %v5399_v0, %v3369_v5 }
 0x59c   :  { %v3400_v33 = vmax.f32 %v3370_v36, 0.0 }
 0x5a1   :  { %v3371_v30 = vpop.f32.mrf.mxu3 }
 0x5a2   :  { %v3372_v54 = vadd.f32 %v5399_v0, %v3371_v30 }
 0x5a4   :  { %v3401_v59 = vmax.f32 %v3372_v54, 0.0 }
 0x5a6   :  { %v3413_v34 = vpack.c.bf16 %v3401_v59, %v3400_v33 }
 0x5a8   :  { %5083 = vmatmul.msk.bf16.gmra.mxu0 %vm3438_vm4, %v3413_v34 }
 0x5a9   :  { %v3374_v39 = vpop.f32.mrf.mxu3 }
 0x5aa   :  { %v3375_v60 = vadd.f32 %v5399_v0, %v3374_v39 }
 0x5ac   :  { %v3402_v7 = vmax.f32 %v3375_v60, 0.0 }
 0x5b1   :  { %v3376_v58 = vpop.f32.mrf.mxu3 }
 0x5b2   :  { %v3377_v37 = vadd.f32 %v5399_v0, %v3376_v58 }
 0x5b4   :  { %v3403_v4 = vmax.f32 %v3377_v37, 0.0 }
 0x5b6   :  { %v3414_v2 = vpack.c.bf16 %v3403_v4, %v3402_v7 }
 0x5b8   :  { %5084 = vmatmul.msk.bf16.gmra.mxu0 %vm3438_vm4, %v3414_v2 }
 0x5b9   :  { %v3379_v24 = vpop.f32.mrf.mxu3 }
 0x5ba   :  { %v3380_v51 = vadd.f32 %v5399_v0, %v3379_v24 }
 0x5bc   :  { %v3404_v63 = vmax.f32 %v3380_v51, 0.0 }
 0x5c1   :  { %v3381_v56 = vpop.f32.mrf.mxu3 }
 0x5c2   :  { %v3382_v45 = vadd.f32 %v5399_v0, %v3381_v56 }
 0x5c4   :  { %v3405_v52 = vmax.f32 %v3382_v45, 0.0 }
 0x5c6   :  { %v3415_v10 = vpack.c.bf16 %v3405_v52, %v3404_v63 }
 0x5c8   :  { %5085 = vmatmul.msk.bf16.gmra.mxu0 %vm3438_vm4, %v3415_v10 }
 0x5c9   :  { %v3384_v12 = vpop.f32.mrf.mxu3 }
 0x5ca   :  { %v3385_v17 = vadd.f32 %v5399_v0, %v3384_v12 }
 0x5cc   :  { %v3406_v14 = vmax.f32 %v3385_v17, 0.0 }
 0x5d1   :  { %v3386_v18 = vpop.f32.mrf.mxu3 }
 0x5d2   :  { %v3387_v49 = vadd.f32 %v5399_v0, %v3386_v18 }
 0x5d4   :  { %v3407_v62 = vmax.f32 %v3387_v49, 0.0 }
 0x5d6   :  { %v3416_v48 = vpack.c.bf16 %v3407_v62, %v3406_v14 }
 0x5d8   :  { %5086 = vmatmul.msk.bf16.gmra.mxu0 %vm3438_vm4, %v3416_v48 }
 0x5d9   :  { %v3389_v29 = vpop.f32.mrf.mxu3 }
 0x5da   :  { %v3390_v16 = vadd.f32 %v5399_v0, %v3389_v29 }
 0x5dc   :  { %v3408_v13 = vmax.f32 %v3390_v16, 0.0 }
 0x5e1   :  { %v3391_v38 = vpop.f32.mrf.mxu3 }
 0x5e2   :  { %v3392_v42 = vadd.f32 %v5399_v0, %v3391_v38 }
 0x5e4   :  { %v3409_v55 = vmax.f32 %v3392_v42, 0.0  ;;  %v5401_v42 = vld [vmem:[%s7003_s16] ss:$0 sm:$0xff] }
 0x5e6   :  { %v3417_v57 = vpack.c.bf16 %v3409_v55, %v3408_v13 }
 0x5e8   :  { %5087 = vmatmul.msk.bf16.gmra.mxu0 %vm3438_vm4, %v3417_v57 }
 0x5f5   :  { %v3472_v11 = vpop.f32.mrf.mxu0 }
 0x5f6   :  { %v3473_v43 = vadd.f32 %v5400_v25, %v3472_v11 }
 0x5f8   :  { %v3512_v41 = vmax.f32 %v3473_v43, 0.0 }
 0x5fd   :  { %v3474_v44 = vpop.f32.mrf.mxu0 }
 0x5fe   :  { %v3475_v47 = vadd.f32 %v5400_v25, %v3474_v44 }
 0x600   :  { %v3513_v0 = vmax.f32 %v3475_v47, 0.0 }
 0x602   :  { %v3528_v61 = vpack.c.bf16 %v3513_v0, %v3512_v41 }
 0x604   :  { %5092 = vmatmul.msk.bf16.vlgmr.msrb.gmra.mxu1 %vm3548_vm6, %v3528_v61 }
 0x605   :  { %v3477_v21 = vpop.f32.mrf.mxu0 }
 0x606   :  { %v3478_v27 = vadd.f32 %v5400_v25, %v3477_v21 }
 0x608   :  { %v3514_v53 = vmax.f32 %v3478_v27, 0.0 }
 0x60d   :  { %v3479_v9 = vpop.f32.mrf.mxu0 }
 0x60e   :  { %v3480_v26 = vadd.f32 %v5400_v25, %v3479_v9 }
 0x610   :  { %v3515_v8 = vmax.f32 %v3480_v26, 0.0 }
 0x612   :  { %v3529_v32 = vpack.c.bf16 %v3515_v8, %v3514_v53 }
 0x614   :  { %5093 = vmatmul.msk.bf16.gmra.mxu1 %vm3548_vm6, %v3529_v32 }
 0x615   :  { %v3482_v28 = vpop.f32.mrf.mxu0 }
 0x616   :  { %v3483_v40 = vadd.f32 %v5400_v25, %v3482_v28 }
 0x618   :  { %v3516_v31 = vmax.f32 %v3483_v40, 0.0 }
 0x61d   :  { %v3484_v1 = vpop.f32.mrf.mxu0 }
 0x61e   :  { %v3485_v23 = vadd.f32 %v5400_v25, %v3484_v1 }
 0x620   :  { %v3517_v15 = vmax.f32 %v3485_v23, 0.0 }
 0x622   :  { %v3530_v50 = vpack.c.bf16 %v3517_v15, %v3516_v31 }
 0x624   :  { %5094 = vmatmul.msk.bf16.gmra.mxu1 %vm3548_vm6, %v3530_v50 }
 0x625   :  { %v3487_v6 = vpop.f32.mrf.mxu0 }
 0x626   :  { %v3488_v35 = vadd.f32 %v5400_v25, %v3487_v6 }
 0x628   :  { %v3518_v19 = vmax.f32 %v3488_v35, 0.0 }
 0x62d   :  { %v3489_v22 = vpop.f32.mrf.mxu0 }
 0x62e   :  { %v3490_v46 = vadd.f32 %v5400_v25, %v3489_v22 }
 0x630   :  { %v3519_v5 = vmax.f32 %v3490_v46, 0.0 }
 0x632   :  { %v3531_v36 = vpack.c.bf16 %v3519_v5, %v3518_v19 }
 0x634   :  { %5095 = vmatmul.msk.bf16.gmra.mxu1 %vm3548_vm6, %v3531_v36 }
 0x635   :  { %v3492_v30 = vpop.f32.mrf.mxu0 }
 0x636   :  { %v3493_v54 = vadd.f32 %v5400_v25, %v3492_v30 }
 0x638   :  { %v3520_v34 = vmax.f32 %v3493_v54, 0.0 }
 0x63d   :  { %v3494_v33 = vpop.f32.mrf.mxu0 }
 0x63e   :  { %v3495_v59 = vadd.f32 %v5400_v25, %v3494_v33 }
 0x640   :  { %v3521_v39 = vmax.f32 %v3495_v59, 0.0 }
 0x642   :  { %v3532_v60 = vpack.c.bf16 %v3521_v39, %v3520_v34 }
 0x644   :  { %5096 = vmatmul.msk.bf16.gmra.mxu1 %vm3548_vm6, %v3532_v60 }
 0x645   :  { %v3497_v58 = vpop.f32.mrf.mxu0 }
 0x646   :  { %v3498_v37 = vadd.f32 %v5400_v25, %v3497_v58 }
 0x648   :  { %v3522_v2 = vmax.f32 %v3498_v37, 0.0 }
 0x64d   :  { %v3499_v7 = vpop.f32.mrf.mxu0 }
 0x64e   :  { %v3500_v4 = vadd.f32 %v5400_v25, %v3499_v7 }
 0x650   :  { %v3523_v24 = vmax.f32 %v3500_v4, 0.0 }
 0x652   :  { %v3533_v51 = vpack.c.bf16 %v3523_v24, %v3522_v2 }
 0x654   :  { %5097 = vmatmul.msk.bf16.gmra.mxu1 %vm3548_vm6, %v3533_v51 }
 0x655   :  { %v3502_v56 = vpop.f32.mrf.mxu0 }
 0x656   :  { %v3503_v45 = vadd.f32 %v5400_v25, %v3502_v56 }
 0x658   :  { %v3524_v10 = vmax.f32 %v3503_v45, 0.0 }
 0x65d   :  { %v3504_v63 = vpop.f32.mrf.mxu0 }
 0x65e   :  { %v3505_v52 = vadd.f32 %v5400_v25, %v3504_v63 }
 0x660   :  { %v3525_v12 = vmax.f32 %v3505_v52, 0.0 }
 0x662   :  { %v3534_v17 = vpack.c.bf16 %v3525_v12, %v3524_v10 }
 0x664   :  { %5098 = vmatmul.msk.bf16.gmra.mxu1 %vm3548_vm6, %v3534_v17 }
 0x665   :  { %v3507_v18 = vpop.f32.mrf.mxu0 }
 0x666   :  { %v3508_v49 = vadd.f32 %v5400_v25, %v3507_v18  ;;  %v6805_v18 = vld [vmem:[#allocation2] ss:$0 sm:$0xff] }
 0x668   :  { %v3526_v48 = vmax.f32 %v3508_v49, 0.0 }
 0x66d   :  { %v3509_v14 = vpop.f32.mrf.mxu0 }
 0x66e   :  { %v3510_v62 = vadd.f32 %v5400_v25, %v3509_v14 }
 0x670   :  { %v3527_v29 = vmax.f32 %v3510_v62, 0.0 }
 0x672   :  { %v3535_v16 = vpack.c.bf16 %v3527_v29, %v3526_v48 }
 0x674   :  { %5099 = vmatmul.msk.bf16.gmra.mxu1 %vm3548_vm6, %v3535_v16 }
 0x681   :  { %v3582_v38 = vpop.f32.mrf.mxu1 }
 0x682   :  { %v3583_v13 = vadd.f32 %v5401_v42, %v3582_v38 }
 0x684   :  { %v3622_v20 = vmax.f32 %v3583_v13, 0.0 }
 0x689   :  { %v3584_v55 = vpop.f32.mrf.mxu1 }
 0x68a   :  { %v3585_v57 = vadd.f32 %v5401_v42, %v3584_v55 }
 0x68c   :  { %v3623_v3 = vmax.f32 %v3585_v57, 0.0 }
 0x68e   :  { %v3638_v11 = vpack.c.bf16 %v3623_v3, %v3622_v20 }
 0x690   :  { %5100 = vmatmul.msk.bf16.vlgmr.msrb.gmra.mxu2 %vm3651_vm7, %v3638_v11 }
 0x691   :  { %v3587_v25 = vpop.f32.mrf.mxu1 }
 0x692   :  { %v3588_v43 = vadd.f32 %v5401_v42, %v3587_v25 }
 0x694   :  { %v3624_v41 = vmax.f32 %v3588_v43, 0.0 }
 0x699   :  { %v3589_v44 = vpop.f32.mrf.mxu1 }
 0x69a   :  { %v3590_v47 = vadd.f32 %v5401_v42, %v3589_v44 }
 0x69c   :  { %v3625_v0 = vmax.f32 %v3590_v47, 0.0 }
 0x69e   :  { %v3639_v61 = vpack.c.bf16 %v3625_v0, %v3624_v41 }
 0x6a0   :  { %5101 = vmatmul.msk.bf16.gmra.mxu2 %vm3651_vm7, %v3639_v61 }
 0x6a1   :  { %v3592_v21 = vpop.f32.mrf.mxu1 }
 0x6a2   :  { %v3593_v27 = vadd.f32 %v5401_v42, %v3592_v21 }
 0x6a4   :  { %v3626_v53 = vmax.f32 %v3593_v27, 0.0 }
 0x6a9   :  { %v3594_v9 = vpop.f32.mrf.mxu1 }
 0x6aa   :  { %v3595_v26 = vadd.f32 %v5401_v42, %v3594_v9 }
 0x6ac   :  { %v3627_v8 = vmax.f32 %v3595_v26, 0.0 }
 0x6ae   :  { %v3640_v32 = vpack.c.bf16 %v3627_v8, %v3626_v53 }
 0x6b0   :  { %5102 = vmatmul.msk.bf16.gmra.mxu2 %vm3651_vm7, %v3640_v32 }
 0x6b1   :  { %v3597_v28 = vpop.f32.mrf.mxu1 }
 0x6b2   :  { %v3598_v40 = vadd.f32 %v5401_v42, %v3597_v28 }
 0x6b4   :  { %v3628_v31 = vmax.f32 %v3598_v40, 0.0 }
 0x6b9   :  { %v3599_v1 = vpop.f32.mrf.mxu1 }
 0x6ba   :  { %v3600_v23 = vadd.f32 %v5401_v42, %v3599_v1 }
 0x6bc   :  { %v3629_v15 = vmax.f32 %v3600_v23, 0.0 }
 0x6be   :  { %v3641_v50 = vpack.c.bf16 %v3629_v15, %v3628_v31 }
 0x6c0   :  { %5103 = vmatmul.msk.bf16.gmra.mxu2 %vm3651_vm7, %v3641_v50 }
 0x6c1   :  { %v3602_v6 = vpop.f32.mrf.mxu1 }
 0x6c2   :  { %v3603_v35 = vadd.f32 %v5401_v42, %v3602_v6 }
 0x6c4   :  { %v3630_v19 = vmax.f32 %v3603_v35, 0.0 }
 0x6c9   :  { %v3604_v22 = vpop.f32.mrf.mxu1 }
 0x6ca   :  { %v3605_v46 = vadd.f32 %v5401_v42, %v3604_v22 }
 0x6cc   :  { %v3631_v5 = vmax.f32 %v3605_v46, 0.0 }
 0x6ce   :  { %v3642_v36 = vpack.c.bf16 %v3631_v5, %v3630_v19 }
 0x6d0   :  { %5104 = vmatmul.msk.bf16.gmra.mxu2 %vm3651_vm7, %v3642_v36 }
 0x6d1   :  { %v3607_v30 = vpop.f32.mrf.mxu1 }
 0x6d2   :  { %v3608_v54 = vadd.f32 %v5401_v42, %v3607_v30 }
 0x6d4   :  { %v3632_v34 = vmax.f32 %v3608_v54, 0.0 }
 0x6d9   :  { %v3609_v33 = vpop.f32.mrf.mxu1 }
 0x6da   :  { %v3610_v59 = vadd.f32 %v5401_v42, %v3609_v33 }
 0x6dc   :  { %v3633_v39 = vmax.f32 %v3610_v59, 0.0 }
 0x6de   :  { %v3643_v60 = vpack.c.bf16 %v3633_v39, %v3632_v34 }
 0x6e0   :  { %5105 = vmatmul.msk.bf16.gmra.mxu2 %vm3651_vm7, %v3643_v60 }
 0x6e1   :  { %v3612_v58 = vpop.f32.mrf.mxu1 }
 0x6e2   :  { %v3613_v37 = vadd.f32 %v5401_v42, %v3612_v58 }
 0x6e4   :  { %v3634_v2 = vmax.f32 %v3613_v37, 0.0 }
 0x6e9   :  { %v3614_v7 = vpop.f32.mrf.mxu1 }
 0x6ea   :  { %v3615_v4 = vadd.f32 %v5401_v42, %v3614_v7 }
 0x6ec   :  { %v3635_v24 = vmax.f32 %v3615_v4, 0.0 }
 0x6ee   :  { %v3644_v51 = vpack.c.bf16 %v3635_v24, %v3634_v2 }
 0x6f0   :  { %5106 = vmatmul.msk.bf16.gmra.mxu2 %vm3651_vm7, %v3644_v51 }
 0x6f1   :  { %v3617_v56 = vpop.f32.mrf.mxu1 }
 0x6f2   :  { %v3618_v45 = vadd.f32 %v5401_v42, %v3617_v56 }
 0x6f4   :  { %v3636_v10 = vmax.f32 %v3618_v45, 0.0 }
 0x6f9   :  { %v3619_v63 = vpop.f32.mrf.mxu1 }
 0x6fa   :  { %v3620_v52 = vadd.f32 %v5401_v42, %v3619_v63 }
 0x6fc   :  { %v3637_v12 = vmax.f32 %v3620_v52, 0.0 }
 0x6fe   :  { %v3645_v17 = vpack.c.bf16 %v3637_v12, %v3636_v10 }
 0x700   :  { %5107 = vmatmul.msk.bf16.gmra.mxu2 %vm3651_vm7, %v3645_v17 }
 0x713   :  { %v3689_v49 = vpop.f32.mrf.mxu2 }
 0x714   :  { %v3690_v14 = vadd.f32 %v6805_v18, %v3689_v49 }
 0x716   :  { %v3729_v62 = vsub.f32 0.0, %v3690_v14 }
 0x718   :  { %v3745_v48 = vmul.f32 1.442695, %v3729_v62 }
 0x71a   :  { %5405 = vpow2.f32 %v3745_v48 }
 0x71b   :  { %v3691_v29 = vpop.f32.mrf.mxu2 }
 0x71c   :  { %v3692_v16 = vadd.f32 %v6805_v18, %v3691_v29 }
 0x71e   :  { %v3730_v38 = vsub.f32 0.0, %v3692_v16 }
 0x720   :  { %v5406_v13 = vpop.eup %5405  ;;  %v3747_v55 = vmul.f32 1.442695, %v3730_v38 }
 0x721   :  { %v3777_v42 = vadd.f32 1.0, %v5406_v13 }
 0x722   :  { %5407 = vpow2.f32 %v3747_v55 }
 0x723   :  { %5409 = vrcp.f32 %v3777_v42  ;;  %v3694_v57 = vpop.f32.mrf.mxu2  ;;  %v3804_v21 = vand.u32 2147483648, %v3777_v42  ;;  %v3802_v9 = vand.u32 2147483647, %v3777_v42  ;;  %vm3798_vm9 = vweird.f32 %v3777_v42 }
 0x724   :  { %v3695_v20 = vadd.f32 %v6805_v18, %v3694_v57 }
 0x725   :  { %v3805_v40 = vor.u32 1.1754944e-38, %v3804_v21  ;;  %vm3803_vm12 = vcmp.eq.f32.partialorder %v3802_v9, 8.507059e+37 }
 0x726   :  { %v3731_v3 = vsub.f32 0.0, %v3695_v20 }
 0x728   :  { %v5408_v11 = vpop.eup %5407  ;;  %v3749_v25 = vmul.f32 1.442695, %v3731_v3 }
 0x729   :  { %v5410_v43 = vpop.eup %5409  ;;  %v3778_v44 = vadd.f32 1.0, %v5408_v11 }
 0x72a   :  { %v3794_v47 = vmul.f32 %v5410_v43, %v3777_v42  ;;  %5411 = vpow2.f32 %v3749_v25  ;;  %vm3799_vm8 = vweird.f32 %v5410_v43 }
 0x72b   :  { %5413 = vrcp.f32 %v3778_v44  ;;  %v3696_v41 = vpop.f32.mrf.mxu2  ;;  %vm3800_vm10 = vmor %vm3798_vm9, %vm3799_vm8  ;;  %v3819_v22 = vand.u32 2147483648, %v3778_v44  ;;  %v3817_v19 = vand.u32 2147483647, %v3778_v44  ;;  %vm3813_vm14 = vweird.f32 %v3778_v44 }
 0x72c   :  { %v3795_v0 = vsub.f32 1.0, %v3794_v47  ;;  %v3697_v61 = vadd.f32 %v6805_v18, %v3696_v41 }
 0x72d   :  { %v3820_v59 = vor.u32 1.1754944e-38, %v3819_v22  ;;  %vm3818_vm0 = vcmp.eq.f32.partialorder %v3817_v19, 8.507059e+37 }
 0x72e   :  { %v3796_v27 = vmul.f32 %v5410_v43, %v3795_v0  ;;  %v3732_v26 = vsub.f32 0.0, %v3697_v61 }
 0x730   :  { %v5412_v53 = vpop.eup %5411  ;;  %v3797_v8 = vadd.f32 %v5410_v43, %v3796_v27  ;;  %v3751_v32 = vmul.f32 1.442695, %v3732_v26 }
 0x731   :  { %v5414_v28 = vpop.eup %5413  ;;  %v3779_v1 = vadd.f32 1.0, %v5412_v53 }
 0x732   :  { %v3801_v23 = vsel %vm3800_vm10, %v5410_v43, %v3797_v8  ;;  %v3809_v31 = vmul.f32 %v5414_v28, %v3778_v44  ;;  %5415 = vpow2.f32 %v3751_v32  ;;  %vm3814_vm13 = vweird.f32 %v5414_v28 }
 0x733   :  { %v3806_v15 = vsel %vm3803_vm12, %v3805_v40, %v3801_v23  ;;  %5417 = vrcp.f32 %v3779_v1  ;;  %v3699_v50 = vpop.f32.mrf.mxu2  ;;  %vm3815_vm15 = vmor %vm3813_vm14, %vm3814_vm13  ;;  %v3834_v2 = vand.u32 2147483648, %v3779_v1  ;;  %v3832_v51 = vand.u32 2147483647, %v3779_v1 }
 0x734   :  { %4034 = vst.msk [vmem:[%s7004_s6] sm:$0xff] %vm4033_vm11, %v3806_v15  ;;  %v3810_v6 = vsub.f32 1.0, %v3809_v31  ;;  %v3700_v35 = vadd.f32 %v6805_v18, %v3699_v50  ;;  %vm3828_vm2 = vweird.f32 %v3779_v1 }
 0x735   :  { %v3835_v12 = vor.u32 1.1754944e-38, %v3834_v2  ;;  %vm3833_vm4 = vcmp.eq.f32.partialorder %v3832_v51, 8.507059e+37 }
 0x736   :  { %v3811_v46 = vmul.f32 %v5414_v28, %v3810_v6  ;;  %v3733_v5 = vsub.f32 0.0, %v3700_v35 }
 0x738   :  { %v5416_v36 = vpop.eup %5415  ;;  %v3812_v30 = vadd.f32 %v5414_v28, %v3811_v46  ;;  %v3753_v54 = vmul.f32 1.442695, %v3733_v5 }
 0x739   :  { %v5418_v33 = vpop.eup %5417  ;;  %v3780_v34 = vadd.f32 1.0, %v5416_v36 }
 0x73a   :  { %v3816_v39 = vsel %vm3815_vm15, %v5414_v28, %v3812_v30  ;;  %v3824_v60 = vmul.f32 %v5418_v33, %v3779_v1  ;;  %5419 = vpow2.f32 %v3753_v54  ;;  %vm3829_vm1 = vweird.f32 %v5418_v33 }
 0x73b   :  { %v3821_v58 = vsel %vm3818_vm0, %v3820_v59, %v3816_v39  ;;  %5421 = vrcp.f32 %v3780_v34  ;;  %v3701_v37 = vpop.f32.mrf.mxu2  ;;  %vm3830_vm3 = vmor %vm3828_vm2, %vm3829_vm1  ;;  %v3849_v38 = vand.u32 2147483648, %v3780_v34  ;;  %v3847_v55 = vand.u32 2147483647, %v3780_v34 }
 0x73c   :  { %4035 = vst.msk [vmem:[%s7004_s6 + $0x8] sm:$0xff] %vm4033_vm11, %v3821_v58  ;;  %v3825_v7 = vsub.f32 1.0, %v3824_v60  ;;  %v3702_v4 = vadd.f32 %v6805_v18, %v3701_v37  ;;  %vm3843_vm6 = vweird.f32 %v3780_v34 }
 0x73d   :  { %v3850_v25 = vor.u32 1.1754944e-38, %v3849_v38  ;;  %vm3848_vm8 = vcmp.eq.f32.partialorder %v3847_v55, 8.507059e+37 }
 0x73e   :  { %v3826_v24 = vmul.f32 %v5418_v33, %v3825_v7  ;;  %v3734_v56 = vsub.f32 0.0, %v3702_v4 }
 0x740   :  { %v5420_v45 = vpop.eup %5419  ;;  %v3827_v63 = vadd.f32 %v5418_v33, %v3826_v24  ;;  %v3755_v52 = vmul.f32 1.442695, %v3734_v56 }
 0x741   :  { %v5422_v10 = vpop.eup %5421  ;;  %v3781_v17 = vadd.f32 1.0, %v5420_v45 }
 0x742   :  { %v3831_v49 = vsel %vm3830_vm3, %v5418_v33, %v3827_v63  ;;  %v3839_v14 = vmul.f32 %v5422_v10, %v3780_v34  ;;  %5423 = vpow2.f32 %v3755_v52  ;;  %vm3844_vm5 = vweird.f32 %v5422_v10 }
 0x743   :  { %v3836_v62 = vsel %vm3833_vm4, %v3835_v12, %v3831_v49  ;;  %5425 = vrcp.f32 %v3781_v17  ;;  %v3704_v48 = vpop.f32.mrf.mxu2  ;;  %vm3845_vm7 = vmor %vm3843_vm6, %vm3844_vm5  ;;  %v3864_v27 = vand.u32 2147483648, %v3781_v17  ;;  %v3862_v26 = vand.u32 2147483647, %v3781_v17 }
 0x744   :  { %4036 = vst.msk [vmem:[%s7004_s6 + $0x10] sm:$0xff] %vm4033_vm11, %v3836_v62  ;;  %v3840_v29 = vsub.f32 1.0, %v3839_v14  ;;  %v3705_v16 = vadd.f32 %v6805_v18, %v3704_v48  ;;  %vm3858_vm10 = vweird.f32 %v3781_v17 }
 0x745   :  { %v3865_v1 = vor.u32 1.1754944e-38, %v3864_v27  ;;  %vm3863_vm13 = vcmp.eq.f32.partialorder %v3862_v26, 8.507059e+37 }
 0x746   :  { %v3841_v13 = vmul.f32 %v5422_v10, %v3840_v29  ;;  %v3735_v42 = vsub.f32 0.0, %v3705_v16 }
 0x748   :  { %v5424_v57 = vpop.eup %5423  ;;  %v3842_v20 = vadd.f32 %v5422_v10, %v3841_v13  ;;  %v3757_v3 = vmul.f32 1.442695, %v3735_v42 }
 0x749   :  { %v5426_v11 = vpop.eup %5425  ;;  %v3782_v43 = vadd.f32 1.0, %v5424_v57 }
 0x74a   :  { %v3846_v44 = vsel %vm3845_vm7, %v5422_v10, %v3842_v20  ;;  %v3854_v47 = vmul.f32 %v5426_v11, %v3781_v17  ;;  %5427 = vpow2.f32 %v3757_v3  ;;  %vm3859_vm9 = vweird.f32 %v5426_v11 }
 0x74b   :  { %v3851_v41 = vsel %vm3848_vm8, %v3850_v25, %v3846_v44  ;;  %5429 = vrcp.f32 %v3782_v43  ;;  %v3706_v0 = vpop.f32.mrf.mxu2  ;;  %vm3860_vm12 = vmor %vm3858_vm10, %vm3859_vm9  ;;  %v3879_v46 = vand.u32 2147483648, %v3782_v43  ;;  %v3877_v5 = vand.u32 2147483647, %v3782_v43 }
 0x74c   :  { %4037 = vst.msk [vmem:[%s7004_s6 + $0x18] sm:$0xff] %vm4033_vm11, %v3851_v41  ;;  %v3855_v61 = vsub.f32 1.0, %v3854_v47  ;;  %v3707_v21 = vadd.f32 %v6805_v18, %v3706_v0  ;;  %vm3873_vm15 = vweird.f32 %v3782_v43 }
 0x74d   :  { %v3880_v34 = vor.u32 1.1754944e-38, %v3879_v46  ;;  %vm3878_vm1 = vcmp.eq.f32.partialorder %v3877_v5, 8.507059e+37 }
 0x74e   :  { %v3856_v9 = vmul.f32 %v5426_v11, %v3855_v61  ;;  %v3736_v53 = vsub.f32 0.0, %v3707_v21 }
 0x750   :  { %v5428_v8 = vpop.eup %5427  ;;  %v3857_v32 = vadd.f32 %v5426_v11, %v3856_v9  ;;  %v3759_v28 = vmul.f32 1.442695, %v3736_v53 }
 0x751   :  { %v5430_v40 = vpop.eup %5429  ;;  %v3783_v23 = vadd.f32 1.0, %v5428_v8 }
 0x752   :  { %v3861_v31 = vsel %vm3860_vm12, %v5426_v11, %v3857_v32  ;;  %v3869_v15 = vmul.f32 %v5430_v40, %v3782_v43  ;;  %5431 = vpow2.f32 %v3759_v28  ;;  %vm3874_vm14 = vweird.f32 %v5430_v40 }
 0x753   :  { %v3866_v50 = vsel %vm3863_vm13, %v3865_v1, %v3861_v31  ;;  %5433 = vrcp.f32 %v3783_v23  ;;  %v3709_v6 = vpop.f32.mrf.mxu2  ;;  %vm3875_vm0 = vmor %vm3873_vm15, %vm3874_vm14  ;;  %v3894_v24 = vand.u32 2147483648, %v3783_v23  ;;  %v3892_v56 = vand.u32 2147483647, %v3783_v23 }
 0x754   :  { %4038 = vst.msk [vmem:[%s7004_s6 + $0x20] sm:$0xff] %vm4033_vm11, %v3866_v50  ;;  %v3870_v35 = vsub.f32 1.0, %v3869_v15  ;;  %v3710_v22 = vadd.f32 %v6805_v18, %v3709_v6  ;;  %vm3888_vm3 = vweird.f32 %v3783_v23 }
 0x755   :  { %v3895_v17 = vor.u32 1.1754944e-38, %v3894_v24  ;;  %vm3893_vm5 = vcmp.eq.f32.partialorder %v3892_v56, 8.507059e+37 }
 0x756   :  { %v3871_v19 = vmul.f32 %v5430_v40, %v3870_v35  ;;  %v3737_v36 = vsub.f32 0.0, %v3710_v22 }
 0x758   :  { %v5432_v30 = vpop.eup %5431  ;;  %v3872_v54 = vadd.f32 %v5430_v40, %v3871_v19  ;;  %v3761_v33 = vmul.f32 1.442695, %v3737_v36 }
 0x759   :  { %v5434_v59 = vpop.eup %5433  ;;  %v3784_v39 = vadd.f32 1.0, %v5432_v30 }
 0x75a   :  { %v3876_v60 = vsel %vm3875_vm0, %v5430_v40, %v3872_v54  ;;  %v3884_v58 = vmul.f32 %v5434_v59, %v3783_v23  ;;  %5435 = vpow2.f32 %v3761_v33  ;;  %vm3889_vm2 = vweird.f32 %v5434_v59 }
 0x75b   :  { %v3881_v37 = vsel %vm3878_vm1, %v3880_v34, %v3876_v60  ;;  %5437 = vrcp.f32 %v3784_v39  ;;  %v3711_v7 = vpop.f32.mrf.mxu2  ;;  %vm3890_vm4 = vmor %vm3888_vm3, %vm3889_vm2  ;;  %v3909_v13 = vand.u32 2147483648, %v3784_v39  ;;  %v3907_v42 = vand.u32 2147483647, %v3784_v39 }
 0x75c   :  { %4039 = vst.msk [vmem:[%s7004_s6 + $0x28] sm:$0xff] %vm4033_vm11, %v3881_v37  ;;  %v3885_v4 = vsub.f32 1.0, %v3884_v58  ;;  %v3712_v2 = vadd.f32 %v6805_v18, %v3711_v7  ;;  %vm3903_vm7 = vweird.f32 %v3784_v39 }
 0x75d   :  { %v3910_v43 = vor.u32 1.1754944e-38, %v3909_v13  ;;  %vm3908_vm9 = vcmp.eq.f32.partialorder %v3907_v42, 8.507059e+37 }
 0x75e   :  { %v3886_v51 = vmul.f32 %v5434_v59, %v3885_v4  ;;  %v3738_v45 = vsub.f32 0.0, %v3712_v2 }
 0x760   :  { %v5436_v63 = vpop.eup %5435  ;;  %v3887_v52 = vadd.f32 %v5434_v59, %v3886_v51  ;;  %v3763_v10 = vmul.f32 1.442695, %v3738_v45 }
 0x761   :  { %v5438_v12 = vpop.eup %5437  ;;  %v3785_v49 = vadd.f32 1.0, %v5436_v63 }
 0x762   :  { %v3891_v14 = vsel %vm3890_vm4, %v5434_v59, %v3887_v52  ;;  %v3899_v62 = vmul.f32 %v5438_v12, %v3784_v39  ;;  %5439 = vpow2.f32 %v3763_v10  ;;  %vm3904_vm6 = vweird.f32 %v5438_v12 }
 0x763   :  { %v3896_v48 = vsel %vm3893_vm5, %v3895_v17, %v3891_v14  ;;  %5441 = vrcp.f32 %v3785_v49  ;;  %v3714_v29 = vpop.f32.mrf.mxu2  ;;  %vm3905_vm8 = vmor %vm3903_vm7, %vm3904_vm6  ;;  %v3924_v9 = vand.u32 2147483648, %v3785_v49  ;;  %v3922_v53 = vand.u32 2147483647, %v3785_v49 }
 0x764   :  { %4040 = vst.msk [vmem:[%s7004_s6 + $0x30] sm:$0xff] %vm4033_vm11, %v3896_v48  ;;  %v3900_v16 = vsub.f32 1.0, %v3899_v62  ;;  %v3715_v38 = vadd.f32 %v6805_v18, %v3714_v29  ;;  %vm3918_vm12 = vweird.f32 %v3785_v49 }
 0x765   :  { %v3925_v23 = vor.u32 1.1754944e-38, %v3924_v9  ;;  %vm3923_vm14 = vcmp.eq.f32.partialorder %v3922_v53, 8.507059e+37 }
 0x766   :  { %v3901_v55 = vmul.f32 %v5438_v12, %v3900_v16  ;;  %v3739_v57 = vsub.f32 0.0, %v3715_v38 }
 0x768   :  { %v5440_v20 = vpop.eup %5439  ;;  %v3902_v3 = vadd.f32 %v5438_v12, %v3901_v55  ;;  %v3765_v11 = vmul.f32 1.442695, %v3739_v57 }
 0x769   :  { %v5442_v25 = vpop.eup %5441  ;;  %v3786_v44 = vadd.f32 1.0, %v5440_v20 }
 0x76a   :  { %v3906_v47 = vsel %vm3905_vm8, %v5438_v12, %v3902_v3  ;;  %v3914_v41 = vmul.f32 %v5442_v25, %v3785_v49  ;;  %5443 = vpow2.f32 %v3765_v11  ;;  %vm3919_vm10 = vweird.f32 %v5442_v25 }
 0x76b   :  { %v3911_v0 = vsel %vm3908_vm9, %v3910_v43, %v3906_v47  ;;  %5445 = vrcp.f32 %v3786_v44  ;;  %v3716_v61 = vpop.f32.mrf.mxu2  ;;  %vm3920_vm13 = vmor %vm3918_vm12, %vm3919_vm10  ;;  %v3939_v19 = vand.u32 2147483648, %v3786_v44  ;;  %v3937_v36 = vand.u32 2147483647, %v3786_v44 }
 0x76c   :  { %4041 = vst.msk [vmem:[%s7004_s6 + $0x38] sm:$0xff] %vm4033_vm11, %v3911_v0  ;;  %v3915_v21 = vsub.f32 1.0, %v3914_v41  ;;  %v3717_v27 = vadd.f32 %v6805_v18, %v3716_v61  ;;  %vm3933_vm0 = vweird.f32 %v3786_v44 }
 0x76d   :  { %v3940_v39 = vor.u32 1.1754944e-38, %v3939_v19  ;;  %vm3938_vm2 = vcmp.eq.f32.partialorder %v3937_v36, 8.507059e+37 }
 0x76e   :  { %v3916_v26 = vmul.f32 %v5442_v25, %v3915_v21  ;;  %v3740_v8 = vsub.f32 0.0, %v3717_v27 }
 0x770   :  { %v5444_v32 = vpop.eup %5443  ;;  %v3917_v28 = vadd.f32 %v5442_v25, %v3916_v26  ;;  %v3767_v40 = vmul.f32 1.442695, %v3740_v8 }
 0x771   :  { %v5446_v1 = vpop.eup %5445  ;;  %v3787_v31 = vadd.f32 1.0, %v5444_v32 }
 0x772   :  { %v3921_v15 = vsel %vm3920_vm13, %v5442_v25, %v3917_v28  ;;  %v3929_v50 = vmul.f32 %v5446_v1, %v3786_v44  ;;  %5447 = vpow2.f32 %v3767_v40  ;;  %vm3934_vm15 = vweird.f32 %v5446_v1 }
 0x773   :  { %v3926_v6 = vsel %vm3923_vm14, %v3925_v23, %v3921_v15  ;;  %5449 = vrcp.f32 %v3787_v31  ;;  %v3719_v35 = vpop.f32.mrf.mxu2  ;;  %vm3935_vm1 = vmor %vm3933_vm0, %vm3934_vm15  ;;  %v3954_v51 = vand.u32 2147483648, %v3787_v31  ;;  %v3952_v45 = vand.u32 2147483647, %v3787_v31 }
 0x774   :  { %4042 = vst.msk [vmem:[%s7004_s6 + $0x40] sm:$0xff] %vm4033_vm11, %v3926_v6  ;;  %v3930_v22 = vsub.f32 1.0, %v3929_v50  ;;  %v3720_v46 = vadd.f32 %v6805_v18, %v3719_v35  ;;  %vm3948_vm4 = vweird.f32 %v3787_v31 }
 0x775   :  { %v3955_v49 = vor.u32 1.1754944e-38, %v3954_v51  ;;  %vm3953_vm6 = vcmp.eq.f32.partialorder %v3952_v45, 8.507059e+37 }
 0x776   :  { %v3931_v5 = vmul.f32 %v5446_v1, %v3930_v22  ;;  %v3741_v30 = vsub.f32 0.0, %v3720_v46 }
 0x778   :  { %v5448_v54 = vpop.eup %5447  ;;  %v3932_v33 = vadd.f32 %v5446_v1, %v3931_v5  ;;  %v3769_v59 = vmul.f32 1.442695, %v3741_v30 }
 0x779   :  { %v5450_v34 = vpop.eup %5449  ;;  %v3788_v60 = vadd.f32 1.0, %v5448_v54 }
 0x77a   :  { %v3936_v58 = vsel %vm3935_vm1, %v5446_v1, %v3932_v33  ;;  %v3944_v37 = vmul.f32 %v5450_v34, %v3787_v31  ;;  %5451 = vpow2.f32 %v3769_v59  ;;  %vm3949_vm3 = vweird.f32 %v5450_v34 }
 0x77b   :  { %v3941_v7 = vsel %vm3938_vm2, %v3940_v39, %v3936_v58  ;;  %5453 = vrcp.f32 %v3788_v60  ;;  %v3721_v4 = vpop.f32.mrf.mxu2  ;;  %vm3950_vm5 = vmor %vm3948_vm4, %vm3949_vm3  ;;  %v3969_v55 = vand.u32 2147483648, %v3788_v60  ;;  %v3967_v57 = vand.u32 2147483647, %v3788_v60 }
 0x77c   :  { %4043 = vst.msk [vmem:[%s7004_s6 + $0x48] sm:$0xff] %vm4033_vm11, %v3941_v7  ;;  %v3945_v2 = vsub.f32 1.0, %v3944_v37  ;;  %v3722_v24 = vadd.f32 %v6805_v18, %v3721_v4  ;;  %vm3963_vm8 = vweird.f32 %v3788_v60 }
 0x77d   :  { %v3970_v44 = vor.u32 1.1754944e-38, %v3969_v55  ;;  %vm3968_vm10 = vcmp.eq.f32.partialorder %v3967_v57, 8.507059e+37 }
 0x77e   :  { %v3946_v56 = vmul.f32 %v5450_v34, %v3945_v2  ;;  %v3742_v63 = vsub.f32 0.0, %v3722_v24 }
 0x780   :  { %v5452_v52 = vpop.eup %5451  ;;  %v3947_v10 = vadd.f32 %v5450_v34, %v3946_v56  ;;  %v3771_v12 = vmul.f32 1.442695, %v3742_v63 }
 0x781   :  { %v5454_v17 = vpop.eup %5453  ;;  %v3789_v14 = vadd.f32 1.0, %v5452_v52 }
 0x782   :  { %v3951_v62 = vsel %vm3950_vm5, %v5450_v34, %v3947_v10  ;;  %v3959_v48 = vmul.f32 %v5454_v17, %v3788_v60  ;;  %5455 = vpow2.f32 %v3771_v12  ;;  %vm3964_vm7 = vweird.f32 %v5454_v17 }
 0x783   :  { %v3956_v29 = vsel %vm3953_vm6, %v3955_v49, %v3951_v62  ;;  %5457 = vrcp.f32 %v3789_v14  ;;  %v3724_v16 = vpop.f32.mrf.mxu2  ;;  %vm3965_vm9 = vmor %vm3963_vm8, %vm3964_vm7  ;;  %v3984_v26 = vand.u32 2147483648, %v3789_v14  ;;  %v3982_v8 = vand.u32 2147483647, %v3789_v14 }
 0x784   :  { %4044 = vst.msk [vmem:[%s7004_s6 + $0x50] sm:$0xff] %vm4033_vm11, %v3956_v29  ;;  %v3960_v38 = vsub.f32 1.0, %v3959_v48  ;;  %v3725_v13 = vadd.f32 %v6805_v18, %v3724_v16  ;;  %vm3978_vm13 = vweird.f32 %v3789_v14 }
 0x785   :  { %v3985_v31 = vor.u32 1.1754944e-38, %v3984_v26  ;;  %vm3983_vm15 = vcmp.eq.f32.partialorder %v3982_v8, 8.507059e+37 }
 0x786   :  { %v3961_v42 = vmul.f32 %v5454_v17, %v3960_v38  ;;  %v3743_v20 = vsub.f32 0.0, %v3725_v13 }
 0x788   :  { %v5456_v3 = vpop.eup %5455  ;;  %v3962_v11 = vadd.f32 %v5454_v17, %v3961_v42  ;;  %v3773_v25 = vmul.f32 1.442695, %v3743_v20 }
 0x789   :  { %v5458_v43 = vpop.eup %5457  ;;  %v3790_v47 = vadd.f32 1.0, %v5456_v3 }
 0x78a   :  { %v3966_v41 = vsel %vm3965_vm9, %v5454_v17, %v3962_v11  ;;  %v3974_v0 = vmul.f32 %v5458_v43, %v3789_v14  ;;  %5459 = vpow2.f32 %v3773_v25  ;;  %vm3979_vm12 = vweird.f32 %v5458_v43 }
 0x78b   :  { %v3971_v61 = vsel %vm3968_vm10, %v3970_v44, %v3966_v41  ;;  %5461 = vrcp.f32 %v3790_v47  ;;  %v3726_v21 = vpop.f32.mrf.mxu2  ;;  %vm3980_vm14 = vmor %vm3978_vm13, %vm3979_vm12  ;;  %v3999_v22 = vand.u32 2147483648, %v3790_v47  ;;  %v3997_v19 = vand.u32 2147483647, %v3790_v47 }
 0x78c   :  { %4045 = vst.msk [vmem:[%s7004_s6 + $0x58] sm:$0xff] %vm4033_vm11, %v3971_v61  ;;  %v3975_v27 = vsub.f32 1.0, %v3974_v0  ;;  %v3727_v9 = vadd.f32 %v6805_v18, %v3726_v21  ;;  %vm3993_vm1 = vweird.f32 %v3790_v47 }
 0x78d   :  { %v4000_v54 = vor.u32 1.1754944e-38, %v3999_v22  ;;  %vm3998_vm3 = vcmp.eq.f32.partialorder %v3997_v19, 8.507059e+37 }
 0x78e   :  { %v3976_v53 = vmul.f32 %v5458_v43, %v3975_v27  ;;  %v3744_v32 = vsub.f32 0.0, %v3727_v9 }
 0x790   :  { %v5460_v28 = vpop.eup %5459  ;;  %v3977_v40 = vadd.f32 %v5458_v43, %v3976_v53  ;;  %v3775_v1 = vmul.f32 1.442695, %v3744_v32 }
 0x791   :  { %v5462_v23 = vpop.eup %5461  ;;  %v3791_v15 = vadd.f32 1.0, %v5460_v28 }
 0x792   :  { %v3981_v50 = vsel %vm3980_vm14, %v5458_v43, %v3977_v40  ;;  %v3989_v6 = vmul.f32 %v5462_v23, %v3790_v47  ;;  %5463 = vpow2.f32 %v3775_v1  ;;  %vm3994_vm0 = vweird.f32 %v5462_v23 }
 0x793   :  { %v3986_v35 = vsel %vm3983_vm15, %v3985_v31, %v3981_v50  ;;  %5465 = vrcp.f32 %v3791_v15  ;;  %vm3995_vm2 = vmor %vm3993_vm1, %vm3994_vm0  ;;  %v4014_v58 = vand.u32 2147483648, %v3791_v15  ;;  %v4012_v7 = vand.u32 2147483647, %v3791_v15 }
 0x794   :  { %4046 = vst.msk [vmem:[%s7004_s6 + $0x60] sm:$0xff] %vm4033_vm11, %v3986_v35  ;;  %v3990_v18 = vsub.f32 1.0, %v3989_v6  ;;  %vm4008_vm5 = vweird.f32 %v3791_v15 }
 0x795   :  { %v4015_v24 = vor.u32 1.1754944e-38, %v4014_v58  ;;  %vm4013_vm7 = vcmp.eq.f32.partialorder %v4012_v7, 8.507059e+37 }
 0x796   :  { %v3991_v46 = vmul.f32 %v5462_v23, %v3990_v18 }
 0x798   :  { %v5464_v5 = vpop.eup %5463  ;;  %v3992_v36 = vadd.f32 %v5462_v23, %v3991_v46 }
 0x799   :  { %v5466_v30 = vpop.eup %5465  ;;  %v3792_v33 = vadd.f32 1.0, %v5464_v5 }
 0x79a   :  { %v3996_v59 = vsel %vm3995_vm2, %v5462_v23, %v3992_v36  ;;  %v4004_v34 = vmul.f32 %v5466_v30, %v3791_v15  ;;  %vm4009_vm4 = vweird.f32 %v5466_v30 }
 0x79b   :  { %v4001_v39 = vsel %vm3998_vm3, %v4000_v54, %v3996_v59  ;;  %5467 = vrcp.f32 %v3792_v33  ;;  %vm4010_vm6 = vmor %vm4008_vm5, %vm4009_vm4  ;;  %v4029_v52 = vand.u32 2147483648, %v3792_v33  ;;  %v4027_v12 = vand.u32 2147483647, %v3792_v33 }
 0x79c   :  { %4047 = vst.msk [vmem:[%s7004_s6 + $0x68] sm:$0xff] %vm4033_vm11, %v4001_v39  ;;  %v4005_v60 = vsub.f32 1.0, %v4004_v34  ;;  %vm4023_vm9 = vweird.f32 %v3792_v33 }
 0x79d   :  { %v4030_v49 = vor.u32 1.1754944e-38, %v4029_v52  ;;  %vm4028_vm12 = vcmp.eq.f32.partialorder %v4027_v12, 8.507059e+37 }
 0x79e   :  { %v4006_v37 = vmul.f32 %v5466_v30, %v4005_v60 }
 0x7a0   :  { %v4007_v4 = vadd.f32 %v5466_v30, %v4006_v37 }
 0x7a1   :  { %v5468_v2 = vpop.eup %5467 }
 0x7a2   :  { %v4011_v51 = vsel %vm4010_vm6, %v5466_v30, %v4007_v4  ;;  %v4019_v56 = vmul.f32 %v5468_v2, %v3792_v33  ;;  %vm4024_vm8 = vweird.f32 %v5468_v2 }
 0x7a3   :  { %v4016_v45 = vsel %vm4013_vm7, %v4015_v24, %v4011_v51  ;;  %vm4025_vm10 = vmor %vm4023_vm9, %vm4024_vm8 }
 0x7a4   :  { %4048 = vst.msk [vmem:[%s7004_s6 + $0x70] sm:$0xff] %vm4033_vm11, %v4016_v45  ;;  %v4020_v63 = vsub.f32 1.0, %v4019_v56 }
 0x7a6   :  { %v4021_v10 = vmul.f32 %v5468_v2, %v4020_v63 }
 0x7a8   :  { %v4022_v17 = vadd.f32 %v5468_v2, %v4021_v10 }
 0x7aa   :  { %v4026_v14 = vsel %vm4025_vm10, %v5468_v2, %v4022_v17 }
 0x7ab   :  { %v4031_v62 = vsel %vm4028_vm12, %v4030_v49, %v4026_v14 }
 0x7ac   :  { %4049 = vst.msk [vmem:[%s7004_s6 + $0x78] sm:$0xff] %vm4033_vm11, %v4031_v62 }
 0x7ad   :  { %4054 = vsyncpa [#allocation4], 1 }
 0x7ae   :  { %4055 = vsyncpa [#allocation6], 1 }

</bundles_post_ra>
